<compile_context>
chip_gen: v6e
topology: v6e:2x2x1
jax: 0.10.0
libtpu: 0.0.40
codegen_flags: <defaults>
</compile_context>

<pallas_src>
import functools

import jax
import jax.numpy as jnp
import numpy as np
from jax import lax
from jax.experimental import pallas as pl
from jax.experimental.pallas import tpu as pltpu

LANE = 128      # TPU lane width: all channel dims are padded to a multiple of this
_HALO = 8       # interior column offset inside the padded scratch (sublane aligned)


def _round_up(x, m):
    return (x + m - 1) // m * m


# ----------------------------------------------------------------------------
# Host-side helpers: bilinear matrices, im2col weight packing, BN folding.
# ----------------------------------------------------------------------------
def _bilinear_1d_matrix(n_in, scale):
    """(n_in*scale, n_in) matrix equal to F.interpolate(mode='bilinear',
    align_corners=False) along one axis (half-pixel centers, edge clamp)."""
    n_out = n_in * scale
    m = np.zeros((n_out, n_in), np.float32)
    for o in range(n_out):
        src = (o + 0.5) / scale - 0.5
        i0 = int(np.floor(src))
        w1 = src - i0
        i0c = min(max(i0, 0), n_in - 1)
        i1c = min(max(i0 + 1, 0), n_in - 1)
        m[o, i0c] += 1.0 - w1
        m[o, i1c] += w1
    return m


def _bilinear_2d_matrix(h, w, scale, pad_cols):
    """(h*scale*w*scale, pad_cols) matrix acting on spatially-flattened NHWC maps.
    Interpolation weights for scale in {2,4} are exactly representable in bf16."""
    m = np.kron(_bilinear_1d_matrix(h, scale), _bilinear_1d_matrix(w, scale))
    out = np.zeros((m.shape[0], pad_cols), np.float32)
    out[:, :m.shape[1]] = m
    return jnp.asarray(out, jnp.bfloat16)


def _pack_conv3x3(w_hwio, cin_pad, cout_pad):
    """HWIO (3,3,cin,cout) -> im2col weight matrix (9*cin_pad, cout_pad), bf16.
    Row order matches the in-kernel im2col: tap-major (ky, kx), then channel."""
    k = w_hwio.shape[0]
    cin, cout = w_hwio.shape[2], w_hwio.shape[3]
    wp = jnp.zeros((k * k, cin_pad, cout_pad), jnp.float32)
    wp = wp.at[:, :cin, :cout].set(w_hwio.reshape(k * k, cin, cout))
    return wp.reshape(k * k * cin_pad, cout_pad).astype(jnp.bfloat16)


def _pack_conv1x1(w_hwio, cin_pad, cout_pad):
    cin, cout = w_hwio.shape[2], w_hwio.shape[3]
    wp = jnp.zeros((cin_pad, cout_pad), jnp.float32)
    wp = wp.at[:cin, :cout].set(w_hwio[0, 0])
    return wp.astype(jnp.bfloat16)


def _pad_affine(scale, shift, c_pad):
    c = scale.shape[0]
    s = jnp.ones((1, c_pad), jnp.float32).at[0, :c].set(scale)
    b = jnp.zeros((1, c_pad), jnp.float32).at[0, :c].set(shift)
    return s, b


def fold_bn(gamma, beta, mean, var, eps=1e-5):
    scale = gamma / jnp.sqrt(var + eps)
    shift = beta - mean * scale
    return scale, shift


# ----------------------------------------------------------------------------
# In-kernel building blocks.
# ----------------------------------------------------------------------------
def _zero_fill(ref):
    ref[...] = jnp.zeros(ref.shape, ref.dtype)


def _store_interior(pad_ref, val_hwc, H, W):
    # Row offset 1 is on an untiled (major) dim; column offset _HALO=8 and width W
    # (multiple of 8) keep the store sublane-aligned (no masked stores).
    pad_ref[1:H + 1, _HALO:_HALO + W, :] = val_hwc


def _conv3x3_matmul(pad_ref, w_ref, H, W, C):
    """3x3 'same' conv as ONE bf16 MXU matmul with f32 accumulation.
    pad_ref holds the zero-haloed input; column order of the im2col matrix
    (tap-major, then channel) matches _pack_conv3x3."""
    xp = pad_ref[...]                                      # (H+2, W+2*_HALO, C) f32
    cols = []
    for ky in range(3):
        for kx in range(3):
            patch = xp[ky:ky + H, _HALO - 1 + kx:_HALO - 1 + kx + W, :]
            cols.append(patch.reshape(H * W, C).astype(jnp.bfloat16))
    im2col = jnp.concatenate(cols, axis=-1)                # (H*W, 9*C) bf16
    return jnp.dot(im2col, w_ref[...], preferred_element_type=jnp.float32)


# ----------------------------------------------------------------------------
# Stage 1: up4(x1) ++ x2  ->  conv3x3+BN+ReLU  ->  conv3x3+BN+ReLU  (one kernel)
# ----------------------------------------------------------------------------
def _stage1_kernel(x2_ref, x1f_ref, u4_ref, w1a_ref, w1b_ref, s1_ref, b1_ref,
                   w2_ref, s2_ref, b2_ref, mid_ref, pad_ref, *, H, W):
    C = pad_ref.shape[-1]

    # Zero the halo scratch each step (scratch is per-core and uninitialized; grid
    # steps may be split across TensorCores, so no program_id==0-only init).
    _zero_fill(pad_ref)

    # Bilinear x4 upsample of the low-res input: one matmul with precomputed weights.
    x1_up = jnp.dot(u4_ref[...], x1f_ref[0].astype(jnp.bfloat16),
                    preferred_element_type=jnp.float32)            # (H*W, C)

    # conv1 over concat([x2, up4(x1)]): two im2col matmuls accumulated (the weight
    # matrix is split by concat source, so no channel concat is materialized).
    _store_interior(pad_ref, x2_ref[0], H, W)
    acc = _conv3x3_matmul(pad_ref, w1a_ref, H, W, C)
    _store_interior(pad_ref, x1_up.reshape(H, W, C), H, W)
    acc = acc + _conv3x3_matmul(pad_ref, w1b_ref, H, W, C)
    y1 = jnp.maximum(acc * s1_ref[...] + b1_ref[...], 0.0)          # (H*W, C)

    # conv2 (kept in VMEM, no HBM round trip for y1).
    _store_interior(pad_ref, y1.reshape(H, W, C), H, W)
    acc2 = _conv3x3_matmul(pad_ref, w2_ref, H, W, C)
    mid_ref[0] = jnp.maximum(acc2 * s2_ref[...] + b2_ref[...], 0.0)  # lane-dense store


def _fpn_stage1(x2_p, x1_p, u4, w1a, w1b, s1, b1, w2, s2, b2):
    N, H, W, P = x2_p.shape
    hwp = x1_p.shape[1]
    kernel = functools.partial(_stage1_kernel, H=H, W=W)
    return pl.pallas_call(
        kernel,
        out_shape=jax.ShapeDtypeStruct((N, H * W, P), jnp.float32),
        grid=(N,),
        in_specs=[
            pl.BlockSpec((1, H, W, P), lambda n: (n, 0, 0, 0)),   # x2 (padded NHWC)
            pl.BlockSpec((1, hwp, P), lambda n: (n, 0, 0)),       # x1 (spatially flat)
            pl.BlockSpec((H * W, hwp), lambda n: (0, 0)),         # up-x4 matrix
            pl.BlockSpec((9 * P, P), lambda n: (0, 0)),           # w1 (x2 part)
            pl.BlockSpec((9 * P, P), lambda n: (0, 0)),           # w1 (x1 part)
            pl.BlockSpec((1, P), lambda n: (0, 0)),               # s1
            pl.BlockSpec((1, P), lambda n: (0, 0)),               # b1
            pl.BlockSpec((9 * P, P), lambda n: (0, 0)),           # w2
            pl.BlockSpec((1, P), lambda n: (0, 0)),               # s2
            pl.BlockSpec((1, P), lambda n: (0, 0)),               # b2
        ],
        out_specs=pl.BlockSpec((1, H * W, P), lambda n: (n, 0, 0)),
        scratch_shapes=[pltpu.VMEM((H + 2, W + 2 * _HALO, P), jnp.float32)],
        compiler_params=pltpu.CompilerParams(
            dimension_semantics=("parallel",),
            vmem_limit_bytes=48 * 1024 * 1024,   # > v5e's 16MiB default, < v7x physical
        ),
    )(x2_p, x1_p, u4, w1a, w1b, s1, b1, w2, s2, b2)


# ----------------------------------------------------------------------------
# Stage 2: up2(mid) -> conv3x3+BN+ReLU -> 1x1 conv (+bias)  (one kernel)
# ----------------------------------------------------------------------------
def _stage2_kernel(midf_ref, u2_ref, w3_ref, s3_ref, b3_ref, w4_ref, b4_ref,
                   out_ref, pad_ref, *, H, W):
    C = pad_ref.shape[-1]

    _zero_fill(pad_ref)

    # Bilinear x2 upsample of the mid feature map: one matmul, stays in VMEM.
    up = jnp.dot(u2_ref[...], midf_ref[0].astype(jnp.bfloat16),
                 preferred_element_type=jnp.float32)               # (H*W, C)

    # conv3 + folded BN + ReLU.
    _store_interior(pad_ref, up.reshape(H, W, C), H, W)
    acc = _conv3x3_matmul(pad_ref, w3_ref, H, W, C)
    y3 = jnp.maximum(acc * s3_ref[...] + b3_ref[...], 0.0)          # (H*W, Cout_pad)

    # Fused 1x1 conv (+ bias) epilogue: no extra HBM write/read of the largest tensor.
    out_ref[0] = jnp.dot(y3.astype(jnp.bfloat16), w4_ref[...],
                         preferred_element_type=jnp.float32) + b4_ref[...]


def _fpn_stage2(mid_flat, u2, w3, s3, b3, w4, b4, H2, W2):
    N, hw_in, P_in = mid_flat.shape
    P_out = w3.shape[1]
    kernel = functools.partial(_stage2_kernel, H=H2, W=W2)
    return pl.pallas_call(
        kernel,
        out_shape=jax.ShapeDtypeStruct((N, H2 * W2, P_out), jnp.float32),
        grid=(N,),
        in_specs=[
            pl.BlockSpec((1, hw_in, P_in), lambda n: (n, 0, 0)),   # mid (spatially flat)
            pl.BlockSpec((H2 * W2, hw_in), lambda n: (0, 0)),      # up-x2 matrix
            pl.BlockSpec((9 * P_in, P_out), lambda n: (0, 0)),     # w3
            pl.BlockSpec((1, P_out), lambda n: (0, 0)),            # s3
            pl.BlockSpec((1, P_out), lambda n: (0, 0)),            # b3
            pl.BlockSpec((P_out, P_out), lambda n: (0, 0)),        # w4 (1x1)
            pl.BlockSpec((1, P_out), lambda n: (0, 0)),            # bias4
        ],
        out_specs=pl.BlockSpec((1, H2 * W2, P_out), lambda n: (n, 0, 0)),
        scratch_shapes=[pltpu.VMEM((H2 + 2, W2 + 2 * _HALO, P_in), jnp.float32)],
        compiler_params=pltpu.CompilerParams(
            dimension_semantics=("parallel",),
            vmem_limit_bytes=48 * 1024 * 1024,
        ),
    )(mid_flat, u2, w3, s3, b3, w4, b4)


# ----------------------------------------------------------------------------
# FPN_LSS module (eval-mode BatchNorm, deterministic synthetic parameters).
# ----------------------------------------------------------------------------
class FPN_LSS_Pallas:
    def __init__(self, in_channels, out_channels, key,
                 scale_factor=4, input_feature_index=(0, 2), extra_upsample=2):
        self.input_feature_index = input_feature_index
        self.scale_factor = scale_factor
        self.extra_upsample = extra_upsample is not None
        self.extra_factor = extra_upsample
        self.out_channels = out_channels
        cf = 2 if self.extra_upsample else 1
        mid = out_channels * cf

        ks = jax.random.split(key, 16)

        def w_init(k, shape):   # HWIO conv weights
            fan_in = shape[0] * shape[1] * shape[2]
            return jax.random.normal(k, shape, jnp.float32) / np.sqrt(fan_in)

        def bn_init(k, c):
            k1, k2, k3, k4 = jax.random.split(k, 4)
            gamma = 1.0 + 0.1 * jax.random.normal(k1, (c,), jnp.float32)
            beta = 0.1 * jax.random.normal(k2, (c,), jnp.float32)
            mean = 0.1 * jax.random.normal(k3, (c,), jnp.float32)
            var = jax.random.uniform(k4, (c,), jnp.float32, 0.5, 1.5)
            return fold_bn(gamma, beta, mean, var)

        # self.conv : conv3x3 -> BN -> ReLU -> conv3x3 -> BN -> ReLU
        self.w1 = w_init(ks[0], (3, 3, in_channels, mid))
        self.s1, self.b1 = bn_init(ks[1], mid)
        self.w2 = w_init(ks[2], (3, 3, mid, mid))
        self.s2, self.b2 = bn_init(ks[3], mid)

        if self.extra_upsample:
            # self.up2 : up x2 -> conv3x3 -> BN -> ReLU -> conv1x1 (bias)
            self.w3 = w_init(ks[4], (3, 3, mid, out_channels))
            self.s3, self.b3 = bn_init(ks[5], out_channels)
            self.w4 = w_init(ks[6], (1, 1, out_channels, out_channels))
            self.bias4 = 0.1 * jax.random.normal(ks[7], (out_channels,), jnp.float32)

    def __call__(self, feats_nchw):
        # PyTorch NCHW boundary; compute in (channel-padded) NHWC.
        x2 = jnp.transpose(feats_nchw[self.input_feature_index[0]], (0, 2, 3, 1))
        x1 = jnp.transpose(feats_nchw[self.input_feature_index[1]], (0, 2, 3, 1))
        N, H, W, C2 = x2.shape
        _, h, w, C1 = x1.shape
        assert h * self.scale_factor == H and w * self.scale_factor == W
        Cmid = self.w1.shape[-1]

        # ---------------- stage 1: up4(x1) ++ x2 -> conv1 -> conv2 ----------------
        P1 = _round_up(max(C2, C1, Cmid), LANE)    # single lane pad for the stage
        hwp = _round_up(h * w, LANE)

        x2_p = jnp.zeros((N, H, W, P1), jnp.float32).at[..., :C2].set(x2)
        x1_p = jnp.zeros((N, hwp, P1), jnp.float32).at[:, :h * w, :C1].set(
            x1.reshape(N, h * w, C1))
        u4 = _bilinear_2d_matrix(h, w, self.scale_factor, hwp)
        w1a = _pack_conv3x3(self.w1[:, :, :C2, :], P1, P1)   # x2 part of the concat
        w1b = _pack_conv3x3(self.w1[:, :, C2:, :], P1, P1)   # up4(x1) part
        s1, b1 = _pad_affine(self.s1, self.b1, P1)
        w2p = _pack_conv3x3(self.w2, P1, P1)
        s2, b2 = _pad_affine(self.s2, self.b2, P1)

        mid = _fpn_stage1(x2_p, x1_p, u4, w1a, w1b, s1, b1, w2p, s2, b2)

        if not self.extra_upsample:
            y = mid.reshape(N, H, W, P1)[..., :Cmid]
            return jnp.transpose(y, (0, 3, 1, 2))

        # ---------------- stage 2: up2 -> conv3 -> 1x1 (+bias) --------------------
        Cout = self.out_channels
        H2, W2 = H * self.extra_factor, W * self.extra_factor
        P2 = _round_up(Cout, LANE)
        u2 = _bilinear_2d_matrix(H, W, self.extra_factor, H * W)
        w3p = _pack_conv3x3(self.w3, P1, P2)
        s3, b3 = _pad_affine(self.s3, self.b3, P2)
        w4p = _pack_conv1x1(self.w4, P2, P2)
        b4 = jnp.zeros((1, P2), jnp.float32).at[0, :Cout].set(self.bias4)

        out = _fpn_stage2(mid, u2, w3p, s3, b3, w4p, b4, H2, W2)
        y = out.reshape(N, H2, W2, P2)[..., :Cout]
        return jnp.transpose(y, (0, 3, 1, 2))   # back to NCHW


# ----------------------------------------------------------------------------
# Pure-JAX reference (lax.conv + jax.image.resize) — independent of the kernel's
# im2col packing and of its precomputed bilinear matrices, so it cross-checks
# both the conv and the upsample implementation.
# ----------------------------------------------------------------------------
def _upsample_bilinear_ref(x_nhwc, factor):
    N, H, W, C = x_nhwc.shape
    return jax.image.resize(
        x_nhwc, (N, H * factor, W * factor, C), method="bilinear"
    ).astype(jnp.float32)


def _ref_conv(x, w, scale, shift, relu, pad):
    y = lax.conv_general_dilated(
        x, w, window_strides=(1, 1), padding=[(pad, pad), (pad, pad)],
        dimension_numbers=("NHWC", "HWIO", "NHWC"))
    y = y * scale + shift
    return jnp.maximum(y, 0.0) if relu else y


def _ref_forward(m, feats):
    x2 = jnp.transpose(feats[m.input_feature_index[0]], (0, 2, 3, 1))
    x1 = jnp.transpose(feats[m.input_feature_index[1]], (0, 2, 3, 1))
    x1 = _upsample_bilinear_ref(x1, m.scale_factor)
    x = jnp.concatenate([x2, x1], axis=-1)
    x = _ref_conv(x, m.w1, m.s1, m.b1, True, 1)
    x = _ref_conv(x, m.w2, m.s2, m.b2, True, 1)
    x = _upsample_bilinear_ref(x, m.extra_factor)
    x = _ref_conv(x, m.w3, m.s3, m.b3, True, 1)
    x = _ref_conv(x, m.w4, jnp.ones_like(m.bias4), m.bias4, False, 0)
    return jnp.transpose(x, (0, 3, 1, 2))


if __name__ == "__main__":
    key = jax.random.PRNGKey(0)
    k_feat0, k_feat1, k_feat2, k_params = jax.random.split(key, 4)

    # Small shapes consistent with the module:
    #   feats[0]: high-res feature (N, C2, 16, 16)
    #   feats[2]: low-res feature  (N, C1, 4, 4)  -> bilinear x4 -> 16x16
    N, C2, C1 = 2, 4, 4
    feats = [
        jax.random.normal(k_feat0, (N, C2, 16, 16), jnp.float32),
        jax.random.normal(k_feat1, (N, 8, 8, 8), jnp.float32),   # unused (index 1)
        jax.random.normal(k_feat2, (N, C1, 4, 4), jnp.float32),
    ]

    in_channels = C2 + C1   # channels after concat
    out_channels = 8

    model = FPN_LSS_Pallas(in_channels, out_channels, k_params,
                           scale_factor=4, input_feature_index=(0, 2),
                           extra_upsample=2)

    out = jax.block_until_ready(model(feats))
    assert out.shape == (N, out_channels, 32, 32), out.shape

    ref = jax.block_until_ready(_ref_forward(model, feats))
    # bf16 MXU operands with f32 accumulation -> loosened tolerance vs. the f32 reference.
    np.testing.assert_allclose(np.asarray(out), np.asarray(ref), atol=5e-2, rtol=5e-2)

    print("KERNEL_OK")
</pallas_src>

<mosaic_0001>
module attributes {stable_mosaic.version = 11 : i64} {
  func.func @_stage1_kernel(%arg0: i32, %arg1: memref<1x16x16x128xf32, #tpu.memory_space<vmem>>, %arg2: memref<1x128x128xf32, #tpu.memory_space<vmem>>, %arg3: memref<256x128xbf16, #tpu.memory_space<vmem>>, %arg4: memref<1152x128xbf16, #tpu.memory_space<vmem>>, %arg5: memref<1152x128xbf16, #tpu.memory_space<vmem>>, %arg6: memref<1x128xf32, #tpu.memory_space<vmem>>, %arg7: memref<1x128xf32, #tpu.memory_space<vmem>>, %arg8: memref<1152x128xbf16, #tpu.memory_space<vmem>>, %arg9: memref<1x128xf32, #tpu.memory_space<vmem>>, %arg10: memref<1x128xf32, #tpu.memory_space<vmem>>, %arg11: memref<1x256x128xf32, #tpu.memory_space<vmem>>, %arg12: memref<18x32x128xf32, #tpu.memory_space<vmem>>) attributes {dimension_semantics = [#tpu.dimension_semantics<parallel>], iteration_bounds = array<i64: 2>, scalar_prefetch = 0 : i64, scratch_operands = 1 : i64, tpu.core_type = #tpu.core_type<tc>, window_params = [{transform_indices = @transform_0, window_bounds = array<i64: 1, 16, 16, 128>}, {transform_indices = @transform_1, window_bounds = array<i64: 1, 128, 128>}, {pipeline_mode = #tpu.pipeline_mode<synchronous>, transform_indices = @transform_2, window_bounds = array<i64: 256, 128>}, {pipeline_mode = #tpu.pipeline_mode<synchronous>, transform_indices = @transform_3, window_bounds = array<i64: 1152, 128>}, {pipeline_mode = #tpu.pipeline_mode<synchronous>, transform_indices = @transform_4, window_bounds = array<i64: 1152, 128>}, {pipeline_mode = #tpu.pipeline_mode<synchronous>, transform_indices = @transform_5, window_bounds = array<i64: 1, 128>}, {pipeline_mode = #tpu.pipeline_mode<synchronous>, transform_indices = @transform_6, window_bounds = array<i64: 1, 128>}, {pipeline_mode = #tpu.pipeline_mode<synchronous>, transform_indices = @transform_7, window_bounds = array<i64: 1152, 128>}, {pipeline_mode = #tpu.pipeline_mode<synchronous>, transform_indices = @transform_8, window_bounds = array<i64: 1, 128>}, {pipeline_mode = #tpu.pipeline_mode<synchronous>, transform_indices = @transform_9, window_bounds = array<i64: 1, 128>}, {transform_indices = @transform_10, window_bounds = array<i64: 1, 256, 128>}]} {
    %cst = arith.constant 0.000000e+00 : f32
    %0 = vector.broadcast %cst : f32 to vector<18x32x128xf32>
    %c0 = arith.constant 0 : index
    %c0_0 = arith.constant 0 : index
    %c0_1 = arith.constant 0 : index
    %1 = vector.load %arg12[%c0, %c0_0, %c0_1] : memref<18x32x128xf32, #tpu.memory_space<vmem>>, vector<18x32x128xf32>
    tpu.vector_store %arg12[%c0, %c0_0, %c0_1], %0 {strides = array<i32>} : memref<18x32x128xf32, #tpu.memory_space<vmem>>, vector<18x32x128xf32>,
    %c0_2 = arith.constant 0 : index
    %c0_3 = arith.constant 0 : index
    %2 = vector.load %arg3[%c0_2, %c0_3] : memref<256x128xbf16, #tpu.memory_space<vmem>>, vector<256x128xbf16>
    %c0_4 = arith.constant 0 : index
    %c0_5 = arith.constant 0 : index
    %c0_6 = arith.constant 0 : index
    %3 = vector.load %arg2[%c0_4, %c0_5, %c0_6] : memref<1x128x128xf32, #tpu.memory_space<vmem>>, vector<1x128x128xf32>
    %4 = vector.shape_cast %3 : vector<1x128x128xf32> to vector<128x128xf32>
    %5 = arith.truncf %4 : vector<128x128xf32> to vector<128x128xbf16>
    %cst_7 = arith.constant dense<0.000000e+00> : vector<256x128xf32>
    %6 = tpu.matmul %2, %5, %cst_7 {dimension_numbers = #tpu.dot_dimension_numbers<[1], [0], [0], [1], [0, 0, 1, 1], [], []>} : vector<256x128xbf16>, vector<128x128xbf16>, vector<256x128xf32> -> vector<256x128xf32>
    %c0_8 = arith.constant 0 : index
    %c0_9 = arith.constant 0 : index
    %c0_10 = arith.constant 0 : index
    %c0_11 = arith.constant 0 : index
    %7 = vector.load %arg1[%c0_8, %c0_9, %c0_10, %c0_11] : memref<1x16x16x128xf32, #tpu.memory_space<vmem>>, vector<1x16x16x128xf32>
    %8 = vector.shape_cast %7 : vector<1x16x16x128xf32> to vector<16x16x128xf32>
    %c1 = arith.constant 1 : index
    %c8 = arith.constant 8 : index
    %c0_12 = arith.constant 0 : index
    %9 = vector.load %arg12[%c1, %c8, %c0_12] : memref<18x32x128xf32, #tpu.memory_space<vmem>>, vector<16x16x128xf32>
    tpu.vector_store %arg12[%c1, %c8, %c0_12], %8 {strides = array<i32>} : memref<18x32x128xf32, #tpu.memory_space<vmem>>, vector<16x16x128xf32>,
    %c0_13 = arith.constant 0 : index
    %c0_14 = arith.constant 0 : index
    %c0_15 = arith.constant 0 : index
    %10 = vector.load %arg12[%c0_13, %c0_14, %c0_15] : memref<18x32x128xf32, #tpu.memory_space<vmem>>, vector<18x32x128xf32>
    %11 = vector.extract_strided_slice %10 {offsets = [0, 7, 0], sizes = [16, 16, 128], strides = [1, 1, 1]} : vector<18x32x128xf32> to vector<16x16x128xf32>
    %12 = vector.shape_cast %11 : vector<16x16x128xf32> to vector<256x128xf32>
    %13 = arith.truncf %12 : vector<256x128xf32> to vector<256x128xbf16>
    %14 = vector.extract_strided_slice %10 {offsets = [0, 8, 0], sizes = [16, 16, 128], strides = [1, 1, 1]} : vector<18x32x128xf32> to vector<16x16x128xf32>
    %15 = vector.shape_cast %14 : vector<16x16x128xf32> to vector<256x128xf32>
    %16 = arith.truncf %15 : vector<256x128xf32> to vector<256x128xbf16>
    %17 = vector.extract_strided_slice %10 {offsets = [0, 9, 0], sizes = [16, 16, 128], strides = [1, 1, 1]} : vector<18x32x128xf32> to vector<16x16x128xf32>
    %18 = vector.shape_cast %17 : vector<16x16x128xf32> to vector<256x128xf32>
    %19 = arith.truncf %18 : vector<256x128xf32> to vector<256x128xbf16>
    %20 = vector.extract_strided_slice %10 {offsets = [1, 7, 0], sizes = [16, 16, 128], strides = [1, 1, 1]} : vector<18x32x128xf32> to vector<16x16x128xf32>
    %21 = vector.shape_cast %20 : vector<16x16x128xf32> to vector<256x128xf32>
    %22 = arith.truncf %21 : vector<256x128xf32> to vector<256x128xbf16>
    %23 = vector.extract_strided_slice %10 {offsets = [1, 8, 0], sizes = [16, 16, 128], strides = [1, 1, 1]} : vector<18x32x128xf32> to vector<16x16x128xf32>
    %24 = vector.shape_cast %23 : vector<16x16x128xf32> to vector<256x128xf32>
    %25 = arith.truncf %24 : vector<256x128xf32> to vector<256x128xbf16>
    %26 = vector.extract_strided_slice %10 {offsets = [1, 9, 0], sizes = [16, 16, 128], strides = [1, 1, 1]} : vector<18x32x128xf32> to vector<16x16x128xf32>
    %27 = vector.shape_cast %26 : vector<16x16x128xf32> to vector<256x128xf32>
    %28 = arith.truncf %27 : vector<256x128xf32> to vector<256x128xbf16>
    %29 = vector.extract_strided_slice %10 {offsets = [2, 7, 0], sizes = [16, 16, 128], strides = [1, 1, 1]} : vector<18x32x128xf32> to vector<16x16x128xf32>
    %30 = vector.shape_cast %29 : vector<16x16x128xf32> to vector<256x128xf32>
    %31 = arith.truncf %30 : vector<256x128xf32> to vector<256x128xbf16>
    %32 = vector.extract_strided_slice %10 {offsets = [2, 8, 0], sizes = [16, 16, 128], strides = [1, 1, 1]} : vector<18x32x128xf32> to vector<16x16x128xf32>
    %33 = vector.shape_cast %32 : vector<16x16x128xf32> to vector<256x128xf32>
    %34 = arith.truncf %33 : vector<256x128xf32> to vector<256x128xbf16>
    %35 = vector.extract_strided_slice %10 {offsets = [2, 9, 0], sizes = [16, 16, 128], strides = [1, 1, 1]} : vector<18x32x128xf32> to vector<16x16x128xf32>
    %36 = vector.shape_cast %35 : vector<16x16x128xf32> to vector<256x128xf32>
    %37 = arith.truncf %36 : vector<256x128xf32> to vector<256x128xbf16>
    %38 = tpu.concatenate %13, %16, %19, %22, %25, %28, %31, %34, %37 in 1 : vector<256x128xbf16>, vector<256x128xbf16>, vector<256x128xbf16>, vector<256x128xbf16>, vector<256x128xbf16>, vector<256x128xbf16>, vector<256x128xbf16>, vector<256x128xbf16>, vector<256x128xbf16> -> vector<256x1152xbf16>
    %c0_16 = arith.constant 0 : index
    %c0_17 = arith.constant 0 : index
    %39 = vector.load %arg4[%c0_16, %c0_17] : memref<1152x128xbf16, #tpu.memory_space<vmem>>, vector<1152x128xbf16>
    %cst_18 = arith.constant dense<0.000000e+00> : vector<256x128xf32>
    %40 = tpu.matmul %38, %39, %cst_18 {dimension_numbers = #tpu.dot_dimension_numbers<[1], [0], [0], [1], [0, 0, 1, 1], [], []>} : vector<256x1152xbf16>, vector<1152x128xbf16>, vector<256x128xf32> -> vector<256x128xf32>
    %41 = vector.shape_cast %6 : vector<256x128xf32> to vector<16x16x128xf32>
    %c1_19 = arith.constant 1 : index
    %c8_20 = arith.constant 8 : index
    %c0_21 = arith.constant 0 : index
    %42 = vector.load %arg12[%c1_19, %c8_20, %c0_21] : memref<18x32x128xf32, #tpu.memory_space<vmem>>, vector<16x16x128xf32>
    tpu.vector_store %arg12[%c1_19, %c8_20, %c0_21], %41 {strides = array<i32>} : memref<18x32x128xf32, #tpu.memory_space<vmem>>, vector<16x16x128xf32>,
    %c0_22 = arith.constant 0 : index
    %c0_23 = arith.constant 0 : index
    %c0_24 = arith.constant 0 : index
    %43 = vector.load %arg12[%c0_22, %c0_23, %c0_24] : memref<18x32x128xf32, #tpu.memory_space<vmem>>, vector<18x32x128xf32>
    %44 = vector.extract_strided_slice %43 {offsets = [0, 7, 0], sizes = [16, 16, 128], strides = [1, 1, 1]} : vector<18x32x128xf32> to vector<16x16x128xf32>
    %45 = vector.shape_cast %44 : vector<16x16x128xf32> to vector<256x128xf32>
    %46 = arith.truncf %45 : vector<256x128xf32> to vector<256x128xbf16>
    %47 = vector.extract_strided_slice %43 {offsets = [0, 8, 0], sizes = [16, 16, 128], strides = [1, 1, 1]} : vector<18x32x128xf32> to vector<16x16x128xf32>
    %48 = vector.shape_cast %47 : vector<16x16x128xf32> to vector<256x128xf32>
    %49 = arith.truncf %48 : vector<256x128xf32> to vector<256x128xbf16>
    %50 = vector.extract_strided_slice %43 {offsets = [0, 9, 0], sizes = [16, 16, 128], strides = [1, 1, 1]} : vector<18x32x128xf32> to vector<16x16x128xf32>
    %51 = vector.shape_cast %50 : vector<16x16x128xf32> to vector<256x128xf32>
    %52 = arith.truncf %51 : vector<256x128xf32> to vector<256x128xbf16>
    %53 = vector.extract_strided_slice %43 {offsets = [1, 7, 0], sizes = [16, 16, 128], strides = [1, 1, 1]} : vector<18x32x128xf32> to vector<16x16x128xf32>
    %54 = vector.shape_cast %53 : vector<16x16x128xf32> to vector<256x128xf32>
    %55 = arith.truncf %54 : vector<256x128xf32> to vector<256x128xbf16>
    %56 = vector.extract_strided_slice %43 {offsets = [1, 8, 0], sizes = [16, 16, 128], strides = [1, 1, 1]} : vector<18x32x128xf32> to vector<16x16x128xf32>
    %57 = vector.shape_cast %56 : vector<16x16x128xf32> to vector<256x128xf32>
    %58 = arith.truncf %57 : vector<256x128xf32> to vector<256x128xbf16>
    %59 = vector.extract_strided_slice %43 {offsets = [1, 9, 0], sizes = [16, 16, 128], strides = [1, 1, 1]} : vector<18x32x128xf32> to vector<16x16x128xf32>
    %60 = vector.shape_cast %59 : vector<16x16x128xf32> to vector<256x128xf32>
    %61 = arith.truncf %60 : vector<256x128xf32> to vector<256x128xbf16>
    %62 = vector.extract_strided_slice %43 {offsets = [2, 7, 0], sizes = [16, 16, 128], strides = [1, 1, 1]} : vector<18x32x128xf32> to vector<16x16x128xf32>
    %63 = vector.shape_cast %62 : vector<16x16x128xf32> to vector<256x128xf32>
    %64 = arith.truncf %63 : vector<256x128xf32> to vector<256x128xbf16>
    %65 = vector.extract_strided_slice %43 {offsets = [2, 8, 0], sizes = [16, 16, 128], strides = [1, 1, 1]} : vector<18x32x128xf32> to vector<16x16x128xf32>
    %66 = vector.shape_cast %65 : vector<16x16x128xf32> to vector<256x128xf32>
    %67 = arith.truncf %66 : vector<256x128xf32> to vector<256x128xbf16>
    %68 = vector.extract_strided_slice %43 {offsets = [2, 9, 0], sizes = [16, 16, 128], strides = [1, 1, 1]} : vector<18x32x128xf32> to vector<16x16x128xf32>
    %69 = vector.shape_cast %68 : vector<16x16x128xf32> to vector<256x128xf32>
    %70 = arith.truncf %69 : vector<256x128xf32> to vector<256x128xbf16>
    %71 = tpu.concatenate %46, %49, %52, %55, %58, %61, %64, %67, %70 in 1 : vector<256x128xbf16>, vector<256x128xbf16>, vector<256x128xbf16>, vector<256x128xbf16>, vector<256x128xbf16>, vector<256x128xbf16>, vector<256x128xbf16>, vector<256x128xbf16>, vector<256x128xbf16> -> vector<256x1152xbf16>
    %c0_25 = arith.constant 0 : index
    %c0_26 = arith.constant 0 : index
    %72 = vector.load %arg5[%c0_25, %c0_26] : memref<1152x128xbf16, #tpu.memory_space<vmem>>, vector<1152x128xbf16>
    %cst_27 = arith.constant dense<0.000000e+00> : vector<256x128xf32>
    %73 = tpu.matmul %71, %72, %cst_27 {dimension_numbers = #tpu.dot_dimension_numbers<[1], [0], [0], [1], [0, 0, 1, 1], [], []>} : vector<256x1152xbf16>, vector<1152x128xbf16>, vector<256x128xf32> -> vector<256x128xf32>
    %74 = arith.addf %40, %73 : vector<256x128xf32>
    %c0_28 = arith.constant 0 : index
    %c0_29 = arith.constant 0 : index
    %75 = vector.load %arg6[%c0_28, %c0_29] : memref<1x128xf32, #tpu.memory_space<vmem>>, vector<1x128xf32>
    %76 = vector.broadcast %75 : vector<1x128xf32> to vector<256x128xf32>
    %77 = arith.mulf %74, %76 : vector<256x128xf32>
    %c0_30 = arith.constant 0 : index
    %c0_31 = arith.constant 0 : index
    %78 = vector.load %arg7[%c0_30, %c0_31] : memref<1x128xf32, #tpu.memory_space<vmem>>, vector<1x128xf32>
    %79 = vector.broadcast %78 : vector<1x128xf32> to vector<256x128xf32>
    %80 = arith.addf %77, %79 : vector<256x128xf32>
    %cst_32 = arith.constant 0.000000e+00 : f32
    %81 = vector.broadcast %cst_32 : f32 to vector<256x128xf32>
    %82 = arith.maximumf %80, %81 : vector<256x128xf32>
    %83 = vector.shape_cast %82 : vector<256x128xf32> to vector<16x16x128xf32>
    %c1_33 = arith.constant 1 : index
    %c8_34 = arith.constant 8 : index
    %c0_35 = arith.constant 0 : index
    %84 = vector.load %arg12[%c1_33, %c8_34, %c0_35] : memref<18x32x128xf32, #tpu.memory_space<vmem>>, vector<16x16x128xf32>
    tpu.vector_store %arg12[%c1_33, %c8_34, %c0_35], %83 {strides = array<i32>} : memref<18x32x128xf32, #tpu.memory_space<vmem>>, vector<16x16x128xf32>,
    %c0_36 = arith.constant 0 : index
    %c0_37 = arith.constant 0 : index
    %c0_38 = arith.constant 0 : index
    %85 = vector.load %arg12[%c0_36, %c0_37, %c0_38] : memref<18x32x128xf32, #tpu.memory_space<vmem>>, vector<18x32x128xf32>
    %86 = vector.extract_strided_slice %85 {offsets = [0, 7, 0], sizes = [16, 16, 128], strides = [1, 1, 1]} : vector<18x32x128xf32> to vector<16x16x128xf32>
    %87 = vector.shape_cast %86 : vector<16x16x128xf32> to vector<256x128xf32>
    %88 = arith.truncf %87 : vector<256x128xf32> to vector<256x128xbf16>
    %89 = vector.extract_strided_slice %85 {offsets = [0, 8, 0], sizes = [16, 16, 128], strides = [1, 1, 1]} : vector<18x32x128xf32> to vector<16x16x128xf32>
    %90 = vector.shape_cast %89 : vector<16x16x128xf32> to vector<256x128xf32>
    %91 = arith.truncf %90 : vector<256x128xf32> to vector<256x128xbf16>
    %92 = vector.extract_strided_slice %85 {offsets = [0, 9, 0], sizes = [16, 16, 128], strides = [1, 1, 1]} : vector<18x32x128xf32> to vector<16x16x128xf32>
    %93 = vector.shape_cast %92 : vector<16x16x128xf32> to vector<256x128xf32>
    %94 = arith.truncf %93 : vector<256x128xf32> to vector<256x128xbf16>
    %95 = vector.extract_strided_slice %85 {offsets = [1, 7, 0], sizes = [16, 16, 128], strides = [1, 1, 1]} : vector<18x32x128xf32> to vector<16x16x128xf32>
    %96 = vector.shape_cast %95 : vector<16x16x128xf32> to vector<256x128xf32>
    %97 = arith.truncf %96 : vector<256x128xf32> to vector<256x128xbf16>
    %98 = vector.extract_strided_slice %85 {offsets = [1, 8, 0], sizes = [16, 16, 128], strides = [1, 1, 1]} : vector<18x32x128xf32> to vector<16x16x128xf32>
    %99 = vector.shape_cast %98 : vector<16x16x128xf32> to vector<256x128xf32>
    %100 = arith.truncf %99 : vector<256x128xf32> to vector<256x128xbf16>
    %101 = vector.extract_strided_slice %85 {offsets = [1, 9, 0], sizes = [16, 16, 128], strides = [1, 1, 1]} : vector<18x32x128xf32> to vector<16x16x128xf32>
    %102 = vector.shape_cast %101 : vector<16x16x128xf32> to vector<256x128xf32>
    %103 = arith.truncf %102 : vector<256x128xf32> to vector<256x128xbf16>
    %104 = vector.extract_strided_slice %85 {offsets = [2, 7, 0], sizes = [16, 16, 128], strides = [1, 1, 1]} : vector<18x32x128xf32> to vector<16x16x128xf32>
    %105 = vector.shape_cast %104 : vector<16x16x128xf32> to vector<256x128xf32>
    %106 = arith.truncf %105 : vector<256x128xf32> to vector<256x128xbf16>
    %107 = vector.extract_strided_slice %85 {offsets = [2, 8, 0], sizes = [16, 16, 128], strides = [1, 1, 1]} : vector<18x32x128xf32> to vector<16x16x128xf32>
    %108 = vector.shape_cast %107 : vector<16x16x128xf32> to vector<256x128xf32>
    %109 = arith.truncf %108 : vector<256x128xf32> to vector<256x128xbf16>
    %110 = vector.extract_strided_slice %85 {offsets = [2, 9, 0], sizes = [16, 16, 128], strides = [1, 1, 1]} : vector<18x32x128xf32> to vector<16x16x128xf32>
    %111 = vector.shape_cast %110 : vector<16x16x128xf32> to vector<256x128xf32>
    %112 = arith.truncf %111 : vector<256x128xf32> to vector<256x128xbf16>
    %113 = tpu.concatenate %88, %91, %94, %97, %100, %103, %106, %109, %112 in 1 : vector<256x128xbf16>, vector<256x128xbf16>, vector<256x128xbf16>, vector<256x128xbf16>, vector<256x128xbf16>, vector<256x128xbf16>, vector<256x128xbf16>, vector<256x128xbf16>, vector<256x128xbf16> -> vector<256x1152xbf16>
    %c0_39 = arith.constant 0 : index
    %c0_40 = arith.constant 0 : index
    %114 = vector.load %arg8[%c0_39, %c0_40] : memref<1152x128xbf16, #tpu.memory_space<vmem>>, vector<1152x128xbf16>
    %cst_41 = arith.constant dense<0.000000e+00> : vector<256x128xf32>
    %115 = tpu.matmul %113, %114, %cst_41 {dimension_numbers = #tpu.dot_dimension_numbers<[1], [0], [0], [1], [0, 0, 1, 1], [], []>} : vector<256x1152xbf16>, vector<1152x128xbf16>, vector<256x128xf32> -> vector<256x128xf32>
    %c0_42 = arith.constant 0 : index
    %c0_43 = arith.constant 0 : index
    %116 = vector.load %arg9[%c0_42, %c0_43] : memref<1x128xf32, #tpu.memory_space<vmem>>, vector<1x128xf32>
    %117 = vector.broadcast %116 : vector<1x128xf32> to vector<256x128xf32>
    %118 = arith.mulf %115, %117 : vector<256x128xf32>
    %c0_44 = arith.constant 0 : index
    %c0_45 = arith.constant 0 : index
    %119 = vector.load %arg10[%c0_44, %c0_45] : memref<1x128xf32, #tpu.memory_space<vmem>>, vector<1x128xf32>
    %120 = vector.broadcast %119 : vector<1x128xf32> to vector<256x128xf32>
    %121 = arith.addf %118, %120 : vector<256x128xf32>
    %cst_46 = arith.constant 0.000000e+00 : f32
    %122 = vector.broadcast %cst_46 : f32 to vector<256x128xf32>
    %123 = arith.maximumf %121, %122 : vector<256x128xf32>
    %c0_47 = arith.constant 0 : index
    %c0_48 = arith.constant 0 : index
    %c0_49 = arith.constant 0 : index
    %124 = vector.load %arg11[%c0_47, %c0_48, %c0_49] : memref<1x256x128xf32, #tpu.memory_space<vmem>>, vector<1x256x128xf32>
    %125 = vector.shape_cast %124 : vector<1x256x128xf32> to vector<256x128xf32>
    %126 = vector.shape_cast %123 : vector<256x128xf32> to vector<1x256x128xf32>
    tpu.vector_store %arg11[%c0_47, %c0_48, %c0_49], %126 {strides = array<i32>} : memref<1x256x128xf32, #tpu.memory_space<vmem>>, vector<1x256x128xf32>,
    return
  }
  func.func @transform_0(%arg0: i32) -> (i32, i32, i32, i32) {
    %c0_i32 = arith.constant 0 : i32
    %c0_i32_0 = arith.constant 0 : i32
    %c0_i32_1 = arith.constant 0 : i32
    %c0_i32_2 = arith.constant 0 : i32
    return %arg0, %c0_i32, %c0_i32_0, %c0_i32_1 : i32, i32, i32, i32
  }
  func.func @transform_1(%arg0: i32) -> (i32, i32, i32) {
    %c0_i32 = arith.constant 0 : i32
    %c0_i32_0 = arith.constant 0 : i32
    %c0_i32_1 = arith.constant 0 : i32
    return %arg0, %c0_i32, %c0_i32_0 : i32, i32, i32
  }
  func.func @transform_2(%arg0: i32) -> (i32, i32) {
    %c0_i32 = arith.constant 0 : i32
    %c0_i32_0 = arith.constant 0 : i32
    %c0_i32_1 = arith.constant 0 : i32
    return %c0_i32, %c0_i32_0 : i32, i32
  }
  func.func @transform_3(%arg0: i32) -> (i32, i32) {
    %c0_i32 = arith.constant 0 : i32
    %c0_i32_0 = arith.constant 0 : i32
    %c0_i32_1 = arith.constant 0 : i32
    return %c0_i32, %c0_i32_0 : i32, i32
  }
  func.func @transform_4(%arg0: i32) -> (i32, i32) {
    %c0_i32 = arith.constant 0 : i32
    %c0_i32_0 = arith.constant 0 : i32
    %c0_i32_1 = arith.constant 0 : i32
    return %c0_i32, %c0_i32_0 : i32, i32
  }
  func.func @transform_5(%arg0: i32) -> (i32, i32) {
    %c0_i32 = arith.constant 0 : i32
    %c0_i32_0 = arith.constant 0 : i32
    %c0_i32_1 = arith.constant 0 : i32
    return %c0_i32, %c0_i32_0 : i32, i32
  }
  func.func @transform_6(%arg0: i32) -> (i32, i32) {
    %c0_i32 = arith.constant 0 : i32
    %c0_i32_0 = arith.constant 0 : i32
    %c0_i32_1 = arith.constant 0 : i32
    return %c0_i32, %c0_i32_0 : i32, i32
  }
  func.func @transform_7(%arg0: i32) -> (i32, i32) {
    %c0_i32 = arith.constant 0 : i32
    %c0_i32_0 = arith.constant 0 : i32
    %c0_i32_1 = arith.constant 0 : i32
    return %c0_i32, %c0_i32_0 : i32, i32
  }
  func.func @transform_8(%arg0: i32) -> (i32, i32) {
    %c0_i32 = arith.constant 0 : i32
    %c0_i32_0 = arith.constant 0 : i32
    %c0_i32_1 = arith.constant 0 : i32
    return %c0_i32, %c0_i32_0 : i32, i32
  }
  func.func @transform_9(%arg0: i32) -> (i32, i32) {
    %c0_i32 = arith.constant 0 : i32
    %c0_i32_0 = arith.constant 0 : i32
    %c0_i32_1 = arith.constant 0 : i32
    return %c0_i32, %c0_i32_0 : i32, i32
  }
  func.func @transform_10(%arg0: i32) -> (i32, i32, i32) {
    %c0_i32 = arith.constant 0 : i32
    %c0_i32_0 = arith.constant 0 : i32
    %c0_i32_1 = arith.constant 0 : i32
    return %arg0, %c0_i32, %c0_i32_0 : i32, i32, i32
  }
}

</mosaic_0001>

<bundles_post_ra>
// kernel: tpu_custom_call.1
= control target key start
LH: loop header
LB: loop body
LE: loop exit
PB: predicated region body
PF: predicated region fallthrough
CT: control target
= control target key end

     0   :  { %s12590_s0 = inlined_call_operand.hbm [shape: f32[2,16,16,128], index: 0, kind: input, shape index: {}]   ;;  %s12591_s1 = inlined_call_operand.hbm [shape: f32[2,128,128], index: 1, kind: input, shape index: {}]   ;;  %s12592_s2 = inlined_call_operand.hbm [shape: bf16[256,128], index: 2, kind: input, shape index: {}]   ;;  %s12593_s3 = inlined_call_operand.hbm [shape: bf16[1152,128], index: 3, kind: input, shape index: {}]   ;;  %s12594_s4 = inlined_call_operand.hbm [shape: bf16[1152,128], index: 4, kind: input, shape index: {}]   ;;  %s12595_s5 = inlined_call_operand.vmem [shape: f32[1,128], index: 5, kind: input, shape index: {}]   ;;  %s12596_s6 = inlined_call_operand.vmem [shape: f32[1,128], index: 6, kind: input, shape index: {}]   ;;  %s12597_s7 = inlined_call_operand.hbm [shape: bf16[1152,128], index: 7, kind: input, shape index: {}]   ;;  %s12598_s8 = inlined_call_operand.vmem [shape: f32[1,128], index: 8, kind: input, shape index: {}]   ;;  %s12599_s9 = inlined_call_operand.vmem [shape: f32[1,128], index: 9, kind: input, shape index: {}]   ;;  %s12600_s10 = inlined_call_operand.hbm [shape: f32[2,256,128], index: 10, kind: output, shape index: {}]  }
   0x1   :  { %12674 = sst [smem:[#allocation81_spill]] %s12590_s0 }
   0x2   :  { %12675 = sst [smem:[#allocation82_spill]] %s12592_s2 }
   0x3   :  { %12676 = sst [smem:[#allocation83_spill]] %s12593_s3 }
   0x4   :  { %12677 = sst [smem:[#allocation84_spill]] %s12594_s4 }
   0x5   :  { %12678 = sst [smem:[#allocation85_spill]] %s12597_s7 }
   0x6   :  { %15 = vsyncpa [#allocation4], 0 }
   0x7   :  { %17 = vsyncpa [#allocation4 + $0x1], 0 }
   0x8   :  { %18 = vsyncpa [#allocation7], 0 }
   0x9   :  { %20 = vsyncpa [#allocation7 + $0x1], 0 }
   0xa   :  { %21 = vsyncpa [#allocation10], 0 }
   0xb   :  { %22 = vsyncpa [#allocation13], 0 }
   0xc   :  { %23 = vsyncpa [#allocation5], 0 }
   0xd   :  { %25 = vsyncpa [#allocation5 + $0x1], 0  ;;  %s9427_s13 = smov 0   ;;  %s9429_s14 = smov 0  }
   0xe   :  { %s9431_s15 = smov 0   ;;  %s9433_s16 = smov 0  }
   0xf LB: > { %12679 = sst [smem:[#allocation21_spill]] %s9351_s15  ;;  %s9448_s17 = sadd.s32 4294967295, %s9355_s16   ;;  %s9355_s16 = sphi %s9433_s16, %s12951_s16   ;;  %s9351_s15 = sphi %s9431_s15, %s12953_s15   ;;  %s9347_s14 = sphi %s9429_s14, %s12955_s14   ;;  %s9343_s13 = sphi %s9427_s13, %s12954_s13  }
  0x10   : > { %s6886_s18 = sadd.s32 4294967294, %s9355_s16   ;;  %p51_p0 = scmp.ne.s32.totalorder %s9347_s14, %s9343_s13 }
  0x11   : > { %p12601_p1 = scmp.eq.s32.totalorder %s9448_s17, 0  ;;  %p269_p2 = scmp.eq.s32.totalorder %s9448_s17, 1 }
  0x12   : > { %p275_p3 = scmp.eq.s32.totalorder %s6886_s18, 1  ;;  %p6887_p5 = scmp.ge.s32.totalorder %s9355_s16, 1 }
  0x13   : > { %p9457_p4 = por %p12601_p1, %p51_p0  ;;  %p282_p7 = scmp.lt.s32.totalorder %s9355_s16, 3 }
  0x14   : > { %p9462_p6 = por %p275_p3, %p51_p0  ;;  %s9357_s22 = smov [#allocation8]  }
  0x15   : > { %s12680_s19 = scalar_select %p9457_p4, 1, 0 }
  0x16   : > { %s12681_s20 = scalar_select %p9462_p6, 1, 0 }
  0x17   : > { %p9467_p8 = pnand %p6887_p5, %p282_p7  ;;  %s294_s23 = sshll.u32 %s9357_s22, 4  ;;  %s295_s23 = int_to_ptr.vmem [resolvable:$true] %s294_s23 }
  0x18   : > { %s9358_s25 = smov [#allocation9]   ;;  %s9359_s27 = smov [#allocation11]  }
  0x19   : > { %p8805_p9 = pneg %p9467_p8  ;;  %s307_s26 = sshll.u32 %s9358_s25, 4  ;;  %s308_s26 = int_to_ptr.vmem [resolvable:$true] %s307_s26 }
  0x1a   : > { %s320_s28 = sshll.u32 %s9359_s27, 4  ;;  %s9126_s29 = scalar_lea.vmem %s295_s23, 2048  ;;  %s321_s28 = int_to_ptr.vmem [resolvable:$true] %s320_s28 }
  0x1b   : > { %p9476_p11 = pnand %p8805_p9, %p12601_p1  ;;  %p9127_p13 = scmp.ne.s32.totalorder %s295_s23, %s9126_s29 }
  0x1c   : > { %p9134_p5 = scmp.lt.s32.totalorder %s295_s23, %s295_s23  ;;  %p9135_p7 = scmp.lt.s32.totalorder %s9126_s29, %s9126_s29 }
  0x1d   : > { %p9117_p12 = pneg %p9476_p11 }
  0x1e   : > { %p9136_p9 = por %p9135_p7, %p9134_p5 }
  0x1f   : > { %p9129_p0 = pnand %p9127_p13, %p9117_p12 }
  0x21   : > { %p9130_p3 = pneg %p9129_p0 }
  0x23   : > { %p9137_p10 = pnand %p9136_p9, %p9130_p3 }
  0x25   : > { %9140 = shalt.err (!%p9137_p10)
}
  0x26   : > { %s9360_s30 = smov 64   ;;  %s9361_s11 = smov 4  }
  0x27   : > { %s12684_s2 = sld [smem:[#allocation82_spill]]  ;;  %s9152_s22 = scalar_lea.vmem %s308_s26, 9216 }
  0x28   : > { %p9153_p13 = scmp.ne.s32.totalorder %s308_s26, %s9152_s22  ;;  %p9160_p3 = scmp.lt.s32.totalorder %s308_s26, %s308_s26 }
  0x29   : > { %p9161_p10 = scmp.lt.s32.totalorder %s9152_s22, %s9152_s22 }
  0x2a   : > { %p9155_p0 = pnand %p9153_p13, %p9117_p12 }
  0x2b   : > { %p9162_p7 = por %p9161_p10, %p9160_p3 }
  0x2c   : > { %p9156_p5 = pneg %p9155_p0 }
  0x2d   : > { %8808 = dma.hbm_to_vmem [thread:$0]  (!%p9476_p11), %s12684_s2, 2048, %s295_s23, [#allocation7], %s9360_s30, %s9360_s30, %s9361_s11  }
  0x2e   : > { %p9163_p9 = pnand %p9162_p7, %p9156_p5 }
  0x30   : > { %9166 = shalt.err (!%p9163_p9)
}
  0x31   : > { %s12685_s3 = sld [smem:[#allocation83_spill]]  ;;  %s9178_s23 = scalar_lea.vmem %s321_s28, 9216 }
  0x32   : > { %p9179_p1 = scmp.ne.s32.totalorder %s321_s28, %s9178_s23  ;;  %p9186_p3 = scmp.lt.s32.totalorder %s321_s28, %s321_s28 }
  0x33   : > { %p9187_p5 = scmp.lt.s32.totalorder %s9178_s23, %s9178_s23 }
  0x34   : > { %p9181_p13 = pnand %p9179_p1, %p9117_p12 }
  0x35   : > { %p9188_p10 = por %p9187_p5, %p9186_p3 }
  0x36   : > { %p9182_p0 = pneg %p9181_p13 }
  0x37   : > { %8811 = dma.hbm_to_vmem [thread:$0]  (!%p9476_p11), %s12685_s3, 9216, %s308_s26, [#allocation10], %s9360_s30, %s9360_s30, %s9361_s11  }
  0x38   : > { %p9189_p7 = pnand %p9188_p10, %p9182_p0 }
  0x3a   : > { %9192 = shalt.err (!%p9189_p7)
}
  0x3b   : > { %s12686_s4 = sld [smem:[#allocation84_spill]]  ;;  %s9362_s26 = smov [#allocation12]  }
  0x3c   : > { %s339_s18 = sshll.u32 %s9362_s26, 4  ;;  %s340_s18 = int_to_ptr.vmem [resolvable:$true] %s339_s18 }
  0x3d   : > { %s9204_s22 = scalar_lea.vmem %s340_s18, 9216  ;;  %p9212_p0 = scmp.lt.s32.totalorder %s340_s18, %s340_s18 }
  0x3e   : > { %p9205_p1 = scmp.ne.s32.totalorder %s340_s18, %s9204_s22  ;;  %p9213_p3 = scmp.lt.s32.totalorder %s9204_s22, %s9204_s22 }
  0x40   : > { %p9207_p9 = pnand %p9205_p1, %p9117_p12  ;;  %p9214_p5 = por %p9213_p3, %p9212_p0 }
  0x41   : > { %8814 = dma.hbm_to_vmem [thread:$0]  (!%p9476_p11), %s12686_s4, 9216, %s321_s28, [#allocation10], %s9360_s30, %s9360_s30, %s9361_s11  }
  0x42   : > { %p9208_p13 = pneg %p9207_p9 }
  0x44   : > { %p9215_p10 = pnand %p9214_p5, %p9208_p13 }
  0x46   : > { %9218 = shalt.err (!%p9215_p10)
}
  0x47   : > { %s12687_s7 = sld [smem:[#allocation85_spill]]  ;;  %s9527_s27 = sadd.s32 1, %s9355_s16  }
  0x48   : > { %12688 = sst [smem:[#allocation22_spill]] %s9527_s27  ;;  %s38_s24 = sadd.s32 1, %s9351_s15 }
  0x49   : > { %s35_s23 = ssub.s32 %s9355_s16, %s9527_s27  ;;  %p45_p12 = scmp.ne.s32.totalorder %s9351_s15, %s9347_s14 }
  0x4a   : > { %p36_p7 = scmp.eq.s32.totalorder %s35_s23, 0  ;;  %p46_p1 = scmp.eq.s32.totalorder %s9355_s16, 0 }
  0x4b   : > { %p9537_p9 = por %p269_p2, %p45_p12  ;;  %p8833_p13 = scmp.lt.s32.totalorder %s9355_s16, 2 }
  0x4c   : > { %s9543_s12 = scalar_select %p36_p7, %s9351_s15, %s38_s24  }
  0x4d   : > { %8817 = dma.hbm_to_vmem [thread:$0]  (!%p9476_p11), %s12687_s7, 9216, %s340_s18, [#allocation13], %s9360_s30, %s9360_s30, %s9361_s11  }
  0x4e   : > { %s12689_s29 = scalar_select %p9537_p9, 1, 0 }
  0x4f   : > { %12690 = sst [smem:[#allocation23_spill]] %s9543_s12  ;;  %p47_p0 = por %p46_p1, %p45_p12 }
  0x50   : > { %s9546_s26 = sand.u32 1, %s9351_s15   ;;  %s7148_s11 = sshll.u32 %s9355_s16, 12 }
  0x51   : > { %s6893_s30 = sshll.u32 %s9546_s26, 8  ;;  %s12691_s0 = sld [smem:[#allocation81_spill]] }
  0x52   : > { %s363_s25 = scalar_lea.vmem [#allocation3], %s6893_s30  ;;  %p9557_p2 = pnand %p8833_p13, %p47_p0 }
  0x53   : > { %s370_s23 = sshll.u32 %s363_s25, 4  ;;  %s9555_s23 = int_to_ptr.vmem [resolvable:$true] %s370_s23 }
  0x54   : > { %p9221_p3 = pneg %p9557_p2 }
  0x57   : > { %s9553_s28 = scalar_lea.hbm %s12691_s0, %s7148_s11  ;;  %s9224_s18 = scalar_lea.hbm %s12691_s0, 8192 }
  0x58   : > { %s9219_s4 = scalar_lea.hbm %s9553_s28, 4096  ;;  %p9225_p12 = scmp.lt.s32.totalorder %s9553_s28, %s12691_s0 }
  0x59   : > { %p9220_p11 = scmp.ne.s32.totalorder %s9553_s28, %s9219_s4  ;;  %p9226_p7 = scmp.lt.s32.totalorder %s9224_s18, %s9219_s4 }
  0x5b   : > { %p9222_p5 = pnand %p9221_p3, %p9220_p11  ;;  %p9227_p1 = por %p9226_p7, %p9225_p12 }
  0x5d   : > { %p9223_p10 = pneg %p9222_p5 }
  0x5f   : > { %p9228_p13 = pnand %p9227_p1, %p9223_p10 }
  0x61   : > { %9231 = shalt.err (!%p9228_p13)
}
  0x62   : > { %s9232_s2 = scalar_lea.vmem %s9555_s23, 4096  ;;  %s9363_s30 = smov [#allocation3]  }
  0x63   : > { %p9233_p0 = scmp.ne.s32.totalorder %s9555_s23, %s9232_s2  ;;  %s9237_s11 = sshll.u32 %s9363_s30, 4  ;;  %s9238_s11 = int_to_ptr.vmem [resolvable:$false] %s9237_s11 }
  0x64   : > { %s9239_s3 = scalar_lea.vmem %s9238_s11, 8192  ;;  %p9240_p6 = scmp.lt.s32.totalorder %s9555_s23, %s9238_s11 }
  0x65   : > { %p9235_p11 = pnand %p9233_p0, %p9221_p3  ;;  %p9241_p9 = scmp.lt.s32.totalorder %s9239_s3, %s9232_s2 }
  0x67   : > { %p9236_p5 = pneg %p9235_p11  ;;  %p9242_p4 = por %p9241_p9, %p9240_p6 }
  0x69   : > { %p9243_p12 = pnand %p9242_p4, %p9236_p5 }
  0x6b   : > { %9246 = shalt.err (!%p9243_p12)
}
  0x6c   : > { %s9364_s4 = smov 128   ;;  %s9365_s18 = smov 8  }
  0x6d   : > { %s12693_s22 = scalar_lea.sflag [#allocation4], %s9546_s26  ;;  %s6896_s2 = sshll.u32 %s9546_s26, 7 }
  0x6e   : > { %8821 = dma.hbm_to_vmem [thread:$0]  (!%p9557_p2), %s9553_s28, 4096, %s9555_s23, %s12693_s22, %s9364_s4, %s9364_s4, %s9365_s18  }
  0x6f   : > { %s7149_s3 = sshll.u32 %s9355_s16, 11  ;;  %s384_s0 = scalar_lea.vmem [#allocation6], %s6896_s2 }
  0x70   : > { %s9597_s11 = scalar_lea.hbm %s12591_s1, %s7149_s3  ;;  %s391_s7 = sshll.u32 %s384_s0, 4  ;;  %s9599_s7 = int_to_ptr.vmem [resolvable:$true] %s391_s7 }
  0x71   : > { %s12694_s12 = sand.u32 1, %s9355_s16   ;;  %s9247_s27 = scalar_lea.hbm %s9597_s11, 2048 }
  0x72   : > { %s381_s15 = scalar_lea.sflag [#allocation7], %s12694_s12  ;;  %p9248_p4 = scmp.ne.s32.totalorder %s9597_s11, %s9247_s27 }
  0x73   : > { %s9252_s23 = scalar_lea.hbm %s12591_s1, 4096  ;;  %p9253_p10 = scmp.lt.s32.totalorder %s9597_s11, %s12591_s1 }
  0x74   : > { %p9250_p6 = pnand %p9248_p4, %p9221_p3  ;;  %p9254_p7 = scmp.lt.s32.totalorder %s9252_s23, %s9247_s27 }
  0x76   : > { %p9251_p9 = pneg %p9250_p6  ;;  %p9255_p1 = por %p9254_p7, %p9253_p10 }
  0x78   : > { %p9256_p13 = pnand %p9255_p1, %p9251_p9 }
  0x7a   : > { %9259 = shalt.err (!%p9256_p13)
}
  0x7b   : > { %s9260_s0 = scalar_lea.vmem %s9599_s7, 2048  ;;  %s9366_s12 = smov [#allocation6]  }
  0x7c   : > { %p9261_p0 = scmp.ne.s32.totalorder %s9599_s7, %s9260_s0  ;;  %s9265_s2 = sshll.u32 %s9366_s12, 4  ;;  %s9266_s2 = int_to_ptr.vmem [resolvable:$false] %s9265_s2 }
  0x7d   : > { %s9267_s25 = scalar_lea.vmem %s9266_s2, 4096  ;;  %p9268_p12 = scmp.lt.s32.totalorder %s9599_s7, %s9266_s2 }
  0x7e   : > { %p9263_p11 = pnand %p9261_p0, %p9221_p3  ;;  %p9269_p4 = scmp.lt.s32.totalorder %s9267_s25, %s9260_s0 }
  0x80   : > { %p9264_p5 = pneg %p9263_p11  ;;  %p9270_p6 = por %p9269_p4, %p9268_p12 }
  0x82   : > { %p9271_p10 = pnand %p9270_p6, %p9264_p5 }
  0x84   : > { %9274 = shalt.err (!%p9271_p10)
}
  0x85   : > { %8824 = dma.hbm_to_vmem [thread:$0]  (!%p9557_p2), %s9597_s11, 2048, %s9599_s7, %s381_s15, %s9364_s4, %s9364_s4, %s9365_s18  }
  0x86   : > { %403 = sbr.rel (%p9467_p8) target bundleno = 1645 (0x66d), region = 60 }
  0x8b   : > { %s9631_s27 = sand.u32 1, %s9347_s14   ;;  %p12695_p3 = scmp.ne.s32.totalorder %s12680_s19, 0 }
  0x8c   : > { %s6900_s30 = sshll.u32 %s9631_s27, 8  ;;  %s406_s26 = scalar_lea.sflag [#allocation4], %s9631_s27 }
  0x8d   : > { %s9637_s24 = scalar_lea.vmem [#allocation3], %s6900_s30 }
  0x8e   : > { %9318 = dma.done.wait (%p12695_p3), %s406_s26, 4096  }
  0x8f   : > { %9320 = vsyncadd (%p12695_p3), %s406_s26, 4294963200  ;;  %s414_s7 = sand.u32 1, %s9448_s17   ;;  %s6901_s15 = sshll.u32 %s9631_s27, 7 }
  0x90   : > { %s415_s21 = scalar_lea.sflag [#allocation7], %s414_s7  ;;  %s9645_s4 = scalar_lea.vmem [#allocation6], %s6901_s15 }
  0x91   : > { %9322 = dma.done.wait (%p12695_p3), %s415_s21, 2048  }
  0x92   : > { %9324 = vsyncadd (%p12695_p3), %s415_s21, 4294965248  ;;  %p12696_p8 = scmp.eq.s32.totalorder %s9448_s17, 0 }
  0x94   : > { %9326 = dma.done.wait (%p12696_p8), [#allocation7], 2048   ;;  %p12697_p2 = pmov %p12696_p8 }
  0x96   : > { %9328 = vsyncadd (%p12697_p2), [#allocation7], 4294965248  ;;  %p12698_p9 = pmov %p12697_p2 }
  0x97   : > { %p12699_p7 = pmov %p12697_p2 }
  0x98   : > { %9330 = dma.done.wait (%p12698_p9), [#allocation10], 18432  }
  0x99   : > { %9332 = vsyncadd (%p12699_p7), [#allocation10], 4294948864  ;;  %p12700_p1 = pmov %p12697_p2 }
  0x9b   : > { %9334 = dma.done.wait (%p12700_p1), [#allocation13], 9216   ;;  %p12701_p13 = pmov %p12700_p1 }
  0x9c   : > { %v595_v0 = vld [vmem:[%s9645_s4 + $0x70] sm:$0xff]  ;;  %v596_v1 = vld [vmem:[%s9645_s4 + $0x78] sm:$0xff]  ;;  %v593_v2 = vld [vmem:[%s9645_s4 + $0x60] sm:$0xff]  ;;  %vm1047_vm0 = vcmask 1040384   ;;  %vm1208_vm1 = vcmask 1046528   ;;  %s12359_s12 = scalar_lea.vmem [#allocation14], %s6900_s30 }
  0x9d   : > { %9336 = vsyncadd (%p12701_p13), [#allocation13], 4294958080  ;;  %v604_v3 = vpack.c.bf16 %v596_v1, %v595_v0  ;;  %v594_v4 = vld [vmem:[%s9645_s4 + $0x68] sm:$0xff]  ;;  %v591_v6 = vld [vmem:[%s9645_s4 + $0x50] sm:$0xff]  ;;  %s7150_s2 = sshll.u32 %s9448_s17, 12  ;;  %s6752_s25 = sshll.u32 %s12359_s12, 4  ;;  %s12545_s25 = int_to_ptr.vmem [resolvable:$true] %s6752_s25 }
  0x9e   : > { %v603_v5 = vpack.c.bf16 %v594_v4, %v593_v2  ;;  %v592_v7 = vld [vmem:[%s9645_s4 + $0x58] sm:$0xff]  ;;  %v589_v8 = vld [vmem:[%s9645_s4 + $0x40] sm:$0xff]  ;;  %v590_v10 = vld [vmem:[%s9645_s4 + $0x48] sm:$0xff]  ;;  %s6739_s7 = scalar_lea.sflag [#allocation5], %s9631_s27  ;;  %s9275_s17 = scalar_lea.vmem %s12545_s25, 4096 }
  0x9f   : > { %8591 = vmatprep.subr.bf16.mxu0 %v604_v3  ;;  %v602_v9 = vpack.c.bf16 %v592_v7, %v591_v6  ;;  %v8883_v11 = vld [vmem:[#allocation8] sm:$0xff]   ;;  %v601_v12 = vpack.c.bf16 %v590_v10, %v589_v8  ;;  %v587_v13 = vld [vmem:[%s9645_s4 + $0x30] sm:$0xff]  ;;  %v588_v14 = vld [vmem:[%s9645_s4 + $0x38] sm:$0xff]  ;;  %v9367_v6 = vmov 0.0   ;;  %p9276_p0 = scmp.ne.s32.totalorder %s12545_s25, %s9275_s17  ;;  %p12948_p11 = scmp.ne.s32.totalorder %s12689_s29, 0 }
  0xa0   : > { %8592 = vmatpush3.bf16.msra.mxu0 %v604_v3  ;;  %8607 = vmatprep.mubr.bf16.mxu0 %v8883_v11  ;;  %v600_v15 = vpack.c.bf16 %v588_v14, %v587_v13  ;;  %v585_v16 = vld [vmem:[%s9645_s4 + $0x20] sm:$0xff]  ;;  %v586_v17 = vld [vmem:[%s9645_s4 + $0x28] sm:$0xff]  ;;  %v583_v19 = vld [vmem:[%s9645_s4 + $0x10] sm:$0xff]  ;;  %v9679_v7 = vrot.slane %v9367_v6, 7  ;;  %s9369_s15 = smov [#allocation14]  }
  0xa1   : > { %8593 = vmatprep.subr.bf16.mxu0 %v603_v5  ;;  %v599_v18 = vpack.c.bf16 %v586_v17, %v585_v16  ;;  %v584_v20 = vld [vmem:[%s9645_s4 + $0x18] sm:$0xff]  ;;  %v581_v22 = vld [vmem:[%s9645_s4] sm:$0xff]  ;;  %v582_v23 = vld [vmem:[%s9645_s4 + $0x8] sm:$0xff]  ;;  %p9277_p5 = pnand %p9276_p0, %p12948_p11  ;;  %s9279_s21 = sshll.u32 %s9369_s15, 4  ;;  %s9280_s21 = int_to_ptr.vmem [resolvable:$false] %s9279_s21 }
  0xa2   : > { %v598_v21 = vpack.c.bf16 %v584_v20, %v583_v19  ;;  %v597_v24 = vpack.c.bf16 %v582_v23, %v581_v22  ;;  %v8905_v25 = vld [vmem:[#allocation11 + $0x78] sm:$0xff]   ;;  %v8884_v26 = vld [vmem:[#allocation8 + $0x8] sm:$0xff]   ;;  %v8885_v28 = vld [vmem:[#allocation8 + $0x10] sm:$0xff]   ;;  %12702 = vst [vmem:[#allocation24_spill] sm:$0xff] %v9679_v7  ;;  %v9683_v8 = vpack.c.bf16 %v9679_v7, %v9679_v7  ;;  %s9281_s4 = scalar_lea.vmem %s9280_s21, 8192  ;;  %p9282_p4 = scmp.lt.s32.totalorder %s12545_s25, %s9280_s21 }
  0xa3   : > { %v8899_v27 = vld [vmem:[#allocation11 + $0xf8] sm:$0xff]   ;;  %7175 = vmatprep.subr.bf16.mxu1 %v8905_v25  ;;  %v8901_v31 = vld [vmem:[#allocation11 + $0xf0] sm:$0xff]   ;;  %v8911_v34 = vld [vmem:[#allocation11 + $0x68] sm:$0xff]   ;;  %p9278_p12 = pneg %p9277_p5  ;;  %p9283_p6 = scmp.lt.s32.totalorder %s9281_s4, %s9275_s17 }
  0xa4   : > { %8594 = vmatpush3.bf16.msra.mxu0 %v603_v5  ;;  %v8900_v29 = vld [vmem:[#allocation11 + $0xb8] sm:$0xff]   ;;  %v8909_v32 = vld [vmem:[#allocation11 + $0x70] sm:$0xff]   ;;  %v8903_v36 = vld [vmem:[#allocation11 + $0xe8] sm:$0xff]   ;;  %12703 = vst [vmem:[#allocation25_spill] sm:$0xff] %v9683_v8 }
  0xa5   : > { %8595 = vmatprep.subr.bf16.mxu0 %v602_v9  ;;  %v8907_v30 = vld [vmem:[#allocation11 + $0x38] sm:$0xff]   ;;  %v8910_v33 = vld [vmem:[#allocation11 + $0x30] sm:$0xff]   ;;  %v8913_v38 = vld [vmem:[#allocation11 + $0x28] sm:$0xff]   ;;  %p9284_p10 = por %p9283_p6, %p9282_p4 }
  0xa6   : > { %7176 = vmatpush3.bf16.msra.mxu1 %v8907_v30  ;;  %v8902_v35 = vld [vmem:[#allocation11 + $0xb0] sm:$0xff]   ;;  %v8886_v37 = vld [vmem:[#allocation8 + $0x18] sm:$0xff]   ;;  %v8887_v39 = vld [vmem:[#allocation8 + $0x20] sm:$0xff]  }
  0xa7   : > { %7177 = vmatprep.subr.bf16.mxu1 %v8909_v32  ;;  %v8915_v40 = vld [vmem:[#allocation11 + $0x60] sm:$0xff]   ;;  %v8904_v41 = vld [vmem:[#allocation11 + $0xa8] sm:$0xff]   ;;  %v8917_v44 = vld [vmem:[#allocation11 + $0x58] sm:$0xff]   ;;  %p9285_p3 = pnand %p9284_p10, %p9278_p12 }
  0xa8   : > { %8596 = vmatpush3.bf16.msra.mxu0 %v602_v9  ;;  %v8906_v42 = vld [vmem:[#allocation11 + $0xe0] sm:$0xff]   ;;  %v8912_v46 = vld [vmem:[#allocation11 + $0xd8] sm:$0xff]   ;;  %v8888_v47 = vld [vmem:[#allocation8 + $0x28] sm:$0xff]   ;;  %v12607_v9 = vmov 0.0|0.0  }
  0xa9   : > { %8597 = vmatprep.subr.bf16.mxu0 %v601_v12  ;;  %v8916_v43 = vld [vmem:[#allocation11 + $0x20] sm:$0xff]   ;;  %v8919_v48 = vld [vmem:[#allocation11 + $0x18] sm:$0xff]   ;;  %v8889_v49 = vld [vmem:[#allocation8 + $0x30] sm:$0xff]   ;;  %2613 = vmatprep.mubr.bf16.mxu1 %v12607_v9 }
  0xaa   : > { %7178 = vmatpush3.bf16.msra.mxu1 %v8910_v33  ;;  %v8908_v45 = vld [vmem:[#allocation11 + $0xa0] sm:$0xff]   ;;  %v8914_v50 = vld [vmem:[#allocation11 + $0x98] sm:$0xff]   ;;  %v8921_v51 = vld [vmem:[#allocation11 + $0x50] sm:$0xff]  }
  0xab   : > { %7179 = vmatprep.subr.bf16.mxu1 %v8911_v34  ;;  %v8918_v52 = vld [vmem:[#allocation11 + $0xd0] sm:$0xff]   ;;  %v8923_v54 = vld [vmem:[#allocation11 + $0x48] sm:$0xff]   ;;  %v8890_v58 = vld [vmem:[#allocation8 + $0x38] sm:$0xff]  }
  0xac   : > { %8598 = vmatpush3.bf16.msra.mxu0 %v601_v12  ;;  %v8922_v53 = vld [vmem:[#allocation11 + $0x10] sm:$0xff]   ;;  %v8924_v56 = vld [vmem:[#allocation11 + $0xc8] sm:$0xff]   ;;  %v8891_v59 = vld [vmem:[#allocation8 + $0x40] sm:$0xff]  }
  0xad   : > { %8599 = vmatprep.subr.bf16.mxu0 %v600_v15  ;;  %v8920_v55 = vld [vmem:[#allocation11 + $0x90] sm:$0xff]   ;;  %v8925_v57 = vld [vmem:[#allocation11 + $0x8] sm:$0xff]   ;;  %v8894_v63 = vld [vmem:[#allocation8 + $0x58] sm:$0xff]  }
  0xae   : > { %7180 = vmatpush3.bf16.msra.mxu1 %v8913_v38  ;;  %v8926_v60 = vld [vmem:[#allocation11 + $0x88] sm:$0xff]   ;;  %v8893_v62 = vld [vmem:[#allocation8 + $0x50] sm:$0xff]   ;;  %v8895_v0 = vld [vmem:[#allocation8 + $0x60] sm:$0xff]   ;;  %v9695_v38 = vrot.slane %v9367_v6, 1 }
  0xaf   : > { %7181 = vmatprep.subr.bf16.mxu1 %v8915_v40  ;;  %v8892_v61 = vld [vmem:[#allocation8 + $0x48] sm:$0xff]   ;;  %v8897_v2 = vld [vmem:[#allocation8 + $0x70] sm:$0xff]   ;;  %v8898_v3 = vld [vmem:[#allocation8 + $0x78] sm:$0xff]  }
  0xb0   : > { %8600 = vmatpush3.bf16.msra.mxu0 %v600_v15  ;;  %v8896_v1 = vld [vmem:[#allocation8 + $0x68] sm:$0xff]   ;;  %v8927_v4 = vld [vmem:[#allocation11 + $0x40] sm:$0xff]   ;;  %v8931_v12 = vld [vmem:[#allocation11 + $0x1f8] sm:$0xff]   ;;  %12704 = vst [vmem:[#allocation26_spill] sm:$0xff] %v9695_v38 }
  0xb1   : > { %8601 = vmatprep.subr.bf16.mxu0 %v599_v18  ;;  %v8928_v5 = vld [vmem:[#allocation11] sm:$0xff]   ;;  %v8939_v13 = vld [vmem:[#allocation11 + $0x178] sm:$0xff]   ;;  %v8943_v15 = vld [vmem:[#allocation11 + $0x170] sm:$0xff]  }
  0xb2   : > { %7182 = vmatpush3.bf16.msra.mxu1 %v8916_v43  ;;  %v8929_v10 = vld [vmem:[#allocation11 + $0xc0] sm:$0xff]   ;;  %v8940_v14 = vld [vmem:[#allocation11 + $0x138] sm:$0xff]   ;;  %v8944_v16 = vld [vmem:[#allocation11 + $0x130] sm:$0xff]  }
  0xb3   : > { %7183 = vmatprep.subr.bf16.mxu1 %v8917_v44  ;;  %v8930_v11 = vld [vmem:[#allocation11 + $0x80] sm:$0xff]   ;;  %v8947_v17 = vld [vmem:[#allocation11 + $0x168] sm:$0xff]   ;;  %v8954_v22 = vld [vmem:[#allocation11 + $0x118] sm:$0xff]  }
  0xb4   : > { %8602 = vmatpush3.bf16.msra.mxu0 %v599_v18  ;;  %v8948_v18 = vld [vmem:[#allocation11 + $0x128] sm:$0xff]   ;;  %v8951_v19 = vld [vmem:[#allocation11 + $0x160] sm:$0xff]   ;;  %v8955_v23 = vld [vmem:[#allocation11 + $0x150] sm:$0xff]  }
  0xb5   : > { %8603 = vmatprep.subr.bf16.mxu0 %v598_v21  ;;  %v8952_v20 = vld [vmem:[#allocation11 + $0x120] sm:$0xff]   ;;  %v8957_v25 = vld [vmem:[#allocation11 + $0x148] sm:$0xff]  }
  0xb6   : > { %7184 = vmatpush3.bf16.msra.mxu1 %v8919_v48 }
  0xb7   : > { %7185 = vmatprep.subr.bf16.mxu1 %v8921_v51 }
  0xb8   : > { %8604 = vmatpush3.bf16.msra.mxu0 %v598_v21  ;;  %v8953_v21 = vld [vmem:[#allocation11 + $0x158] sm:$0xff]  }
  0xb9   : > { %8605 = vmatprep.subr.bf16.mxu0 %v597_v24 }
  0xba   : > { %7186 = vmatpush3.bf16.msra.mxu1 %v8922_v53 }
  0xbb   : > { %7187 = vmatprep.subr.bf16.mxu1 %v8923_v54 }
  0xbc   : > { %8606 = vmatpush3.bf16.msra.mxu0 %v597_v24  ;;  %v8956_v24 = vld [vmem:[#allocation11 + $0x110] sm:$0xff]  }
  0xbd   : > { %7287 = vmatprep.subr.bf16.mxu0 %v8899_v27  ;;  %v8961_v27 = vld [vmem:[#allocation11 + $0x140] sm:$0xff]  }
  0xbe   : > { %7188 = vmatpush3.bf16.msra.mxu1 %v8925_v57 }
  0xbf   : > { %8608 = vmatmul.mubr.bf16.vlgmr.msra.gmra.mxu0 %v8884_v26  ;;  %7189 = vmatprep.subr.bf16.mxu1 %v8927_v4  ;;  %v8959_v26 = vld [vmem:[#allocation11 + $0x108] sm:$0xff]  }
  0xc0   : > { %8611 = vmatprep.mubr.bf16.mxu0 %v8885_v28  ;;  %7288 = vmatpush3.bf16.msra.mxu0 %v8900_v29  ;;  %v8962_v28 = vld [vmem:[#allocation11 + $0x100] sm:$0xff]  }
  0xc1   : > { %7289 = vmatprep.subr.bf16.mxu0 %v8901_v31 }
  0xc2   : > { %7190 = vmatpush3.bf16.msra.mxu1 %v8928_v5  ;;  %v8937_v5 = vld [vmem:[#allocation11 + $0x1e0] sm:$0xff]  }
  0xc3   : > { %7399 = vmatprep.subr.bf16.mxu1 %v8939_v13 }
  0xc4   : > { %7290 = vmatpush3.bf16.msra.mxu0 %v8902_v35 }
  0xc5   : > { %7291 = vmatprep.subr.bf16.mxu0 %v8903_v36  ;;  %2614 = vmatmul.mubr.bf16.vlgmr.msra.gmra.mxu1 %v9683_v8 }
  0xc6   : > { %7400 = vmatpush3.bf16.msra.mxu1 %v8940_v14 }
  0xc7   : > { %8612 = vmatmul.mubr.bf16.gmra.mxu0 %v8886_v37  ;;  %7401 = vmatprep.subr.bf16.mxu1 %v8943_v15  ;;  %v8938_v15 = vld [vmem:[#allocation11 + $0x1a0] sm:$0xff]  }
  0xc8   : > { %8615 = vmatprep.mubr.bf16.mxu0 %v8887_v39  ;;  %7292 = vmatpush3.bf16.msra.mxu0 %v8904_v41 }
  0xc9   : > { %7293 = vmatprep.subr.bf16.mxu0 %v8906_v42  ;;  %v9705_v42 = vpack.c.bf16 %v9695_v38, %v9695_v38 }
  0xca   : > { %7402 = vmatpush3.bf16.msra.mxu1 %v8944_v16  ;;  %v8941_v16 = vld [vmem:[#allocation11 + $0x1d8] sm:$0xff]  }
  0xcb   : > { %7403 = vmatprep.subr.bf16.mxu1 %v8947_v17  ;;  %12705 = vst [vmem:[#allocation27_spill] sm:$0xff] %v9705_v42 }
  0xcc   : > { %7294 = vmatpush3.bf16.msra.mxu0 %v8908_v45 }
  0xcd   : > { %7295 = vmatprep.subr.bf16.mxu0 %v8912_v46  ;;  %v8932_v46 = vld [vmem:[#allocation11 + $0x1b8] sm:$0xff]  }
  0xce   : > { %7404 = vmatpush3.bf16.msra.mxu1 %v8948_v18 }
  0xcf   : > { %8616 = vmatmul.mubr.bf16.gmra.mxu0 %v8888_v47  ;;  %7405 = vmatprep.subr.bf16.mxu1 %v8951_v19 }
  0xd0   : > { %8619 = vmatprep.mubr.bf16.mxu0 %v8889_v49  ;;  %7296 = vmatpush3.bf16.msra.mxu0 %v8914_v50  ;;  %v8933_v50 = vld [vmem:[#allocation11 + $0x1f0] sm:$0xff]  }
  0xd1   : > { %7297 = vmatprep.subr.bf16.mxu0 %v8918_v52 }
  0xd2   : > { %7406 = vmatpush3.bf16.msra.mxu1 %v8952_v20 }
  0xd3   : > { %7407 = vmatprep.subr.bf16.mxu1 %v8953_v21 }
  0xd4   : > { %7298 = vmatpush3.bf16.msra.mxu0 %v8920_v55 }
  0xd5   : > { %7299 = vmatprep.subr.bf16.mxu0 %v8924_v56  ;;  %v8934_v56 = vld [vmem:[#allocation11 + $0x1b0] sm:$0xff]  }
  0xd6   : > { %7408 = vmatpush3.bf16.msra.mxu1 %v8954_v22 }
  0xd7   : > { %8620 = vmatmul.mubr.bf16.gmra.mxu0 %v8890_v58  ;;  %7409 = vmatprep.subr.bf16.mxu1 %v8955_v23  ;;  %v8942_v23 = vld [vmem:[#allocation11 + $0x198] sm:$0xff]  }
  0xd8   : > { %8623 = vmatprep.mubr.bf16.mxu0 %v8891_v59  ;;  %7300 = vmatpush3.bf16.msra.mxu0 %v8926_v60  ;;  %v8935_v59 = vld [vmem:[#allocation11 + $0x1e8] sm:$0xff]  }
  0xd9   : > { %7301 = vmatprep.subr.bf16.mxu0 %v8929_v10 }
  0xda   : > { %7410 = vmatpush3.bf16.msra.mxu1 %v8956_v24 }
  0xdb   : > { %7411 = vmatprep.subr.bf16.mxu1 %v8957_v25 }
  0xdc   : > { %7302 = vmatpush3.bf16.msra.mxu0 %v8930_v11 }
  0xdd   : > { %7511 = vmatprep.subr.bf16.mxu0 %v8931_v12 }
  0xde   : > { %7412 = vmatpush3.bf16.msra.mxu1 %v8959_v26 }
  0xdf   : > { %8624 = vmatmul.mubr.bf16.gmra.mxu0 %v8892_v61  ;;  %7413 = vmatprep.subr.bf16.mxu1 %v8961_v27 }
  0xe0   : > { %8627 = vmatprep.mubr.bf16.mxu0 %v8893_v62 }
  0xe2   : > { %7414 = vmatpush3.bf16.msra.mxu1 %v8962_v28  ;;  %v8945_v28 = vld [vmem:[#allocation11 + $0x1d0] sm:$0xff]  }
  0xe7   : > { %8628 = vmatmul.mubr.bf16.gmra.mxu0 %v8894_v63 }
  0xe8   : > { %8631 = vmatprep.mubr.bf16.mxu0 %v8895_v0 }
  0xef   : > { %8632 = vmatmul.mubr.bf16.gmra.mxu0 %v8896_v1 }
  0xf0   : > { %8635 = vmatprep.mubr.bf16.mxu0 %v8897_v2  ;;  %v8936_v2 = vld [vmem:[#allocation11 + $0x1a8] sm:$0xff]  }
  0xf7   : > { %8636 = vmatmul.mubr.bf16.gmra.mxu0 %v8898_v3 }
 0x17f   : > { %v9687_v29 = vpop.f32.mrf.mxu0 }
 0x180   : > { %v1686_v35 = vrot.slane %v9687_v29, 7  ;;  %v1845_v13 = vrot.slane %v9687_v29, 1 }
 0x181   : > { %v735_v30 = vpop.f32.mrf.mxu0 }
 0x182   : > { %v1681_v32 = vrot.slane %v735_v30, 7  ;;  %v1687_v49 = vsel %vm1047_vm0, %v9679_v7, %v1686_v35  ;;  %v1840_v54 = vrot.slane %v735_v30, 1 }
 0x183   : > { %v9689_v31 = vpop.f32.mrf.mxu0 }
 0x184   : > { %v1688_v33 = vrot.slane %v9689_v31, 7  ;;  %v1682_v40 = vsel %vm1047_vm0, %v9679_v7, %v1681_v32  ;;  %v9712_v47 = vpack.c.bf16 %v9689_v31, %v9687_v29  ;;  %v1846_v6 = vrot.slane %v9689_v31, 1 }
 0x185   : > { %v738_v34 = vpop.f32.mrf.mxu0 }
 0x186   : > { %v1683_v36 = vrot.slane %v738_v34, 7  ;;  %v9693_v37 = vpack.c.bf16 %v738_v34, %v735_v30  ;;  %v1689_v43 = vsel %vm1047_vm0, %v1686_v35, %v1688_v33  ;;  %v1841_v51 = vrot.slane %v738_v34, 1  ;;  %v8946_v34 = vld [vmem:[#allocation11 + $0x190] sm:$0xff]  }
 0x187   : > { %v9697_v39 = vpop.f32.mrf.mxu0  ;;  %v9719_v53 = vpack.c.bf16 %v1689_v43, %v1687_v49  ;;  %v1847_v17 = vsel %vm1208_vm1, %v1845_v13, %v1846_v6  ;;  %v1849_v18 = vsel %vm1208_vm1, %v1846_v6, %v9695_v38 }
 0x188   : > { %2621 = vmatprep.mubr.bf16.mxu1 %v9693_v37  ;;  %v1684_v41 = vsel %vm1047_vm0, %v1681_v32, %v1683_v36  ;;  %v1842_v60 = vsel %vm1208_vm1, %v1840_v54, %v1841_v51  ;;  %v1844_v61 = vsel %vm1208_vm1, %v1841_v51, %v9695_v38  ;;  %v1696_v11 = vrot.slane %v9697_v39, 7  ;;  %v8958_v51 = vld [vmem:[#allocation11 + $0x1c0] sm:$0xff]  }
 0x189   : > { %v9708_v44 = vpop.f32.mrf.mxu0  ;;  %v1788_v45 = vpack.c.bf16 %v1684_v41, %v1682_v40  ;;  %v9743_v4 = vpack.c.bf16 %v1844_v61, %v1842_v60  ;;  %v9772_v26 = vpack.c.bf16 %v1849_v18, %v1847_v17  ;;  %v8949_v40 = vld [vmem:[#allocation11 + $0x1c8] sm:$0xff]   ;;  %v1855_v54 = vrot.slane %v9697_v39, 1 }
 0x18a   : > { %v1691_v48 = vrot.slane %v9708_v44, 7  ;;  %v1697_v20 = vsel %vm1047_vm0, %v9679_v7, %v1696_v11  ;;  %v1850_v29 = vrot.slane %v9708_v44, 1 }
 0x18b   : > { %2622 = vmatmul.mubr.bf16.gmra.mxu1 %v1788_v45  ;;  %2774 = vmatprep.mubr.bf16.mxu0 %v1788_v45  ;;  %v9717_v52 = vpop.f32.mrf.mxu0 }
 0x18c   : > { %2629 = vmatprep.mubr.bf16.mxu1 %v9712_v47  ;;  %2775 = vmatmul.mubr.bf16.vlgmr.msra.gmra.mxu0 %v9705_v42  ;;  %v1692_v58 = vsel %vm1047_vm0, %v9679_v7, %v1691_v48  ;;  %v1698_v12 = vrot.slane %v9717_v52, 7  ;;  %v9769_v24 = vpack.c.bf16 %v9717_v52, %v9697_v39  ;;  %v8960_v39 = vld [vmem:[#allocation11 + $0x180] sm:$0xff]  }
 0x18d   : > { %7512 = vmatpush3.bf16.msra.mxu0 %v8932_v46  ;;  %2782 = vmatprep.mubr.bf16.mxu0 %v9719_v53  ;;  %v9724_v55 = vpop.f32.mrf.mxu0 }
 0x18e   : > { %v1693_v57 = vrot.slane %v9724_v55, 7  ;;  %7513 = vmatprep.subr.bf16.mxu0 %v8933_v50  ;;  %v9741_v3 = vpack.c.bf16 %v9724_v55, %v9708_v44  ;;  %v1699_v21 = vsel %vm1047_vm0, %v1696_v11, %v1698_v12  ;;  %v1851_v30 = vrot.slane %v9724_v55, 1 }
 0x18f   : > { %v9732_v62 = vpop.f32.mrf.mxu0  ;;  %v9778_v31 = vpack.c.bf16 %v1699_v21, %v1697_v20  ;;  %v1856_v55 = vrot.slane %v9717_v52, 1  ;;  %v8963_v52 = vld [vmem:[#allocation9 + $0x78] sm:$0xff]  }
 0x190   : > { %v1694_v63 = vsel %vm1047_vm0, %v1691_v48, %v1693_v57  ;;  %v1852_v41 = vsel %vm1208_vm1, %v1850_v29, %v1851_v30  ;;  %v1854_v43 = vsel %vm1208_vm1, %v1851_v30, %v9695_v38  ;;  %v8950_v48 = vld [vmem:[#allocation11 + $0x188] sm:$0xff]   ;;  %v1706_v57 = vrot.slane %v9732_v62, 7 }
 0x191   : > { %v9735_v0 = vpack.c.bf16 %v1694_v63, %v1692_v58  ;;  %v9737_v1 = vpop.f32.mrf.mxu0  ;;  %7514 = vmatpush3.bf16.msra.mxu0 %v8934_v56  ;;  %v9803_v50 = vpack.c.bf16 %v1854_v43, %v1852_v41  ;;  %v1857_v60 = vsel %vm1208_vm1, %v1855_v54, %v1856_v55  ;;  %v1859_v61 = vsel %vm1208_vm1, %v1856_v55, %v9695_v38 }
 0x192   : > { %7515 = vmatprep.subr.bf16.mxu0 %v8935_v59  ;;  %v1701_v25 = vrot.slane %v9737_v1, 7  ;;  %v9832_v13 = vpack.c.bf16 %v1859_v61, %v1857_v60 }
 0x193   : > { %2630 = vmatmul.mubr.bf16.gmra.mxu1 %v9719_v53  ;;  %v9747_v10 = vpop.f32.mrf.mxu0 }
 0x194   : > { %2637 = vmatprep.mubr.bf16.mxu1 %v9741_v3  ;;  %2783 = vmatmul.mubr.bf16.gmra.mxu0 %v9743_v4  ;;  %v1702_v35 = vsel %vm1047_vm0, %v9679_v7, %v1701_v25  ;;  %v1708_v58 = vrot.slane %v9747_v10, 7  ;;  %v9829_v11 = vpack.c.bf16 %v9747_v10, %v9732_v62 }
 0x195   : > { %2790 = vmatprep.mubr.bf16.mxu0 %v9735_v0  ;;  %v9755_v14 = vpop.f32.mrf.mxu0  ;;  %7516 = vmatpush3.bf16.msra.mxu0 %v8936_v2  ;;  %v1707_v2 = vsel %vm1047_vm0, %v9679_v7, %v1706_v57 }
 0x196   : > { %7517 = vmatprep.subr.bf16.mxu0 %v8937_v5  ;;  %v1703_v27 = vrot.slane %v9755_v14, 7  ;;  %v9801_v49 = vpack.c.bf16 %v9755_v14, %v9737_v1  ;;  %v1709_v5 = vsel %vm1047_vm0, %v1706_v57, %v1708_v58  ;;  %v1861_v17 = vrot.slane %v9755_v14, 1 }
 0x197   : > { %v9760_v19 = vpop.f32.mrf.mxu0  ;;  %v9838_v18 = vpack.c.bf16 %v1709_v5, %v1707_v2 }
 0x198   : > { %v1704_v36 = vsel %vm1047_vm0, %v1701_v25, %v1703_v27  ;;  %v1864_v25 = vsel %vm1208_vm1, %v1861_v17, %v9695_v38  ;;  %v1716_v41 = vrot.slane %v9760_v19, 7 }
 0x199   : > { %v9765_v22 = vpop.f32.mrf.mxu0  ;;  %7518 = vmatpush3.bf16.msra.mxu0 %v8938_v15  ;;  %v9795_v45 = vpack.c.bf16 %v1704_v36, %v1702_v35  ;;  %v1865_v35 = vrot.slane %v9732_v62, 1  ;;  %v1866_v36 = vrot.slane %v9747_v10, 1 }
 0x19a   : > { %7519 = vmatprep.subr.bf16.mxu0 %v8941_v16  ;;  %v1711_v12 = vrot.slane %v9765_v22, 7  ;;  %v1860_v16 = vrot.slane %v9737_v1, 1  ;;  %v1717_v54 = vsel %vm1047_vm0, %v9679_v7, %v1716_v41  ;;  %v1870_v61 = vrot.slane %v9765_v22, 1 }
 0x19b   : > { %2638 = vmatmul.mubr.bf16.gmra.mxu1 %v9735_v0  ;;  %v9780_v32 = vpop.f32.mrf.mxu0  ;;  %v1867_v62 = vsel %vm1208_vm1, %v1865_v35, %v1866_v36  ;;  %v1869_v10 = vsel %vm1208_vm1, %v1866_v36, %v9695_v38 }
 0x19c   : > { %2645 = vmatprep.mubr.bf16.mxu1 %v9769_v24  ;;  %2791 = vmatmul.mubr.bf16.gmra.mxu0 %v9772_v26  ;;  %v1862_v14 = vsel %vm1208_vm1, %v1860_v16, %v1861_v17  ;;  %v1718_v43 = vrot.slane %v9780_v32, 7  ;;  %v9889_v58 = vpack.c.bf16 %v9780_v32, %v9760_v19 }
 0x19d   : > { %2798 = vmatprep.mubr.bf16.mxu0 %v9778_v31  ;;  %v9785_v33 = vpop.f32.mrf.mxu0  ;;  %7520 = vmatpush3.bf16.msra.mxu0 %v8942_v23  ;;  %v1712_v23 = vsel %vm1047_vm0, %v9679_v7, %v1711_v12 }
 0x19e   : > { %7521 = vmatprep.subr.bf16.mxu0 %v8945_v28  ;;  %v1713_v15 = vrot.slane %v9785_v33, 7  ;;  %v9861_v30 = vpack.c.bf16 %v9785_v33, %v9765_v22  ;;  %v1719_v55 = vsel %vm1047_vm0, %v1716_v41, %v1718_v43  ;;  %v1871_v2 = vrot.slane %v9785_v33, 1 }
 0x19f   : > { %v9793_v44 = vpop.f32.mrf.mxu0  ;;  %v9898_v5 = vpack.c.bf16 %v1719_v55, %v1717_v54  ;;  %v7191_v54 = vpop.f32.mrf.mxu1 }
 0x1a0   : > { %v1714_v1 = vsel %vm1047_vm0, %v1711_v12, %v1713_v15  ;;  %v1726_v55 = vrot.slane %v9793_v44, 7 }
 0x1a1   : > { %v9797_v46 = vpop.f32.mrf.mxu0  ;;  %7522 = vmatpush3.bf16.msra.mxu0 %v8946_v34  ;;  %v9855_v28 = vpack.c.bf16 %v1714_v1, %v1712_v23  ;;  %v9863_v34 = vpack.c.bf16 %v1864_v25, %v1862_v14  ;;  %v1872_v23 = vsel %vm1208_vm1, %v1870_v61, %v1871_v2  ;;  %v1874_v1 = vsel %vm1208_vm1, %v1871_v2, %v9695_v38  ;;  %v9938_v61 = vld [vmem:[#allocation11 + $0x238] sm:$0xff]  }
 0x1a2   : > { %7523 = vmatprep.subr.bf16.mxu0 %v8949_v40  ;;  %v9928_v43 = vpack.c.bf16 %v1874_v1, %v1872_v23  ;;  %8639 = vmatprep.subr.bf16.mxu1 %v9938_v61 }
 0x1a3   : > { %2646 = vmatmul.mubr.bf16.gmra.mxu1 %v9778_v31  ;;  %v9808_v56 = vpop.f32.mrf.mxu0 }
 0x1a4   : > { %2653 = vmatprep.mubr.bf16.mxu1 %v9801_v49  ;;  %2799 = vmatmul.mubr.bf16.gmra.mxu0 %v9803_v50 }
 0x1a5   : > { %2806 = vmatprep.mubr.bf16.mxu0 %v9795_v45  ;;  %v9815_v59 = vpop.f32.mrf.mxu0  ;;  %7524 = vmatpush3.bf16.msra.mxu0 %v8950_v48 }
 0x1a6   : > { %7525 = vmatprep.subr.bf16.mxu0 %v8958_v51  ;;  %v1723_v60 = vrot.slane %v9815_v59, 7  ;;  %v9926_v41 = vpack.c.bf16 %v9815_v59, %v9797_v46 }
 0x1a7   : > { %v9820_v63 = vpop.f32.mrf.mxu0 }
 0x1a9   : > { %v9825_v6 = vpop.f32.mrf.mxu0  ;;  %7526 = vmatpush3.bf16.msra.mxu0 %v8960_v39  ;;  %v1721_v39 = vrot.slane %v9797_v46, 7 }
 0x1aa   : > { %7647 = vmatprep.subr.bf16.mxu0 %v8963_v52  ;;  %v9892_v52 = vpack.c.bf16 %v1869_v10, %v1867_v62  ;;  %v1875_v62 = vrot.slane %v9760_v19, 1  ;;  %v1876_v10 = vrot.slane %v9780_v32, 1 }
 0x1ab   : > { %2654 = vmatmul.mubr.bf16.gmra.mxu1 %v9795_v45  ;;  %v9840_v20 = vpop.f32.mrf.mxu0  ;;  %v1722_v33 = vsel %vm1047_vm0, %v9679_v7, %v1721_v39  ;;  %v1724_v17 = vsel %vm1047_vm0, %v1721_v39, %v1723_v60  ;;  %v1728_v39 = vrot.slane %v9808_v56, 7  ;;  %v7192_v60 = vpop.f32.mrf.mxu1 }
 0x1ac   : > { %2661 = vmatprep.mubr.bf16.mxu1 %v9829_v11  ;;  %2807 = vmatmul.mubr.bf16.gmra.mxu0 %v9832_v13  ;;  %v9922_v36 = vpack.c.bf16 %v1724_v17, %v1722_v33  ;;  %v9940_v2 = vadd.f32 %v7192_v60, %v7191_v54  ;;  %v1877_v19 = vsel %vm1208_vm1, %v1875_v62, %v1876_v10  ;;  %v1731_v17 = vrot.slane %v9825_v6, 7 }
 0x1ad   : > { %2814 = vmatprep.mubr.bf16.mxu0 %v9838_v18  ;;  %v9845_v21 = vpop.f32.mrf.mxu0  ;;  %v1879_v32 = vsel %vm1208_vm1, %v1876_v10, %v9695_v38  ;;  %v9951_v33 = vpack.c.bf16 %v9808_v56, %v9793_v44 }
 0x1ae   : > { %v9954_v23 = vpack.c.bf16 %v1879_v32, %v1877_v19  ;;  %v1733_v1 = vrot.slane %v9845_v21, 7  ;;  %v1732_v10 = vsel %vm1047_vm0, %v9679_v7, %v1731_v17  ;;  %v1885_v19 = vrot.slane %v9793_v44, 1 }
 0x1af   : > { %v9853_v27 = vpop.f32.mrf.mxu0  ;;  %v1886_v32 = vrot.slane %v9808_v56, 1 }
 0x1b0   : > { %v1734_v54 = vsel %vm1047_vm0, %v1731_v17, %v1733_v1 }
 0x1b1   : > { %v9857_v29 = vpop.f32.mrf.mxu0  ;;  %v1887_v17 = vsel %vm1208_vm1, %v1885_v19, %v1886_v32  ;;  %v1889_v1 = vsel %vm1208_vm1, %v1886_v32, %v9695_v38 }
 0x1b3   : > { %2662 = vmatmul.mubr.bf16.gmra.mxu1 %v9838_v18  ;;  %v9868_v40 = vpop.f32.mrf.mxu0 }
 0x1b4   : > { %2669 = vmatprep.mubr.bf16.mxu1 %v9861_v30  ;;  %2815 = vmatmul.mubr.bf16.gmra.mxu0 %v9863_v34  ;;  %v1906_v8 = vrot.slane %v9868_v40, 1 }
 0x1b5   : > { %2822 = vmatprep.mubr.bf16.mxu0 %v9855_v28  ;;  %v9875_v48 = vpop.f32.mrf.mxu0 }
 0x1b6   : > { %v1901_v42 = vrot.slane %v9875_v48, 1 }
 0x1b7   : > { %v9880_v51 = vpop.f32.mrf.mxu0 }
 0x1b8   : > { %v1976_v12 = vrot.slane %v9880_v51, 1 }
 0x1b9   : > { %v9885_v57 = vpop.f32.mrf.mxu0 }
 0x1bb   : > { %2670 = vmatmul.mubr.bf16.gmra.mxu1 %v9855_v28  ;;  %v9901_v15 = vpop.f32.mrf.mxu0 }
 0x1bc   : > { %2677 = vmatprep.mubr.bf16.mxu1 %v9889_v58  ;;  %2823 = vmatmul.mubr.bf16.gmra.mxu0 %v9892_v52  ;;  %v9907_v16 = vpack.c.bf16 %v9901_v15, %v9880_v51  ;;  %v1977_v22 = vrot.slane %v9901_v15, 1 }
 0x1bd   : > { %2830 = vmatprep.mubr.bf16.mxu0 %v9898_v5 }
 0x1be   : > { %v1978_v14 = vsel %vm1208_vm1, %v1976_v12, %v1977_v22  ;;  %v1980_v25 = vsel %vm1208_vm1, %v1977_v22, %v9695_v38  ;;  %v1727_v12 = vsel %vm1047_vm0, %v9679_v7, %v1726_v55  ;;  %v1729_v22 = vsel %vm1047_vm0, %v1726_v55, %v1728_v39 }
 0x1bf   : > { %v9920_v35 = vpack.c.bf16 %v1980_v25, %v1978_v14  ;;  %v1880_v14 = vrot.slane %v9797_v46, 1  ;;  %v1881_v25 = vrot.slane %v9815_v59, 1  ;;  %v9960_v62 = vpack.c.bf16 %v1729_v22, %v1727_v12 }
 0x1c0   : > { %v9971_v59 = vpack.c.bf16 %v1734_v54, %v1732_v10  ;;  %v9975_v39 = vpack.c.bf16 %v9845_v21, %v9825_v6  ;;  %v1736_v12 = vrot.slane %v9820_v63, 7  ;;  %v1738_v22 = vrot.slane %v9840_v20, 7 }
 0x1c1   : > { %v1882_v55 = vsel %vm1208_vm1, %v1880_v14, %v1881_v25  ;;  %v1884_v46 = vsel %vm1208_vm1, %v1881_v25, %v9695_v38  ;;  %v9995_v14 = vpack.c.bf16 %v9840_v20, %v9820_v63  ;;  %v1741_v25 = vrot.slane %v9857_v29, 7 }
 0x1c2   : > { %v9977_v60 = vpack.c.bf16 %v1884_v46, %v1882_v55  ;;  %v1737_v44 = vsel %vm1047_vm0, %v9679_v7, %v1736_v12  ;;  %v1739_v56 = vsel %vm1047_vm0, %v1736_v12, %v1738_v22  ;;  %v9998_v10 = vpack.c.bf16 %v1889_v1, %v1887_v17 }
 0x1c3   : > { %2678 = vmatmul.mubr.bf16.gmra.mxu1 %v9898_v5  ;;  %v1743_v54 = vrot.slane %v9875_v48, 7  ;;  %v1890_v55 = vrot.slane %v9825_v6, 1  ;;  %v1891_v46 = vrot.slane %v9845_v21, 1  ;;  %v10004_v19 = vpack.c.bf16 %v1739_v56, %v1737_v44 }
 0x1c4   : > { %2685 = vmatprep.mubr.bf16.mxu1 %v9926_v41  ;;  %2831 = vmatmul.mubr.bf16.gmra.mxu0 %v9928_v43  ;;  %v1742_v32 = vsel %vm1047_vm0, %v9679_v7, %v1741_v25  ;;  %v10019_v17 = vpack.c.bf16 %v9875_v48, %v9857_v29  ;;  %v1895_v44 = vrot.slane %v9820_v63, 1  ;;  %v1896_v56 = vrot.slane %v9840_v20, 1  ;;  %v850_v63 = vpop.f32.mrf.mxu0 }
 0x1c5   : > { %2838 = vmatprep.mubr.bf16.mxu0 %v9922_v36  ;;  %v1744_v12 = vsel %vm1047_vm0, %v1741_v25, %v1743_v54  ;;  %v1892_v22 = vsel %vm1208_vm1, %v1890_v55, %v1891_v46  ;;  %v1894_v6 = vsel %vm1208_vm1, %v1891_v46, %v9695_v38  ;;  %v1746_v25 = vrot.slane %v9853_v27, 7 }
 0x1c6   : > { %v10015_v21 = vpack.c.bf16 %v1744_v12, %v1742_v32  ;;  %v10021_v1 = vpack.c.bf16 %v1894_v6, %v1892_v22  ;;  %v1748_v54 = vrot.slane %v9868_v40, 7  ;;  %v1897_v55 = vsel %vm1208_vm1, %v1895_v44, %v1896_v56 }
 0x1c7   : > { %v1899_v46 = vsel %vm1208_vm1, %v1896_v56, %v9695_v38  ;;  %v1747_v20 = vsel %vm1047_vm0, %v9679_v7, %v1746_v25  ;;  %v10039_v12 = vpack.c.bf16 %v9868_v40, %v9853_v27  ;;  %v1751_v22 = vrot.slane %v9885_v57, 7 }
 0x1c8   : > { %v1749_v32 = vsel %vm1047_vm0, %v1746_v25, %v1748_v54  ;;  %v10042_v6 = vpack.c.bf16 %v1899_v46, %v1897_v55  ;;  %v1753_v9 = vrot.slane %v850_v63, 7  ;;  %v1900_v44 = vrot.slane %v9857_v29, 1 }
 0x1c9   : > { %v10047_v56 = vpack.c.bf16 %v1749_v32, %v1747_v20  ;;  %v1752_v25 = vsel %vm1047_vm0, %v9679_v7, %v1751_v22  ;;  %v1904_v29 = vsel %vm1208_vm1, %v1901_v42, %v9695_v38  ;;  %v10061_v46 = vpack.c.bf16 %v850_v63, %v9885_v57 }
 0x1ca   : > { %v1754_v54 = vsel %vm1047_vm0, %v1751_v22, %v1753_v9  ;;  %v1902_v55 = vsel %vm1208_vm1, %v1900_v44, %v1901_v42  ;;  %v1905_v32 = vrot.slane %v9853_v27, 1  ;;  %v1967_v9 = vrot.slane %v9880_v51, 7 }
 0x1cb   : > { %2686 = vmatmul.mubr.bf16.gmra.mxu1 %v9922_v36  ;;  %v10058_v48 = vpack.c.bf16 %v1754_v54, %v1752_v25  ;;  %v10063_v20 = vpack.c.bf16 %v1904_v29, %v1902_v55  ;;  %v1969_v22 = vrot.slane %v9901_v15, 7  ;;  %v1909_v44 = vsel %vm1208_vm1, %v1906_v8, %v9695_v38 }
 0x1cc   : > { %2693 = vmatprep.mubr.bf16.mxu1 %v9951_v33  ;;  %2839 = vmatmul.mubr.bf16.gmra.mxu0 %v9954_v23  ;;  %v1907_v42 = vsel %vm1208_vm1, %v1905_v32, %v1906_v8  ;;  %v1968_v27 = vsel %vm1047_vm0, %v9679_v7, %v1967_v9  ;;  %v1910_v51 = vrot.slane %v9885_v57, 1  ;;  %v1911_v15 = vrot.slane %v850_v63, 1  ;;  %v8974_v32 = vld [vmem:[#allocation11 + $0x230] sm:$0xff]   ;;  %v8964_v57 = vld [vmem:[#allocation9 + $0x38] sm:$0xff]  }
 0x1cd   : > { %2846 = vmatprep.mubr.bf16.mxu0 %v9960_v62  ;;  %v1970_v40 = vsel %vm1047_vm0, %v1967_v9, %v1969_v22  ;;  %v10079_v25 = vpack.c.bf16 %v1909_v44, %v1907_v42  ;;  %v8965_v63 = vld [vmem:[#allocation9 + $0x70] sm:$0xff]   ;;  %v8980_v9 = vld [vmem:[#allocation11 + $0x220] sm:$0xff]   ;;  %v8967_v22 = vld [vmem:[#allocation9 + $0x68] sm:$0xff]  }
 0x1ce   : > { %v10083_v54 = vpack.c.bf16 %v1970_v40, %v1968_v27  ;;  %v1912_v8 = vsel %vm1208_vm1, %v1910_v51, %v1911_v15  ;;  %v1914_v55 = vsel %vm1208_vm1, %v1911_v15, %v9695_v38  ;;  %v8968_v42 = vld [vmem:[#allocation9 + $0x28] sm:$0xff]   ;;  %v8969_v44 = vld [vmem:[#allocation9 + $0x60] sm:$0xff]   ;;  %v8972_v27 = vld [vmem:[#allocation9 + $0x58] sm:$0xff]  }
 0x1cf   : > { %v10091_v29 = vpack.c.bf16 %v1914_v55, %v1912_v8  ;;  %v8983_v40 = vld [vmem:[#allocation11 + $0x208] sm:$0xff]   ;;  %v8973_v51 = vld [vmem:[#allocation9 + $0x18] sm:$0xff]   ;;  %v8975_v15 = vld [vmem:[#allocation9 + $0x50] sm:$0xff]  }
 0x1d0   : > { %v8978_v8 = vld [vmem:[#allocation9 + $0x48] sm:$0xff]  }
 0x1d1   : > { %v8979_v55 = vld [vmem:[#allocation9 + $0x8] sm:$0xff]  }
 0x1d3   : > { %2694 = vmatmul.mubr.bf16.gmra.mxu1 %v9960_v62 }
 0x1d4   : > { %2701 = vmatprep.mubr.bf16.mxu1 %v9975_v39  ;;  %2847 = vmatmul.mubr.bf16.gmra.mxu0 %v9977_v60 }
 0x1d5   : > { %2854 = vmatprep.mubr.bf16.mxu0 %v9971_v59 }
 0x1db   : > { %2702 = vmatmul.mubr.bf16.gmra.mxu1 %v9971_v59 }
 0x1dc   : > { %2709 = vmatprep.mubr.bf16.mxu1 %v9995_v14  ;;  %2855 = vmatmul.mubr.bf16.gmra.mxu0 %v9998_v10 }
 0x1dd   : > { %2862 = vmatprep.mubr.bf16.mxu0 %v10004_v19 }
 0x1e3   : > { %2710 = vmatmul.mubr.bf16.gmra.mxu1 %v10004_v19 }
 0x1e4   : > { %2717 = vmatprep.mubr.bf16.mxu1 %v10019_v17  ;;  %2863 = vmatmul.mubr.bf16.gmra.mxu0 %v10021_v1 }
 0x1e5   : > { %2870 = vmatprep.mubr.bf16.mxu0 %v10015_v21 }
 0x1eb   : > { %2718 = vmatmul.mubr.bf16.gmra.mxu1 %v10015_v21 }
 0x1ec   : > { %2725 = vmatprep.mubr.bf16.mxu1 %v10039_v12  ;;  %2871 = vmatmul.mubr.bf16.gmra.mxu0 %v10042_v6 }
 0x1ed   : > { %2878 = vmatprep.mubr.bf16.mxu0 %v10047_v56 }
 0x1f3   : > { %2726 = vmatmul.mubr.bf16.gmra.mxu1 %v10047_v56 }
 0x1f4   : > { %2733 = vmatprep.mubr.bf16.mxu1 %v10061_v46  ;;  %2879 = vmatmul.mubr.bf16.gmra.mxu0 %v10063_v20 }
 0x1f5   : > { %2886 = vmatprep.mubr.bf16.mxu0 %v10058_v48 }
 0x1fb   : > { %2734 = vmatmul.mubr.bf16.gmra.mxu1 %v10058_v48 }
 0x1fc   : > { %2887 = vmatmul.mubr.bf16.gmra.mxu0 %v10079_v25  ;;  %2935 = vmatprep.mubr.bf16.mxu1 %v9743_v4  ;;  %v8977_v4 = vld [vmem:[#allocation11 + $0x228] sm:$0xff]  }
 0x1fd   : > { %2894 = vmatprep.mubr.bf16.mxu0 %v10083_v54 }
 0x203   : > { %2936 = vmatmul.mubr.bf16.vlgmr.msra.gmra.mxu1 %v9693_v37  ;;  %v8966_v37 = vld [vmem:[#allocation9 + $0x30] sm:$0xff]  }
 0x204   : > { %2895 = vmatmul.mubr.bf16.gmra.mxu0 %v10091_v29  ;;  %2943 = vmatprep.mubr.bf16.mxu1 %v9772_v26 }
 0x205   : > { %3096 = vmatprep.mubr.bf16.mxu0 %v9712_v47  ;;  %8640 = vmatpush3.bf16.msra.mxu1 %v9938_v61  ;;  %v8981_v61 = vld [vmem:[#allocation11 + $0x218] sm:$0xff]  }
 0x206   : > { %8641 = vmatprep.subr.bf16.mxu1 %v8974_v32 }
 0x209   : > { %8642 = vmatpush3.bf16.msra.mxu1 %v8974_v32  ;;  %v8984_v32 = vld [vmem:[#allocation9 + $0x40] sm:$0xff]  }
 0x20a   : > { %8643 = vmatprep.subr.bf16.mxu1 %v8977_v4 }
 0x20b   : > { %2944 = vmatmul.mubr.bf16.gmra.mxu1 %v9712_v47  ;;  %v8982_v47 = vld [vmem:[#allocation11 + $0x210] sm:$0xff]  }
 0x20c   : > { %2951 = vmatprep.mubr.bf16.mxu1 %v9803_v50  ;;  %3097 = vmatmul.mubr.bf16.vlgmr.msra.gmra.mxu0 %v9719_v53  ;;  %v8970_v53 = vld [vmem:[#allocation9 + $0x20] sm:$0xff]  }
 0x20d   : > { %7648 = vmatpush3.bf16.msra.mxu0 %v8964_v57  ;;  %3104 = vmatprep.mubr.bf16.mxu0 %v9741_v3 }
 0x20e   : > { %7649 = vmatprep.subr.bf16.mxu0 %v8965_v63  ;;  %8644 = vmatpush3.bf16.msra.mxu1 %v8977_v4  ;;  %v8987_v4 = vld [vmem:[#allocation9 + $0x178] sm:$0xff]  }
 0x20f   : > { %8645 = vmatprep.subr.bf16.mxu1 %v8980_v9 }
 0x211   : > { %7650 = vmatpush3.bf16.msra.mxu0 %v8966_v37 }
 0x212   : > { %7651 = vmatprep.subr.bf16.mxu0 %v8967_v22  ;;  %8646 = vmatpush3.bf16.msra.mxu1 %v8980_v9 }
 0x213   : > { %2952 = vmatmul.mubr.bf16.gmra.mxu1 %v9741_v3  ;;  %8647 = vmatprep.subr.bf16.mxu1 %v8981_v61  ;;  %v8986_v3 = vld [vmem:[#allocation11 + $0x200] sm:$0xff]  }
 0x214   : > { %2959 = vmatprep.mubr.bf16.mxu1 %v9832_v13  ;;  %3105 = vmatmul.mubr.bf16.gmra.mxu0 %v9735_v0  ;;  %v8976_v0 = vld [vmem:[#allocation9 + $0x10] sm:$0xff]  }
 0x215   : > { %3112 = vmatprep.mubr.bf16.mxu0 %v9769_v24  ;;  %7652 = vmatpush3.bf16.msra.mxu0 %v8968_v42 }
 0x216   : > { %7653 = vmatprep.subr.bf16.mxu0 %v8969_v44  ;;  %8648 = vmatpush3.bf16.msra.mxu1 %v8981_v61 }
 0x217   : > { %8649 = vmatprep.subr.bf16.mxu1 %v8982_v47 }
 0x219   : > { %7654 = vmatpush3.bf16.msra.mxu0 %v8970_v53 }
 0x21a   : > { %7655 = vmatprep.subr.bf16.mxu0 %v8972_v27  ;;  %8650 = vmatpush3.bf16.msra.mxu1 %v8982_v47 }
 0x21b   : > { %2960 = vmatmul.mubr.bf16.gmra.mxu1 %v9769_v24  ;;  %8651 = vmatprep.subr.bf16.mxu1 %v8983_v40  ;;  %v8991_v24 = vld [vmem:[#allocation9 + $0xf8] sm:$0xff]  }
 0x21c   : > { %2967 = vmatprep.mubr.bf16.mxu1 %v9863_v34  ;;  %3113 = vmatmul.mubr.bf16.gmra.mxu0 %v9778_v31  ;;  %v8985_v31 = vld [vmem:[#allocation9] sm:$0xff]  }
 0x21d   : > { %3120 = vmatprep.mubr.bf16.mxu0 %v9801_v49  ;;  %7656 = vmatpush3.bf16.msra.mxu0 %v8973_v51 }
 0x21e   : > { %7657 = vmatprep.subr.bf16.mxu0 %v8975_v15  ;;  %8652 = vmatpush3.bf16.msra.mxu1 %v8983_v40 }
 0x21f   : > { %8653 = vmatprep.subr.bf16.mxu1 %v8986_v3 }
 0x221   : > { %7658 = vmatpush3.bf16.msra.mxu0 %v8976_v0 }
 0x222   : > { %7659 = vmatprep.subr.bf16.mxu0 %v8978_v8  ;;  %8654 = vmatpush3.bf16.msra.mxu1 %v8986_v3 }
 0x223   : > { %2968 = vmatmul.mubr.bf16.gmra.mxu1 %v9801_v49  ;;  %7759 = vmatprep.subr.bf16.mxu1 %v8991_v24 }
 0x224   : > { %2975 = vmatprep.mubr.bf16.mxu1 %v9892_v52  ;;  %3121 = vmatmul.mubr.bf16.gmra.mxu0 %v9795_v45  ;;  %v7194_v45 = vpop.f32.mrf.mxu1 }
 0x225   : > { %3128 = vmatprep.mubr.bf16.mxu0 %v9829_v11  ;;  %7660 = vmatpush3.bf16.msra.mxu0 %v8979_v55 }
 0x226   : > { %7661 = vmatprep.subr.bf16.mxu0 %v8984_v32  ;;  %v7195_v49 = vpop.f32.mrf.mxu1 }
 0x229   : > { %7662 = vmatpush3.bf16.msra.mxu0 %v8985_v31 }
 0x22a   : > { %7871 = vmatprep.subr.bf16.mxu0 %v8987_v4 }
 0x22b   : > { %2976 = vmatmul.mubr.bf16.gmra.mxu1 %v9829_v11 }
 0x22c   : > { %2983 = vmatprep.mubr.bf16.mxu1 %v9928_v43  ;;  %3129 = vmatmul.mubr.bf16.gmra.mxu0 %v9838_v18 }
 0x22d   : > { %3136 = vmatprep.mubr.bf16.mxu0 %v9861_v30 }
 0x233   : > { %2984 = vmatmul.mubr.bf16.gmra.mxu1 %v9861_v30 }
 0x234   : > { %2991 = vmatprep.mubr.bf16.mxu1 %v9954_v23  ;;  %3137 = vmatmul.mubr.bf16.gmra.mxu0 %v9855_v28 }
 0x235   : > { %3144 = vmatprep.mubr.bf16.mxu0 %v9889_v58 }
 0x23b   : > { %2992 = vmatmul.mubr.bf16.gmra.mxu1 %v9889_v58 }
 0x23c   : > { %2999 = vmatprep.mubr.bf16.mxu1 %v9977_v60  ;;  %3145 = vmatmul.mubr.bf16.gmra.mxu0 %v9898_v5 }
 0x23d   : > { %3152 = vmatprep.mubr.bf16.mxu0 %v9926_v41 }
 0x243   : > { %3000 = vmatmul.mubr.bf16.gmra.mxu1 %v9926_v41 }
 0x244   : > { %3007 = vmatprep.mubr.bf16.mxu1 %v9998_v10  ;;  %3153 = vmatmul.mubr.bf16.gmra.mxu0 %v9922_v36  ;;  %v7196_v36 = vadd.f32 %v7195_v49, %v7194_v45 }
 0x245   : > { %3160 = vmatprep.mubr.bf16.mxu0 %v9951_v33 }
 0x24b   : > { %v7197_v11 = vpop.f32.mrf.mxu1  ;;  %3008 = vmatmul.mubr.bf16.gmra.mxu1 %v9951_v33 }
 0x24c   : > { %v7303_v18 = vpop.f32.mrf.mxu0  ;;  %3015 = vmatprep.mubr.bf16.mxu1 %v10021_v1  ;;  %3161 = vmatmul.mubr.bf16.gmra.mxu0 %v9960_v62 }
 0x24d   : > { %v7198_v28 = vpop.f32.mrf.mxu1  ;;  %3168 = vmatprep.mubr.bf16.mxu0 %v9975_v39 }
 0x24e   : > { %v7199_v30 = vadd.f32 %v7198_v28, %v7197_v11  ;;  %v7304_v58 = vpop.f32.mrf.mxu0 }
 0x24f   : > { %v7305_v5 = vadd.f32 %v7304_v58, %v7303_v18  ;;  %v7200_v41 = vpop.f32.mrf.mxu1 }
 0x250   : > { %v7306_v57 = vpop.f32.mrf.mxu0 }
 0x251   : > { %v10135_v63 = vadd.f32 %v7305_v5, %v9940_v2  ;;  %v7201_v9 = vpop.f32.mrf.mxu1 }
 0x252   : > { %v7202_v37 = vadd.f32 %v7201_v9, %v7200_v41  ;;  %v7307_v33 = vpop.f32.mrf.mxu0 }
 0x253   : > { %v7308_v22 = vadd.f32 %v7307_v33, %v7306_v57  ;;  %v7203_v61 = vpop.f32.mrf.mxu1  ;;  %3016 = vmatmul.mubr.bf16.gmra.mxu1 %v9975_v39 }
 0x254   : > { %v7309_v62 = vpop.f32.mrf.mxu0  ;;  %3023 = vmatprep.mubr.bf16.mxu1 %v10042_v6  ;;  %3169 = vmatmul.mubr.bf16.gmra.mxu0 %v9971_v59 }
 0x255   : > { %v10140_v42 = vadd.f32 %v7308_v22, %v7196_v36  ;;  %v7204_v44 = vpop.f32.mrf.mxu1  ;;  %3176 = vmatprep.mubr.bf16.mxu0 %v9995_v14 }
 0x256   : > { %v7205_v47 = vadd.f32 %v7204_v44, %v7203_v61  ;;  %v7310_v2 = vpop.f32.mrf.mxu0 }
 0x257   : > { %v7311_v53 = vadd.f32 %v7310_v2, %v7309_v62  ;;  %v7206_v27 = vpop.f32.mrf.mxu1 }
 0x258   : > { %v7312_v40 = vpop.f32.mrf.mxu0 }
 0x259   : > { %v10143_v51 = vadd.f32 %v7311_v53, %v7199_v30  ;;  %v7207_v15 = vpop.f32.mrf.mxu1 }
 0x25a   : > { %v7208_v3 = vadd.f32 %v7207_v15, %v7206_v27  ;;  %v7313_v39 = vpop.f32.mrf.mxu0 }
 0x25b   : > { %v7314_v0 = vadd.f32 %v7313_v39, %v7312_v40  ;;  %v7209_v8 = vpop.f32.mrf.mxu1  ;;  %3024 = vmatmul.mubr.bf16.gmra.mxu1 %v9995_v14 }
 0x25c   : > { %v7315_v59 = vpop.f32.mrf.mxu0  ;;  %3031 = vmatprep.mubr.bf16.mxu1 %v10063_v20  ;;  %3177 = vmatmul.mubr.bf16.gmra.mxu0 %v10004_v19 }
 0x25d   : > { %v10148_v55 = vadd.f32 %v7314_v0, %v7202_v37  ;;  %v7210_v32 = vpop.f32.mrf.mxu1  ;;  %3184 = vmatprep.mubr.bf16.mxu0 %v10019_v17 }
 0x25e   : > { %v7211_v24 = vadd.f32 %v7210_v32, %v7209_v8  ;;  %v7316_v31 = vpop.f32.mrf.mxu0 }
 0x25f   : > { %v7317_v4 = vadd.f32 %v7316_v31, %v7315_v59  ;;  %v7212_v45 = vpop.f32.mrf.mxu1 }
 0x260   : > { %v7318_v49 = vpop.f32.mrf.mxu0 }
 0x261   : > { %v10151_v11 = vadd.f32 %v7317_v4, %v7205_v47  ;;  %v7213_v18 = vpop.f32.mrf.mxu1 }
 0x262   : > { %v7214_v28 = vadd.f32 %v7213_v18, %v7212_v45  ;;  %v7319_v14 = vpop.f32.mrf.mxu0 }
 0x263   : > { %v7320_v30 = vadd.f32 %v7319_v14, %v7318_v49  ;;  %v7215_v58 = vpop.f32.mrf.mxu1  ;;  %3032 = vmatmul.mubr.bf16.gmra.mxu1 %v10019_v17 }
 0x264   : > { %v7321_v19 = vpop.f32.mrf.mxu0  ;;  %3039 = vmatprep.mubr.bf16.mxu1 %v10079_v25  ;;  %3185 = vmatmul.mubr.bf16.gmra.mxu0 %v10015_v21 }
 0x265   : > { %v10156_v5 = vadd.f32 %v7320_v30, %v7208_v3  ;;  %v7216_v41 = vpop.f32.mrf.mxu1  ;;  %3192 = vmatprep.mubr.bf16.mxu0 %v10039_v12 }
 0x266   : > { %v7217_v57 = vadd.f32 %v7216_v41, %v7215_v58  ;;  %v7322_v36 = vpop.f32.mrf.mxu0 }
 0x267   : > { %v7323_v9 = vadd.f32 %v7322_v36, %v7321_v19  ;;  %v7218_v37 = vpop.f32.mrf.mxu1 }
 0x268   : > { %v7324_v33 = vpop.f32.mrf.mxu0 }
 0x269   : > { %v10159_v22 = vadd.f32 %v7323_v9, %v7211_v24  ;;  %v7219_v61 = vpop.f32.mrf.mxu1 }
 0x26a   : > { %v7220_v62 = vadd.f32 %v7219_v61, %v7218_v37  ;;  %v7325_v17 = vpop.f32.mrf.mxu0  ;;  %v12706_v37 = vmov 0.0|0.0  }
 0x26b   : > { %v7326_v44 = vadd.f32 %v7325_v17, %v7324_v33  ;;  %v7221_v47 = vpop.f32.mrf.mxu1  ;;  %3040 = vmatmul.mubr.bf16.gmra.mxu1 %v10039_v12 }
 0x26c   : > { %v7327_v21 = vpop.f32.mrf.mxu0  ;;  %3047 = vmatprep.mubr.bf16.mxu1 %v10091_v29  ;;  %3193 = vmatmul.mubr.bf16.gmra.mxu0 %v10047_v56 }
 0x26d   : > { %v10164_v2 = vadd.f32 %v7326_v44, %v7214_v28  ;;  %v7222_v53 = vpop.f32.mrf.mxu1  ;;  %3200 = vmatprep.mubr.bf16.mxu0 %v10061_v46 }
 0x26e   : > { %v7223_v27 = vadd.f32 %v7222_v53, %v7221_v47  ;;  %v7328_v40 = vpop.f32.mrf.mxu0  ;;  %v8992_v53 = vld [vmem:[#allocation9 + $0xb8] sm:$0xff]  }
 0x26f   : > { %v7329_v15 = vadd.f32 %v7328_v40, %v7327_v21  ;;  %v7224_v3 = vpop.f32.mrf.mxu1 }
 0x270   : > { %v7330_v39 = vpop.f32.mrf.mxu0 }
 0x271   : > { %v10167_v0 = vadd.f32 %v7329_v15, %v7217_v57  ;;  %v7225_v8 = vpop.f32.mrf.mxu1 }
 0x272   : > { %v7226_v59 = vadd.f32 %v7225_v8, %v7224_v3  ;;  %v7331_v12 = vpop.f32.mrf.mxu0  ;;  %v12707_v3 = vld [vmem:[#allocation25_spill] sm:$0xff] }
 0x273   : > { %v7332_v32 = vadd.f32 %v7331_v12, %v7330_v39  ;;  %v7227_v24 = vpop.f32.mrf.mxu1  ;;  %3048 = vmatmul.mubr.bf16.gmra.mxu1 %v10061_v46 }
 0x274   : > { %v7333_v56 = vpop.f32.mrf.mxu0  ;;  %3055 = vmatprep.mubr.bf16.mxu1 %v9920_v35  ;;  %3201 = vmatmul.mubr.bf16.gmra.mxu0 %v10058_v48 }
 0x275   : > { %v10172_v31 = vadd.f32 %v7332_v32, %v7220_v62  ;;  %v7228_v4 = vpop.f32.mrf.mxu1  ;;  %3208 = vmatprep.mubr.bf16.mxu0 %v9907_v16 }
 0x276   : > { %v7229_v45 = vadd.f32 %v7228_v4, %v7227_v24  ;;  %v7334_v49 = vpop.f32.mrf.mxu0  ;;  %v10192_v24 = vld [vmem:[%s9637_s24] sm:$0xff] }
 0x277   : > { %v7335_v18 = vadd.f32 %v7334_v49, %v7333_v56  ;;  %v7230_v28 = vpop.f32.mrf.mxu1  ;;  %v10195_v56 = vld [vmem:[%s9637_s24 + $0x8] sm:$0xff] }
 0x278   : > { %v7336_v14 = vpop.f32.mrf.mxu0 }
 0x279   : > { %v10175_v30 = vadd.f32 %v7335_v18, %v7223_v27  ;;  %v7231_v58 = vpop.f32.mrf.mxu1 }
 0x27a   : > { %v7232_v19 = vadd.f32 %v7231_v58, %v7230_v28  ;;  %v7337_v46 = vpop.f32.mrf.mxu0  ;;  %v8988_v28 = vld [vmem:[#allocation9 + $0x138] sm:$0xff]   ;;  %v1056_v58 = vrot.slane %v10195_v56, 7 }
 0x27b   : > { %v7338_v41 = vadd.f32 %v7337_v46, %v7336_v14  ;;  %v7233_v57 = vpop.f32.mrf.mxu1  ;;  %3056 = vmatmul.mubr.bf16.gmra.mxu1 %v9907_v16  ;;  %v1054_v14 = vrot.slane %v10192_v24, 7 }
 0x27c   : > { %v7339_v48 = vpop.f32.mrf.mxu0  ;;  %3209 = vmatmul.mubr.bf16.gmra.mxu0 %v10083_v54  ;;  %8655 = vmatprep.mubr.bf16.mxu1 %v9772_v26  ;;  %v8993_v54 = vld [vmem:[#allocation9 + $0xf0] sm:$0xff]  }
 0x27d   : > { %v10180_v36 = vadd.f32 %v7338_v41, %v7226_v59  ;;  %v7234_v9 = vpop.f32.mrf.mxu1  ;;  %3216 = vmatprep.mubr.bf16.mxu0 %v12706_v37  ;;  %v8994_v59 = vld [vmem:[#allocation9 + $0xb0] sm:$0xff]  }
 0x27e   : > { %v7235_v33 = vadd.f32 %v7234_v9, %v7233_v57  ;;  %v7340_v61 = vpop.f32.mrf.mxu0  ;;  %v8989_v57 = vld [vmem:[#allocation9 + $0x170] sm:$0xff]  }
 0x27f   : > { %v7341_v62 = vadd.f32 %v7340_v61, %v7339_v48  ;;  %v7236_v17 = vpop.f32.mrf.mxu1  ;;  %v8997_v48 = vld [vmem:[#allocation9 + $0xa8] sm:$0xff]   ;;  %v8999_v61 = vld [vmem:[#allocation9 + $0xe0] sm:$0xff]  }
 0x280   : > { %v7342_v44 = vpop.f32.mrf.mxu0 }
 0x281   : > { %v10183_v47 = vadd.f32 %v7341_v62, %v7229_v45  ;;  %v7237_v21 = vpop.f32.mrf.mxu1 }
 0x282   : > { %v7238_v16 = vadd.f32 %v7237_v21, %v7236_v17  ;;  %v7343_v27 = vpop.f32.mrf.mxu0  ;;  %v1055_v21 = vsel %vm1047_vm0, %v9679_v7, %v1054_v14 }
 0x283   : > { %v7344_v26 = vadd.f32 %v7343_v27, %v7342_v44  ;;  %v7239_v40 = vpop.f32.mrf.mxu1  ;;  %8656 = vmatmul.mubr.bf16.vlgmr.msra.gmra.mxu1 %v9803_v50  ;;  %v8995_v50 = vld [vmem:[#allocation9 + $0xe8] sm:$0xff]   ;;  %v10215_v27 = vld [vmem:[%s9637_s24 + $0x10] sm:$0xff] }
 0x284   : > { %v7345_v15 = vpop.f32.mrf.mxu0  ;;  %3217 = vmatmul.mubr.bf16.gmra.mxu0 %v12707_v3  ;;  %8659 = vmatprep.mubr.bf16.mxu1 %v9832_v13 }
 0x285   : > { %v10188_v39 = vadd.f32 %v7344_v26, %v7232_v19  ;;  %v7240_v8 = vpop.f32.mrf.mxu1  ;;  %3850 = vmatprep.mubr.bf16.mxu0 %v12706_v37  ;;  %7760 = vmatpush3.bf16.msra.mxu1 %v8992_v53  ;;  %v10203_v19 = vpack.c.bf16 %v10195_v56, %v10192_v24  ;;  %v1057_v53 = vsel %vm1047_vm0, %v1054_v14, %v1056_v58  ;;  %v8998_v14 = vld [vmem:[#allocation9 + $0x128] sm:$0xff]  }
 0x286   : > { %v7241_v12 = vadd.f32 %v7240_v8, %v7239_v40  ;;  %v7346_v32 = vpop.f32.mrf.mxu0  ;;  %7761 = vmatprep.subr.bf16.mxu1 %v8993_v54  ;;  %v10218_v40 = vld [vmem:[%s9637_s24 + $0x18] sm:$0xff] }
 0x287   : > { %v7347_v4 = vadd.f32 %v7346_v32, %v7345_v15  ;;  %v7242_v45 = vpop.f32.mrf.mxu1  ;;  %12708 = vst [vmem:[#allocation28_spill] sm:$0xff] %v10203_v19 }
 0x288   : > { %v7348_v49 = vpop.f32.mrf.mxu0 }
 0x289   : > { %v10197_v18 = vadd.f32 %v7347_v4, %v7235_v33  ;;  %v7243_v13 = vpop.f32.mrf.mxu1  ;;  %7762 = vmatpush3.bf16.msra.mxu1 %v8994_v59  ;;  %v9001_v59 = vld [vmem:[#allocation9 + $0xd8] sm:$0xff]  }
 0x28a   : > { %v7244_v46 = vadd.f32 %v7243_v13, %v7242_v45  ;;  %v7349_v41 = vpop.f32.mrf.mxu0  ;;  %7763 = vmatprep.subr.bf16.mxu1 %v8995_v50  ;;  %v10220_v50 = vpack.c.bf16 %v1057_v53, %v1055_v21  ;;  %v1061_v13 = vrot.slane %v10218_v40, 7 }
 0x28b   : > { %v7350_v9 = vadd.f32 %v7349_v41, %v7348_v49  ;;  %v7245_v33 = vpop.f32.mrf.mxu1  ;;  %8660 = vmatmul.mubr.bf16.gmra.mxu1 %v9863_v34  ;;  %v8990_v34 = vld [vmem:[#allocation9 + $0x130] sm:$0xff]   ;;  %v1059_v49 = vrot.slane %v10215_v27, 7 }
 0x28c   : > { %v7351_v62 = vpop.f32.mrf.mxu0  ;;  %8663 = vmatprep.mubr.bf16.mxu1 %v9892_v52  ;;  %3851 = vmatmul.mubr.bf16.vlgmr.msra.gmra.mxu0 %v12707_v3  ;;  %v8996_v52 = vld [vmem:[#allocation9 + $0x168] sm:$0xff]  }
 0x28d   : > { %v10208_v17 = vadd.f32 %v7350_v9, %v7238_v16  ;;  %7872 = vmatpush3.bf16.msra.mxu0 %v8988_v28  ;;  %v7246_v44 = vpop.f32.mrf.mxu1  ;;  %3858 = vmatprep.mubr.bf16.mxu0 %v10203_v19  ;;  %v9000_v16 = vld [vmem:[#allocation9 + $0xa0] sm:$0xff]   ;;  %v10228_v28 = vpack.c.bf16 %v10218_v40, %v10215_v27  ;;  %v1060_v21 = vsel %vm1047_vm0, %v9679_v7, %v1059_v49 }
 0x28e   : > { %v7247_v54 = vadd.f32 %v7246_v44, %v7245_v33  ;;  %v7352_v26 = vpop.f32.mrf.mxu0  ;;  %7873 = vmatprep.subr.bf16.mxu0 %v8989_v57  ;;  %7764 = vmatpush3.bf16.msra.mxu1 %v8997_v48  ;;  %v9002_v57 = vld [vmem:[#allocation9 + $0x98] sm:$0xff]   ;;  %v9006_v48 = vld [vmem:[#allocation9 + $0x160] sm:$0xff]   ;;  %v9003_v33 = vld [vmem:[#allocation9 + $0xd0] sm:$0xff]   ;;  %v1062_v53 = vsel %vm1047_vm0, %v1059_v49, %v1061_v13 }
 0x28f   : > { %v7353_v15 = vadd.f32 %v7352_v26, %v7351_v62  ;;  %v7248_v8 = vpop.f32.mrf.mxu1  ;;  %7765 = vmatprep.subr.bf16.mxu1 %v8999_v61  ;;  %12709 = vst [vmem:[#allocation29_spill] sm:$0xff] %v10228_v28 }
 0x290   : > { %v7354_v32 = vpop.f32.mrf.mxu0 }
 0x291   : > { %v10222_v4 = vadd.f32 %v7353_v15, %v7241_v12  ;;  %v7249_v45 = vpop.f32.mrf.mxu1  ;;  %7874 = vmatpush3.bf16.msra.mxu0 %v8990_v34  ;;  %v10240_v34 = vld [vmem:[%s9637_s24 + $0x20] sm:$0xff] }
 0x292   : > { %v7250_v58 = vadd.f32 %v7249_v45, %v7248_v8  ;;  %v7355_v41 = vpop.f32.mrf.mxu0  ;;  %7875 = vmatprep.subr.bf16.mxu0 %v8996_v52  ;;  %7766 = vmatpush3.bf16.msra.mxu1 %v9000_v16  ;;  %v10243_v16 = vld [vmem:[%s9637_s24 + $0x28] sm:$0xff]  ;;  %v10245_v45 = vpack.c.bf16 %v1062_v53, %v1060_v21  ;;  %v9009_v21 = vld [vmem:[#allocation9 + $0xc0] sm:$0xff]  }
 0x293   : > { %v7356_v12 = vadd.f32 %v7355_v41, %v7354_v32  ;;  %v7251_v9 = vpop.f32.mrf.mxu1  ;;  %8664 = vmatmul.mubr.bf16.gmra.mxu1 %v9928_v43  ;;  %7767 = vmatprep.subr.bf16.mxu1 %v9001_v59  ;;  %v9008_v43 = vld [vmem:[#allocation9 + $0x120] sm:$0xff]   ;;  %v9005_v59 = vld [vmem:[#allocation9 + $0xc8] sm:$0xff]   ;;  %v1066_v41 = vrot.slane %v10243_v16, 7 }
 0x294   : > { %v7357_v61 = vpop.f32.mrf.mxu0  ;;  %8667 = vmatprep.mubr.bf16.mxu1 %v9954_v23  ;;  %3859 = vmatmul.mubr.bf16.gmra.mxu0 %v10220_v50  ;;  %v9004_v23 = vld [vmem:[#allocation9 + $0x90] sm:$0xff]   ;;  %12710 = vst [vmem:[#allocation30_spill] sm:$0xff] %v10245_v45 }
 0x295   : > { %v10233_v62 = vadd.f32 %v7356_v12, %v7244_v46  ;;  %v7252_v44 = vpop.f32.mrf.mxu1  ;;  %3866 = vmatprep.mubr.bf16.mxu0 %v10228_v28  ;;  %7876 = vmatpush3.bf16.msra.mxu0 %v8998_v14  ;;  %v9011_v46 = vld [vmem:[#allocation9 + $0x158] sm:$0xff]   ;;  %v1064_v14 = vrot.slane %v10240_v34, 7 }
 0x296   : > { %v7253_v26 = vadd.f32 %v7252_v44, %v7251_v9  ;;  %v7358_v52 = vpop.f32.mrf.mxu0  ;;  %7768 = vmatpush3.bf16.msra.mxu1 %v9002_v57  ;;  %7877 = vmatprep.subr.bf16.mxu0 %v9006_v48  ;;  %v10253_v57 = vpack.c.bf16 %v10243_v16, %v10240_v34  ;;  %v9012_v48 = vld [vmem:[#allocation9 + $0x118] sm:$0xff]  }
 0x297   : > { %v7359_v15 = vadd.f32 %v7358_v52, %v7357_v61  ;;  %v7254_v8 = vpop.f32.mrf.mxu1  ;;  %7769 = vmatprep.subr.bf16.mxu1 %v9003_v33  ;;  %v9007_v33 = vld [vmem:[#allocation9 + $0x88] sm:$0xff]   ;;  %v9013_v61 = vld [vmem:[#allocation9 + $0x150] sm:$0xff]  }
 0x298   : > { %v7360_v32 = vpop.f32.mrf.mxu0  ;;  %12712 = vst [vmem:[#allocation32_spill] sm:$0xff] %v10253_v57 }
 0x299   : > { %v10247_v49 = vadd.f32 %v7359_v15, %v7247_v54  ;;  %v7255_v13 = vpop.f32.mrf.mxu1  ;;  %7878 = vmatpush3.bf16.msra.mxu0 %v9008_v43  ;;  %v10265_v15 = vld [vmem:[%s9637_s24 + $0x30] sm:$0xff] }
 0x29a   : > { %v7256_v12 = vadd.f32 %v7255_v13, %v7254_v8  ;;  %v7361_v9 = vpop.f32.mrf.mxu0  ;;  %7770 = vmatpush3.bf16.msra.mxu1 %v9004_v23  ;;  %7879 = vmatprep.subr.bf16.mxu0 %v9011_v46  ;;  %v1065_v23 = vsel %vm1047_vm0, %v9679_v7, %v1064_v14  ;;  %v1067_v46 = vsel %vm1047_vm0, %v1064_v14, %v1066_v41 }
 0x29b   : > { %12711 = vst [vmem:[#allocation31_spill] sm:$0xff] %v10247_v49  ;;  %v7362_v54 = vadd.f32 %v7361_v9, %v7360_v32  ;;  %v7257_v44 = vpop.f32.mrf.mxu1  ;;  %8668 = vmatmul.mubr.bf16.gmra.mxu1 %v9977_v60  ;;  %7771 = vmatprep.subr.bf16.mxu1 %v9005_v59  ;;  %v9014_v60 = vld [vmem:[#allocation9 + $0x110] sm:$0xff]   ;;  %v10268_v32 = vld [vmem:[%s9637_s24 + $0x38] sm:$0xff]  ;;  %v10270_v37 = vpack.c.bf16 %v1067_v46, %v1065_v23 }
 0x29c   : > { %v7363_v53 = vpop.f32.mrf.mxu0  ;;  %8671 = vmatprep.mubr.bf16.mxu1 %v9998_v10  ;;  %3867 = vmatmul.mubr.bf16.gmra.mxu0 %v10245_v45  ;;  %v9010_v10 = vld [vmem:[#allocation9 + $0x80] sm:$0xff]  }
 0x29d   : > { %v10258_v43 = vadd.f32 %v7362_v54, %v7250_v58  ;;  %v7258_v52 = vpop.f32.mrf.mxu1  ;;  %3874 = vmatprep.mubr.bf16.mxu0 %v10253_v57  ;;  %7880 = vmatpush3.bf16.msra.mxu0 %v9012_v48  ;;  %v9015_v58 = vld [vmem:[#allocation9 + $0x148] sm:$0xff]   ;;  %v9019_v54 = vld [vmem:[#allocation9 + $0x1f8] sm:$0xff]   ;;  %12714 = vst [vmem:[#allocation34_spill] sm:$0xff] %v10270_v37  ;;  %v1069_v48 = vrot.slane %v10265_v15, 7 }
 0x29e   : > { %v7259_v8 = vadd.f32 %v7258_v52, %v7257_v44  ;;  %v7364_v59 = vpop.f32.mrf.mxu0  ;;  %7772 = vmatpush3.bf16.msra.mxu1 %v9007_v33  ;;  %7881 = vmatprep.subr.bf16.mxu0 %v9013_v61  ;;  %v1071_v44 = vrot.slane %v10268_v32, 7  ;;  %v10278_v33 = vpack.c.bf16 %v10268_v32, %v10265_v15  ;;  %v9016_v61 = vld [vmem:[#allocation9 + $0x108] sm:$0xff]  }
 0x29f   : > { %12713 = vst [vmem:[#allocation33_spill] sm:$0xff] %v10258_v43  ;;  %v7365_v13 = vadd.f32 %v7364_v59, %v7363_v53  ;;  %v7260_v9 = vpop.f32.mrf.mxu1  ;;  %7773 = vmatprep.subr.bf16.mxu1 %v9009_v21  ;;  %v9017_v21 = vld [vmem:[#allocation9 + $0x140] sm:$0xff]  }
 0x2a0   : > { %v7366_v3 = vpop.f32.mrf.mxu0  ;;  %12716 = vst [vmem:[#allocation36_spill] sm:$0xff] %v10278_v33 }
 0x2a1   : > { %v10272_v14 = vadd.f32 %v7365_v13, %v7253_v26  ;;  %v7261_v41 = vpop.f32.mrf.mxu1  ;;  %7882 = vmatpush3.bf16.msra.mxu0 %v9014_v60 }
 0x2a2   : > { %v7262_v53 = vadd.f32 %v7261_v41, %v7260_v9  ;;  %v7367_v52 = vpop.f32.mrf.mxu0  ;;  %7774 = vmatpush3.bf16.msra.mxu1 %v9010_v10  ;;  %7883 = vmatprep.subr.bf16.mxu0 %v9015_v58  ;;  %v1070_v10 = vsel %vm1047_vm0, %v9679_v7, %v1069_v48  ;;  %v9018_v58 = vld [vmem:[#allocation9 + $0x100] sm:$0xff]  }
 0x2a3   : > { %12715 = vst [vmem:[#allocation35_spill] sm:$0xff] %v10272_v14  ;;  %v7368_v23 = vadd.f32 %v7367_v52, %v7366_v3  ;;  %v7263_v26 = vpop.f32.mrf.mxu1  ;;  %8672 = vmatmul.mubr.bf16.gmra.mxu1 %v10021_v1  ;;  %7983 = vmatprep.subr.bf16.mxu1 %v9019_v54  ;;  %v1072_v3 = vsel %vm1047_vm0, %v1069_v48, %v1071_v44  ;;  %v10290_v9 = vld [vmem:[%s9637_s24 + $0x40] sm:$0xff]  ;;  %v10293_v54 = vld [vmem:[%s9637_s24 + $0x48] sm:$0xff] }
 0x2a4   : > { %v7369_v46 = vpop.f32.mrf.mxu0  ;;  %8675 = vmatprep.mubr.bf16.mxu1 %v10042_v6  ;;  %3875 = vmatmul.mubr.bf16.gmra.mxu0 %v10270_v37  ;;  %v10295_v6 = vld [vmem:[#allocation9 + $0x238] sm:$0xff]   ;;  %v1074_v48 = vrot.slane %v10290_v9, 7  ;;  %v1076_v44 = vrot.slane %v10293_v54, 7 }
 0x2a5   : > { %v10283_v59 = vadd.f32 %v7368_v23, %v7256_v12  ;;  %v7264_v60 = vpop.f32.mrf.mxu1  ;;  %3882 = vmatprep.mubr.bf16.mxu0 %v10278_v33  ;;  %7884 = vmatpush3.bf16.msra.mxu0 %v9016_v61  ;;  %12718 = vst [vmem:[#allocation38_spill] sm:$0xff] %v10295_v6  ;;  %v10297_v23 = vpack.c.bf16 %v1072_v3, %v1070_v10 }
 0x2a6   : > { %v7265_v13 = vadd.f32 %v7264_v60, %v7263_v26  ;;  %v7370_v1 = vpop.f32.mrf.mxu0  ;;  %7885 = vmatprep.subr.bf16.mxu0 %v9017_v21  ;;  %v10305_v61 = vpack.c.bf16 %v10293_v54, %v10290_v9 }
 0x2a7   : > { %12717 = vst [vmem:[#allocation37_spill] sm:$0xff] %v10283_v59  ;;  %v7371_v12 = vadd.f32 %v7370_v1, %v7369_v46  ;;  %v7266_v41 = vpop.f32.mrf.mxu1  ;;  %12719 = vst [vmem:[#allocation39_spill] sm:$0xff] %v10297_v23 }
 0x2a8   : > { %v7372_v52 = vpop.f32.mrf.mxu0  ;;  %12721 = vst [vmem:[#allocation41_spill] sm:$0xff] %v10305_v61 }
 0x2a9   : > { %v10299_v33 = vadd.f32 %v7371_v12, %v7259_v8  ;;  %v7267_v57 = vpop.f32.mrf.mxu1  ;;  %7886 = vmatpush3.bf16.msra.mxu0 %v9018_v58  ;;  %v1077_v58 = vsel %vm1047_vm0, %v1074_v48, %v1076_v44 }
 0x2aa   : > { %v7268_v21 = vadd.f32 %v7267_v57, %v7266_v41  ;;  %v7373_v26 = vpop.f32.mrf.mxu0  ;;  %8687 = vmatprep.subr.bf16.mxu0 %v10295_v6  ;;  %v1075_v57 = vsel %vm1047_vm0, %v9679_v7, %v1074_v48  ;;  %v10318_v41 = vld [vmem:[%s9637_s24 + $0x50] sm:$0xff]  ;;  %v1220_v6 = vrot.slane %v10218_v40, 1 }
 0x2ab   : > { %12720 = vst [vmem:[#allocation40_spill] sm:$0xff] %v10299_v33  ;;  %v7374_v46 = vadd.f32 %v7373_v26, %v7372_v52  ;;  %v7269_v60 = vpop.f32.mrf.mxu1  ;;  %8676 = vmatmul.mubr.bf16.gmra.mxu1 %v10063_v20  ;;  %v10321_v20 = vld [vmem:[%s9637_s24 + $0x58] sm:$0xff]  ;;  %v10323_v33 = vpack.c.bf16 %v1077_v58, %v1075_v57 }
 0x2ac   : > { %v7375_v8 = vpop.f32.mrf.mxu0  ;;  %8679 = vmatprep.mubr.bf16.mxu1 %v10079_v25  ;;  %3883 = vmatmul.mubr.bf16.gmra.mxu0 %v10297_v23  ;;  %v10331_v48 = vpack.c.bf16 %v10321_v20, %v10318_v41 }
 0x2ad   : > { %v10311_v10 = vadd.f32 %v7374_v46, %v7262_v53  ;;  %v7270_v3 = vpop.f32.mrf.mxu1  ;;  %3890 = vmatprep.mubr.bf16.mxu0 %v10305_v61  ;;  %12723 = vst [vmem:[#allocation43_spill] sm:$0xff] %v10323_v33  ;;  %v1079_v61 = vrot.slane %v10318_v41, 7 }
 0x2ae   : > { %v7271_v1 = vadd.f32 %v7270_v3, %v7269_v60  ;;  %v7376_v12 = vpop.f32.mrf.mxu0  ;;  %12725 = vst [vmem:[#allocation45_spill] sm:$0xff] %v10331_v48 }
 0x2af   : > { %12722 = vst [vmem:[#allocation42_spill] sm:$0xff] %v10311_v10  ;;  %v7377_v52 = vadd.f32 %v7376_v12, %v7375_v8  ;;  %v7272_v25 = vpop.f32.mrf.mxu1  ;;  %v1081_v10 = vrot.slane %v10321_v20, 7  ;;  %v1080_v12 = vsel %vm1047_vm0, %v9679_v7, %v1079_v61 }
 0x2b0   : > { %v7378_v26 = vpop.f32.mrf.mxu0 }
 0x2b1   : > { %v10325_v53 = vadd.f32 %v7377_v52, %v7265_v13  ;;  %v7273_v46 = vpop.f32.mrf.mxu1  ;;  %v1082_v52 = vsel %vm1047_vm0, %v1079_v61, %v1081_v10 }
 0x2b2   : > { %v7274_v44 = vadd.f32 %v7273_v46, %v7272_v25  ;;  %v7379_v60 = vpop.f32.mrf.mxu0  ;;  %v10343_v46 = vld [vmem:[%s9637_s24 + $0x60] sm:$0xff]  ;;  %v10348_v59 = vpack.c.bf16 %v1082_v52, %v1080_v12 }
 0x2b3   : > { %12724 = vst [vmem:[#allocation44_spill] sm:$0xff] %v10325_v53  ;;  %v7380_v8 = vadd.f32 %v7379_v60, %v7378_v26  ;;  %v7275_v3 = vpop.f32.mrf.mxu1  ;;  %8680 = vmatmul.mubr.bf16.gmra.mxu1 %v10091_v29  ;;  %v10346_v29 = vld [vmem:[%s9637_s24 + $0x68] sm:$0xff] }
 0x2b4   : > { %v7381_v57 = vpop.f32.mrf.mxu0  ;;  %8683 = vmatprep.mubr.bf16.mxu1 %v9920_v35  ;;  %3891 = vmatmul.mubr.bf16.gmra.mxu0 %v10323_v33  ;;  %12727 = vst [vmem:[#allocation47_spill] sm:$0xff] %v10348_v59  ;;  %v10356_v61 = vpack.c.bf16 %v10346_v29, %v10343_v46 }
 0x2b5   : > { %v10336_v13 = vadd.f32 %v7380_v8, %v7268_v21  ;;  %v7276_v58 = vpop.f32.mrf.mxu1  ;;  %3898 = vmatprep.mubr.bf16.mxu0 %v10331_v48  ;;  %v1084_v48 = vrot.slane %v10343_v46, 7 }
 0x2b6   : > { %v7277_v25 = vadd.f32 %v7276_v58, %v7275_v3  ;;  %v7382_v26 = vpop.f32.mrf.mxu0  ;;  %12729 = vst [vmem:[#allocation49_spill] sm:$0xff] %v10356_v61 }
 0x2b7   : > { %12726 = vst [vmem:[#allocation46_spill] sm:$0xff] %v10336_v13  ;;  %v7383_v60 = vadd.f32 %v7382_v26, %v7381_v57  ;;  %v7278_v35 = vpop.f32.mrf.mxu1  ;;  %v1086_v13 = vrot.slane %v10346_v29, 7  ;;  %v12730_v26 = vld [vmem:[#allocation27_spill] sm:$0xff] }
 0x2b8   : > { %v7384_v53 = vpop.f32.mrf.mxu0 }
 0x2b9   : > { %v10350_v21 = vadd.f32 %v7383_v60, %v7271_v1  ;;  %v7279_v8 = vpop.f32.mrf.mxu1  ;;  %v1085_v60 = vsel %vm1047_vm0, %v9679_v7, %v1084_v48 }
 0x2ba   : > { %v7280_v10 = vadd.f32 %v7279_v8, %v7278_v35  ;;  %v7385_v3 = vpop.f32.mrf.mxu0  ;;  %v1087_v35 = vsel %vm1047_vm0, %v1084_v48, %v1086_v13 }
 0x2bb   : > { %12728 = vst [vmem:[#allocation48_spill] sm:$0xff] %v10350_v21  ;;  %v7386_v57 = vadd.f32 %v7385_v3, %v7384_v53  ;;  %v7281_v58 = vpop.f32.mrf.mxu1  ;;  %8684 = vmatmul.mubr.bf16.gmra.mxu1 %v12730_v26  ;;  %v10368_v3 = vld [vmem:[%s9637_s24 + $0x70] sm:$0xff]  ;;  %v10371_v21 = vld [vmem:[%s9637_s24 + $0x78] sm:$0xff] }
 0x2bc   : > { %v7387_v12 = vpop.f32.mrf.mxu0  ;;  %3899 = vmatmul.mubr.bf16.gmra.mxu0 %v10348_v59  ;;  %4011 = vmatprep.mubr.bf16.mxu1 %v10220_v50  ;;  %v1214_v50 = vrot.slane %v10192_v24, 1  ;;  %v1089_v48 = vrot.slane %v10368_v3, 7  ;;  %v1091_v13 = vrot.slane %v10371_v21, 7  ;;  %v9022_v24 = vld [vmem:[#allocation9 + $0x1f0] sm:$0xff]  }
 0x2bd   : > { %v10361_v1 = vadd.f32 %v7386_v57, %v7274_v44  ;;  %v7282_v52 = vpop.f32.mrf.mxu1  ;;  %3906 = vmatprep.mubr.bf16.mxu0 %v10356_v61  ;;  %v1215_v44 = vrot.slane %v10195_v56, 1 }
 0x2be   : > { %v7283_v8 = vadd.f32 %v7282_v52, %v7281_v58  ;;  %v7388_v53 = vpop.f32.mrf.mxu0  ;;  %v10383_v58 = vpack.c.bf16 %v10371_v21, %v10368_v3 }
 0x2bf   : > { %12731 = vst [vmem:[#allocation50_spill] sm:$0xff] %v10361_v1  ;;  %v7389_v14 = vadd.f32 %v7388_v53, %v7387_v12  ;;  %v7284_v28 = vpop.f32.mrf.mxu1  ;;  %v10375_v1 = vpack.c.bf16 %v1087_v35, %v1085_v60  ;;  %v9020_v12 = vld [vmem:[#allocation9 + $0x1b8] sm:$0xff]   ;;  %v1218_v60 = vsel %vm1208_vm1, %v1215_v44, %v9695_v38 }
 0x2c0   : > { %v7390_v57 = vpop.f32.mrf.mxu0  ;;  %12734 = vst [vmem:[#allocation53_spill] sm:$0xff] %v10383_v58 }
 0x2c1   : > { %12732 = vst [vmem:[#allocation51_spill] sm:$0xff] %v10375_v1  ;;  %v10377_v61 = vadd.f32 %v7389_v14, %v7277_v25  ;;  %v7285_v43 = vpop.f32.mrf.mxu1  ;;  %v1216_v25 = vsel %vm1208_vm1, %v1214_v50, %v1215_v44  ;;  %v10401_v50 = vld [vmem:[%s9637_s24 + $0x88] sm:$0xff] }
 0x2c2   : > { %v7286_v52 = vadd.f32 %v7285_v43, %v7284_v28  ;;  %v7391_v53 = vpop.f32.mrf.mxu0  ;;  %v1090_v43 = vsel %vm1047_vm0, %v9679_v7, %v1089_v48  ;;  %v9025_v44 = vld [vmem:[#allocation9 + $0x1e8] sm:$0xff]  }
 0x2c3   : > { %12733 = vst [vmem:[#allocation52_spill] sm:$0xff] %v10377_v61  ;;  %v7392_v49 = vadd.f32 %v7391_v53, %v7390_v57  ;;  %v7415_v56 = vpop.f32.mrf.mxu1  ;;  %4012 = vmatmul.mubr.bf16.vlgmr.msra.gmra.mxu1 %v12730_v26  ;;  %v1092_v57 = vsel %vm1047_vm0, %v1089_v48, %v1091_v13  ;;  %v9023_v53 = vld [vmem:[#allocation9 + $0x1b0] sm:$0xff]  }
 0x2c4   : > { %v7393_v14 = vpop.f32.mrf.mxu0  ;;  %3907 = vmatmul.mubr.bf16.gmra.mxu0 %v10375_v1  ;;  %4019 = vmatprep.mubr.bf16.mxu1 %v10245_v45  ;;  %v10398_v45 = vld [vmem:[%s9637_s24 + $0x80] sm:$0xff] }
 0x2c5   : > { %v10391_v35 = vadd.f32 %v7392_v49, %v7280_v10  ;;  %v7416_v28 = vpop.f32.mrf.mxu1  ;;  %3914 = vmatprep.mubr.bf16.mxu0 %v10383_v58  ;;  %7984 = vmatpush3.bf16.msra.mxu1 %v9020_v12  ;;  %v1219_v58 = vrot.slane %v10215_v27, 1  ;;  %v10408_v12 = vpack.c.bf16 %v1092_v57, %v1090_v43  ;;  %v1094_v19 = vrot.slane %v10398_v45, 7  ;;  %v9026_v27 = vld [vmem:[#allocation9 + $0x1a8] sm:$0xff]  }
 0x2c6   : > { %v7417_v26 = vadd.f32 %v7416_v28, %v7415_v56  ;;  %v7394_v61 = vpop.f32.mrf.mxu0  ;;  %7985 = vmatprep.subr.bf16.mxu1 %v9022_v24  ;;  %v1096_v24 = vrot.slane %v10401_v50, 7  ;;  %v1223_v57 = vsel %vm1208_vm1, %v1220_v6, %v9695_v38 }
 0x2c7   : > { %12735 = vst [vmem:[#allocation54_spill] sm:$0xff] %v10391_v35  ;;  %v7395_v49 = vadd.f32 %v7394_v61, %v7393_v14  ;;  %v7418_v10 = vpop.f32.mrf.mxu1  ;;  %v10403_v35 = vpack.c.bf16 %v1218_v60, %v1216_v25  ;;  %12736 = vst [vmem:[#allocation55_spill] sm:$0xff] %v10408_v12  ;;  %v10416_v61 = vpack.c.bf16 %v10401_v50, %v10398_v45 }
 0x2c8   : > { %v2938_v48 = vadd.f32 %v7417_v26, %v10135_v63  ;;  %v7396_v13 = vpop.f32.mrf.mxu0  ;;  %v9028_v63 = vld [vmem:[#allocation9 + $0x1e0] sm:$0xff]   ;;  %v1221_v43 = vsel %vm1208_vm1, %v1219_v58, %v1220_v6  ;;  %v10435_v58 = vld [vmem:[%s9637_s24 + $0x98] sm:$0xff] }
 0x2c9   : > { %v10410_v56 = vadd.f32 %v7395_v49, %v7283_v8  ;;  %v7419_v28 = vpop.f32.mrf.mxu1  ;;  %12737 = vst [vmem:[#allocation56_spill] sm:$0xff] %v10416_v61  ;;  %7986 = vmatpush3.bf16.msra.mxu1 %v9023_v53  ;;  %v1095_v49 = vsel %vm1047_vm0, %v9679_v7, %v1094_v19  ;;  %v9030_v6 = vld [vmem:[#allocation9 + $0x1d8] sm:$0xff]  }
 0x2ca   : > { %v7420_v14 = vadd.f32 %v7419_v28, %v7418_v10  ;;  %v7397_v40 = vpop.f32.mrf.mxu0  ;;  %7987 = vmatprep.subr.bf16.mxu1 %v9025_v44  ;;  %v9029_v10 = vld [vmem:[#allocation9 + $0x1a0] sm:$0xff]  }
 0x2cb   : > { %v7398_v26 = vadd.f32 %v7397_v40, %v7396_v13  ;;  %v7421_v25 = vpop.f32.mrf.mxu1  ;;  %4020 = vmatmul.mubr.bf16.gmra.mxu1 %v10403_v35 }
 0x2cc   : > { %v2941_v8 = vadd.f32 %v7420_v14, %v10140_v42  ;;  %v7527_v60 = vpop.f32.mrf.mxu0  ;;  %3915 = vmatmul.mubr.bf16.gmra.mxu0 %v10408_v12  ;;  %4027 = vmatprep.mubr.bf16.mxu1 %v10270_v37  ;;  %v1097_v42 = vsel %vm1047_vm0, %v1094_v19, %v1096_v24  ;;  %v10432_v14 = vld [vmem:[%s9637_s24 + $0x90] sm:$0xff]  ;;  %v1225_v37 = vrot.slane %v10243_v16, 1 }
 0x2cd   : > { %v10425_v53 = vadd.f32 %v7398_v26, %v7286_v52  ;;  %v7422_v44 = vpop.f32.mrf.mxu1  ;;  %3922 = vmatprep.mubr.bf16.mxu0 %v10416_v61  ;;  %7988 = vmatpush3.bf16.msra.mxu1 %v9026_v27  ;;  %v10437_v26 = vpack.c.bf16 %v1223_v57, %v1221_v43  ;;  %v1224_v61 = vrot.slane %v10240_v34, 1  ;;  %v10442_v27 = vpack.c.bf16 %v1097_v42, %v1095_v49 }
 0x2ce   : > { %v7423_v13 = vadd.f32 %v7422_v44, %v7421_v25  ;;  %v7528_v28 = vpop.f32.mrf.mxu0  ;;  %7989 = vmatprep.subr.bf16.mxu1 %v9028_v63  ;;  %v1099_v44 = vrot.slane %v10432_v14, 7  ;;  %v10448_v63 = vpack.c.bf16 %v10435_v58, %v10432_v14 }
 0x2cf   : > { %12738 = vst [vmem:[#allocation57_spill] sm:$0xff] %v10425_v53  ;;  %v7529_v52 = vadd.f32 %v7528_v28, %v7527_v60  ;;  %v7424_v40 = vpop.f32.mrf.mxu1  ;;  %12739 = vst [vmem:[#allocation58_spill] sm:$0xff] %v10442_v27  ;;  %v1101_v53 = vrot.slane %v10435_v58, 7  ;;  %v9031_v60 = vld [vmem:[#allocation9 + $0x198] sm:$0xff]  }
 0x2d0   : > { %v2946_v19 = vadd.f32 %v7423_v13, %v10143_v51  ;;  %v7530_v24 = vpop.f32.mrf.mxu0  ;;  %12740 = vst [vmem:[#allocation59_spill] sm:$0xff] %v10448_v63  ;;  %v9032_v51 = vld [vmem:[#allocation9 + $0x1d0] sm:$0xff]  }
 0x2d1   : > { %v7425_v25 = vpop.f32.mrf.mxu1  ;;  %7990 = vmatpush3.bf16.msra.mxu1 %v9029_v10  ;;  %v10450_v43 = vadd.f32 %v7529_v52, %v2938_v48  ;;  %v1226_v48 = vsel %vm1208_vm1, %v1224_v61, %v1225_v37  ;;  %v1228_v10 = vsel %vm1208_vm1, %v1225_v37, %v9695_v38  ;;  %v1102_v52 = vsel %vm1047_vm0, %v1099_v44, %v1101_v53  ;;  %v10469_v61 = vld [vmem:[%s9637_s24 + $0xa8] sm:$0xff] }
 0x2d2   : > { %v7426_v34 = vadd.f32 %v7425_v25, %v7424_v40  ;;  %v7531_v16 = vpop.f32.mrf.mxu0  ;;  %7991 = vmatprep.subr.bf16.mxu1 %v9030_v6  ;;  %v1100_v6 = vsel %vm1047_vm0, %v9679_v7, %v1099_v44  ;;  %v9034_v37 = vld [vmem:[#allocation9 + $0x1c8] sm:$0xff]   ;;  %v1230_v53 = vrot.slane %v10268_v32, 1 }
 0x2d3   : > { %12741 = vst [vmem:[#allocation60_spill] sm:$0xff] %v10450_v43  ;;  %v7532_v57 = vadd.f32 %v7531_v16, %v7530_v24  ;;  %v7427_v49 = vpop.f32.mrf.mxu1  ;;  %4028 = vmatmul.mubr.bf16.gmra.mxu1 %v10437_v26  ;;  %v1229_v43 = vrot.slane %v10265_v15, 1 }
 0x2d4   : > { %v2949_v42 = vadd.f32 %v7426_v34, %v10148_v55  ;;  %v7533_v13 = vpop.f32.mrf.mxu0  ;;  %3923 = vmatmul.mubr.bf16.gmra.mxu0 %v10442_v27  ;;  %4035 = vmatprep.mubr.bf16.mxu1 %v10297_v23  ;;  %v9033_v55 = vld [vmem:[#allocation9 + $0x190] sm:$0xff]   ;;  %v10466_v34 = vld [vmem:[%s9637_s24 + $0xa0] sm:$0xff] }
 0x2d5   : > { %v7428_v28 = vpop.f32.mrf.mxu1  ;;  %3930 = vmatprep.mubr.bf16.mxu0 %v10448_v63  ;;  %7992 = vmatpush3.bf16.msra.mxu1 %v9031_v60  ;;  %v10463_v40 = vadd.f32 %v7532_v57, %v2941_v8  ;;  %v10471_v63 = vpack.c.bf16 %v1228_v10, %v1226_v48  ;;  %v10476_v60 = vpack.c.bf16 %v1102_v52, %v1100_v6 }
 0x2d6   : > { %v7429_v24 = vadd.f32 %v7428_v28, %v7427_v49  ;;  %v7534_v25 = vpop.f32.mrf.mxu0  ;;  %7993 = vmatprep.subr.bf16.mxu1 %v9032_v51  ;;  %v1104_v49 = vrot.slane %v10466_v34, 7  ;;  %v1106_v28 = vrot.slane %v10469_v61, 7  ;;  %v10482_v51 = vpack.c.bf16 %v10469_v61, %v10466_v34 }
 0x2d7   : > { %12742 = vst [vmem:[#allocation61_spill] sm:$0xff] %v10463_v40  ;;  %v7535_v16 = vadd.f32 %v7534_v25, %v7533_v13  ;;  %v7430_v23 = vpop.f32.mrf.mxu1  ;;  %12743 = vst [vmem:[#allocation62_spill] sm:$0xff] %v10471_v63  ;;  %v9036_v13 = vld [vmem:[#allocation9 + $0x188] sm:$0xff]   ;;  %v1235_v40 = vrot.slane %v10293_v54, 1 }
 0x2d8   : > { %v2954_v44 = vadd.f32 %v7429_v24, %v10151_v11  ;;  %v7536_v8 = vpop.f32.mrf.mxu0  ;;  %12744 = vst [vmem:[#allocation63_spill] sm:$0xff] %v10482_v51  ;;  %v9037_v11 = vld [vmem:[#allocation9 + $0x1c0] sm:$0xff]   ;;  %v1105_v25 = vsel %vm1047_vm0, %v9679_v7, %v1104_v49 }
 0x2d9   : > { %v7431_v57 = vpop.f32.mrf.mxu1  ;;  %7994 = vmatpush3.bf16.msra.mxu1 %v9033_v55  ;;  %v10484_v48 = vadd.f32 %v7535_v16, %v2946_v19  ;;  %v1231_v19 = vsel %vm1208_vm1, %v1229_v43, %v1230_v53  ;;  %v10503_v43 = vld [vmem:[%s9637_s24 + $0xb8] sm:$0xff] }
 0x2da   : > { %v7432_v15 = vadd.f32 %v7431_v57, %v7430_v23  ;;  %v7537_v32 = vpop.f32.mrf.mxu0  ;;  %7995 = vmatprep.subr.bf16.mxu1 %v9034_v37  ;;  %v1233_v23 = vsel %vm1208_vm1, %v1230_v53, %v9695_v38  ;;  %v1107_v37 = vsel %vm1047_vm0, %v1104_v49, %v1106_v28 }
 0x2db   : > { %v7538_v10 = vadd.f32 %v7537_v32, %v7536_v8  ;;  %v7433_v6 = vpop.f32.mrf.mxu1  ;;  %4036 = vmatmul.mubr.bf16.gmra.mxu1 %v10471_v63 }
 0x2dc   : > { %v2957_v52 = vadd.f32 %v7432_v15, %v10156_v5  ;;  %v7539_v24 = vpop.f32.mrf.mxu0  ;;  %3931 = vmatmul.mubr.bf16.gmra.mxu0 %v10476_v60  ;;  %4043 = vmatprep.mubr.bf16.mxu1 %v10323_v33  ;;  %v9038_v5 = vld [vmem:[#allocation9 + $0x180] sm:$0xff]   ;;  %v10500_v15 = vld [vmem:[%s9637_s24 + $0xb0] sm:$0xff]  ;;  %v10505_v33 = vpack.c.bf16 %v1233_v23, %v1231_v19 }
 0x2dd   : > { %v7434_v55 = vpop.f32.mrf.mxu1  ;;  %3938 = vmatprep.mubr.bf16.mxu0 %v10482_v51  ;;  %7996 = vmatpush3.bf16.msra.mxu1 %v9036_v13  ;;  %v10497_v16 = vadd.f32 %v7538_v10, %v2949_v42  ;;  %v1234_v51 = vrot.slane %v10290_v9, 1  ;;  %v10510_v42 = vpack.c.bf16 %v1107_v37, %v1105_v25  ;;  %v1109_v10 = vrot.slane %v10500_v15, 7 }
 0x2de   : > { %v7435_v8 = vadd.f32 %v7434_v55, %v7433_v6  ;;  %v7540_v57 = vpop.f32.mrf.mxu0  ;;  %7997 = vmatprep.subr.bf16.mxu1 %v9037_v11  ;;  %12745 = vst [vmem:[#allocation64_spill] sm:$0xff] %v10505_v33  ;;  %v1111_v6 = vrot.slane %v10503_v43, 7  ;;  %v10516_v11 = vpack.c.bf16 %v10503_v43, %v10500_v15 }
 0x2df   : > { %v7541_v53 = vadd.f32 %v7540_v57, %v7539_v24  ;;  %v7436_v32 = vpop.f32.mrf.mxu1  ;;  %v1236_v25 = vsel %vm1208_vm1, %v1234_v51, %v1235_v40 }
 0x2e0   : > { %v2962_v49 = vadd.f32 %v7435_v8, %v10159_v22  ;;  %v7542_v28 = vpop.f32.mrf.mxu0  ;;  %12746 = vst [vmem:[#allocation65_spill] sm:$0xff] %v10516_v11  ;;  %v1112_v8 = vsel %vm1047_vm0, %v1109_v10, %v1111_v6 }
 0x2e1   : > { %v7437_v13 = vpop.f32.mrf.mxu1  ;;  %7998 = vmatpush3.bf16.msra.mxu1 %v9038_v5  ;;  %v10518_v24 = vadd.f32 %v7541_v53, %v2954_v44  ;;  %v1238_v44 = vsel %vm1208_vm1, %v1235_v40, %v9695_v38  ;;  %v1110_v5 = vsel %vm1047_vm0, %v9679_v7, %v1109_v10  ;;  %v1239_v40 = vrot.slane %v10318_v41, 1 }
 0x2e2   : > { %v7438_v9 = vadd.f32 %v7437_v13, %v7436_v32  ;;  %v7543_v19 = vpop.f32.mrf.mxu0  ;;  %v10534_v32 = vld [vmem:[%s9637_s24 + $0xc0] sm:$0xff]  ;;  %v10544_v10 = vpack.c.bf16 %v1112_v8, %v1110_v5 }
 0x2e3   : > { %v7544_v54 = vadd.f32 %v7543_v19, %v7542_v28  ;;  %v7439_v22 = vpop.f32.mrf.mxu1  ;;  %4044 = vmatmul.mubr.bf16.gmra.mxu1 %v10505_v33  ;;  %v10537_v28 = vld [vmem:[%s9637_s24 + $0xc8] sm:$0xff]  ;;  %v1240_v19 = vrot.slane %v10321_v20, 1  ;;  %v1114_v6 = vrot.slane %v10534_v32, 7 }
 0x2e4   : > { %v2965_v23 = vadd.f32 %v7438_v9, %v10164_v2  ;;  %v7545_v55 = vpop.f32.mrf.mxu0  ;;  %3939 = vmatmul.mubr.bf16.gmra.mxu0 %v10510_v42  ;;  %4051 = vmatprep.mubr.bf16.mxu1 %v10348_v59  ;;  %v10539_v9 = vpack.c.bf16 %v1238_v44, %v1236_v25  ;;  %12749 = vst [vmem:[#allocation68_spill] sm:$0xff] %v10544_v10 }
 0x2e5   : > { %v7440_v37 = vpop.f32.mrf.mxu1  ;;  %3946 = vmatprep.mubr.bf16.mxu0 %v10516_v11  ;;  %v10531_v57 = vadd.f32 %v7544_v54, %v2957_v52  ;;  %v1116_v54 = vrot.slane %v10537_v28, 7  ;;  %v1241_v5 = vsel %vm1208_vm1, %v1239_v40, %v1240_v19 }
 0x2e6   : > { %v7441_v2 = vadd.f32 %v7440_v37, %v7439_v22  ;;  %v7546_v53 = vpop.f32.mrf.mxu0  ;;  %12748 = vst [vmem:[#allocation67_spill] sm:$0xff] %v10539_v9  ;;  %v10550_v22 = vpack.c.bf16 %v10537_v28, %v10534_v32 }
 0x2e7   : > { %12747 = vst [vmem:[#allocation66_spill] sm:$0xff] %v10531_v57  ;;  %v7547_v51 = vadd.f32 %v7546_v53, %v7545_v55  ;;  %v7442_v13 = vpop.f32.mrf.mxu1 }
 0x2e8   : > { %v2970_v11 = vadd.f32 %v7441_v2, %v10167_v0  ;;  %v7548_v59 = vpop.f32.mrf.mxu0  ;;  %12750 = vst [vmem:[#allocation69_spill] sm:$0xff] %v10550_v22  ;;  %v1117_v2 = vsel %vm1047_vm0, %v1114_v6, %v1116_v54 }
 0x2e9   : > { %v7443_v52 = vpop.f32.mrf.mxu1  ;;  %v10552_v55 = vadd.f32 %v7547_v51, %v2962_v49  ;;  %v1243_v49 = vsel %vm1208_vm1, %v1240_v19, %v9695_v38  ;;  %v1244_v19 = vrot.slane %v10343_v46, 1 }
 0x2ea   : > { %v7444_v25 = vadd.f32 %v7443_v52, %v7442_v13  ;;  %v7549_v41 = vpop.f32.mrf.mxu0  ;;  %v10568_v13 = vld [vmem:[%s9637_s24 + $0xd0] sm:$0xff]  ;;  %v10571_v52 = vld [vmem:[%s9637_s24 + $0xd8] sm:$0xff] }
 0x2eb   : > { %v7550_v44 = vadd.f32 %v7549_v41, %v7548_v59  ;;  %v7445_v20 = vpop.f32.mrf.mxu1  ;;  %4052 = vmatmul.mubr.bf16.gmra.mxu1 %v10539_v9  ;;  %v1115_v59 = vsel %vm1047_vm0, %v9679_v7, %v1114_v6  ;;  %v10573_v41 = vpack.c.bf16 %v1243_v49, %v1241_v5  ;;  %v1119_v54 = vrot.slane %v10568_v13, 7 }
 0x2ec   : > { %v2973_v0 = vadd.f32 %v7444_v25, %v10172_v31  ;;  %v7551_v37 = vpop.f32.mrf.mxu0  ;;  %3947 = vmatmul.mubr.bf16.gmra.mxu0 %v10544_v10  ;;  %4059 = vmatprep.mubr.bf16.mxu1 %v10375_v1  ;;  %v10578_v6 = vpack.c.bf16 %v1117_v2, %v1115_v59 }
 0x2ed   : > { %v7446_v8 = vpop.f32.mrf.mxu1  ;;  %3954 = vmatprep.mubr.bf16.mxu0 %v10550_v22  ;;  %v10565_v53 = vadd.f32 %v7550_v44, %v2965_v23  ;;  %12751 = vst [vmem:[#allocation70_spill] sm:$0xff] %v10573_v41  ;;  %v1245_v22 = vrot.slane %v10346_v29, 1  ;;  %v1121_v44 = vrot.slane %v10571_v52, 7 }
 0x2ee   : > { %v7447_v31 = vadd.f32 %v7446_v8, %v7445_v20  ;;  %v7552_v51 = vpop.f32.mrf.mxu0  ;;  %12752 = vst [vmem:[#allocation71_spill] sm:$0xff] %v10578_v6  ;;  %v10584_v20 = vpack.c.bf16 %v10571_v52, %v10568_v13 }
 0x2ef   : > { %v7553_v40 = vadd.f32 %v7552_v51, %v7551_v37  ;;  %v7448_v25 = vpop.f32.mrf.mxu1  ;;  %v1246_v59 = vsel %vm1208_vm1, %v1244_v19, %v1245_v22 }
 0x2f0   : > { %v2978_v1 = vadd.f32 %v7447_v31, %v10175_v30  ;;  %v7554_v57 = vpop.f32.mrf.mxu0  ;;  %12753 = vst [vmem:[#allocation72_spill] sm:$0xff] %v10584_v20  ;;  %v1122_v31 = vsel %vm1047_vm0, %v1119_v54, %v1121_v44 }
 0x2f1   : > { %v7449_v23 = vpop.f32.mrf.mxu1  ;;  %v10586_v37 = vadd.f32 %v7553_v40, %v2970_v11  ;;  %v1248_v11 = vsel %vm1208_vm1, %v1245_v22, %v9695_v38  ;;  %v1249_v22 = vrot.slane %v10368_v3, 1 }
 0x2f2   : > { %v7450_v5 = vadd.f32 %v7449_v23, %v7448_v25  ;;  %v7555_v46 = vpop.f32.mrf.mxu0  ;;  %v10602_v25 = vld [vmem:[%s9637_s24 + $0xe0] sm:$0xff]  ;;  %v10605_v23 = vld [vmem:[%s9637_s24 + $0xe8] sm:$0xff] }
 0x2f3   : > { %12754 = vst [vmem:[#allocation73_spill] sm:$0xff] %v10586_v37  ;;  %v7556_v49 = vadd.f32 %v7555_v46, %v7554_v57  ;;  %v7451_v29 = vpop.f32.mrf.mxu1  ;;  %4060 = vmatmul.mubr.bf16.gmra.mxu1 %v10573_v41  ;;  %v1120_v57 = vsel %vm1047_vm0, %v9679_v7, %v1119_v54  ;;  %v10607_v46 = vpack.c.bf16 %v1248_v11, %v1246_v59  ;;  %v1124_v44 = vrot.slane %v10602_v25, 7 }
 0x2f4   : > { %v2981_v30 = vadd.f32 %v7450_v5, %v10180_v36  ;;  %v7557_v8 = vpop.f32.mrf.mxu0  ;;  %3955 = vmatmul.mubr.bf16.gmra.mxu0 %v10578_v6  ;;  %4067 = vmatprep.mubr.bf16.mxu1 %v10408_v12  ;;  %v10612_v54 = vpack.c.bf16 %v1122_v31, %v1120_v57 }
 0x2f5   : > { %v7452_v2 = vpop.f32.mrf.mxu1  ;;  %3962 = vmatprep.mubr.bf16.mxu0 %v10584_v20  ;;  %v10599_v51 = vadd.f32 %v7556_v49, %v2973_v0  ;;  %v1250_v20 = vrot.slane %v10371_v21, 1  ;;  %v1126_v49 = vrot.slane %v10605_v23, 7 }
 0x2f6   : > { %v7453_v36 = vadd.f32 %v7452_v2, %v7451_v29  ;;  %v7558_v40 = vpop.f32.mrf.mxu0  ;;  %12756 = vst [vmem:[#allocation75_spill] sm:$0xff] %v10612_v54  ;;  %v10618_v29 = vpack.c.bf16 %v10605_v23, %v10602_v25 }
 0x2f7   : > { %12755 = vst [vmem:[#allocation74_spill] sm:$0xff] %v10599_v51  ;;  %v7559_v19 = vadd.f32 %v7558_v40, %v7557_v8  ;;  %v7454_v5 = vpop.f32.mrf.mxu1  ;;  %v1251_v57 = vsel %vm1208_vm1, %v1249_v22, %v1250_v20  ;;  %v1253_v31 = vsel %vm1208_vm1, %v1250_v20, %v9695_v38  ;;  %v1254_v22 = vrot.slane %v10398_v45, 1 }
 0x2f8   : > { %v2986_v12 = vadd.f32 %v7453_v36, %v10183_v47  ;;  %v7560_v37 = vpop.f32.mrf.mxu0  ;;  %12757 = vst [vmem:[#allocation76_spill] sm:$0xff] %v10618_v29  ;;  %v1127_v36 = vsel %vm1047_vm0, %v1124_v44, %v1126_v49  ;;  %v1255_v20 = vrot.slane %v10401_v50, 1 }
 0x2f9   : > { %v7455_v0 = vpop.f32.mrf.mxu1  ;;  %v10620_v8 = vadd.f32 %v7559_v19, %v2978_v1 }
 0x2fa   : > { %v7456_v59 = vadd.f32 %v7455_v0, %v7454_v5  ;;  %v7561_v3 = vpop.f32.mrf.mxu0  ;;  %v1258_v45 = vsel %vm1208_vm1, %v1255_v20, %v9695_v38 }
 0x2fb   : > { %12758 = vst [vmem:[#allocation77_spill] sm:$0xff] %v10620_v8  ;;  %v7562_v11 = vadd.f32 %v7561_v3, %v7560_v37  ;;  %v7457_v21 = vpop.f32.mrf.mxu1  ;;  %4068 = vmatmul.mubr.bf16.gmra.mxu1 %v10607_v46  ;;  %v1125_v37 = vsel %vm1047_vm0, %v9679_v7, %v1124_v44 }
 0x2fc   : > { %v2989_v47 = vadd.f32 %v7456_v59, %v10188_v39  ;;  %v7563_v2 = vpop.f32.mrf.mxu0  ;;  %3963 = vmatmul.mubr.bf16.gmra.mxu0 %v10612_v54  ;;  %4075 = vmatprep.mubr.bf16.mxu1 %v10442_v27  ;;  %v10635_v59 = vpack.c.bf16 %v1253_v31, %v1251_v57  ;;  %v10640_v27 = vpack.c.bf16 %v1127_v36, %v1125_v37  ;;  %v1260_v37 = vrot.slane %v10435_v58, 1  ;;  %v12763_v58 = vld [vmem:[#allocation38_spill] sm:$0xff] }
 0x2fd   : > { %v7458_v1 = vpop.f32.mrf.mxu1  ;;  %3970 = vmatprep.mubr.bf16.mxu0 %v10618_v29  ;;  %v10633_v40 = vadd.f32 %v7562_v11, %v2981_v30 }
 0x2fe   : > { %v7459_v39 = vadd.f32 %v7458_v1, %v7457_v21  ;;  %v7564_v19 = vpop.f32.mrf.mxu0  ;;  %12759 = vst [vmem:[#allocation78_spill] sm:$0xff] %v10635_v59  ;;  %12760 = vst [vmem:[#allocation79_spill] sm:$0xff] %v10640_v27  ;;  %v1259_v1 = vrot.slane %v10432_v14, 1  ;;  %v1263_v14 = vsel %vm1208_vm1, %v1260_v37, %v9695_v38 }
 0x2ff   : > { %v7565_v5 = vadd.f32 %v7564_v19, %v7563_v2  ;;  %v7460_v0 = vpop.f32.mrf.mxu1 }
 0x300   : > { %v2994_v3 = vadd.f32 %v7459_v39, %v10197_v18  ;;  %v7566_v29 = vpop.f32.mrf.mxu0  ;;  %v1256_v18 = vsel %vm1208_vm1, %v1254_v22, %v1255_v20 }
 0x301   : > { %v7461_v51 = vpop.f32.mrf.mxu1  ;;  %v10642_v8 = vadd.f32 %v7565_v5, %v2986_v12 }
 0x302   : > { %v7462_v30 = vadd.f32 %v7461_v51, %v7460_v0  ;;  %v7567_v44 = vpop.f32.mrf.mxu0 }
 0x303   : > { %v7568_v49 = vadd.f32 %v7567_v44, %v7566_v29  ;;  %v7463_v11 = vpop.f32.mrf.mxu1  ;;  %4076 = vmatmul.mubr.bf16.gmra.mxu1 %v10635_v59 }
 0x304   : > { %v2997_v21 = vadd.f32 %v7462_v30, %v10208_v17  ;;  %v7569_v2 = vpop.f32.mrf.mxu0  ;;  %3971 = vmatmul.mubr.bf16.gmra.mxu0 %v10640_v27  ;;  %4083 = vmatprep.mubr.bf16.mxu1 %v10476_v60  ;;  %v10654_v17 = vpack.c.bf16 %v1258_v45, %v1256_v18 }
 0x305   : > { %v7464_v50 = vpop.f32.mrf.mxu1  ;;  %4172 = vmatprep.mubr.bf16.mxu0 %v10403_v35  ;;  %v10652_v12 = vadd.f32 %v7568_v49, %v2989_v47  ;;  %v9024_v47 = vld [vmem:[#allocation9 + $0x230] sm:$0xff]   ;;  %v12762_v49 = vld [vmem:[#allocation28_spill] sm:$0xff] }
 0x306   : > { %v7465_v51 = vadd.f32 %v7464_v50, %v7463_v11  ;;  %v7570_v29 = vpop.f32.mrf.mxu0  ;;  %12761 = vst [vmem:[#allocation80_spill] sm:$0xff] %v10654_v17 }
 0x307   : > { %v7571_v57 = vadd.f32 %v7570_v29, %v7569_v2  ;;  %v7466_v31 = vpop.f32.mrf.mxu1  ;;  %v1264_v29 = vrot.slane %v10466_v34, 1 }
 0x308   : > { %v3002_v36 = vadd.f32 %v7465_v51, %v10222_v4  ;;  %v7572_v39 = vpop.f32.mrf.mxu0  ;;  %v1261_v4 = vsel %vm1208_vm1, %v1259_v1, %v1260_v37 }
 0x309   : > { %v7467_v19 = vpop.f32.mrf.mxu1  ;;  %v10659_v5 = vadd.f32 %v7571_v57, %v2994_v3  ;;  %v10672_v51 = vpack.c.bf16 %v1263_v14, %v1261_v4  ;;  %v1265_v57 = vrot.slane %v10469_v61, 1  ;;  %v12767_v4 = vld [vmem:[#allocation29_spill] sm:$0xff] }
 0x30a   : > { %v7468_v0 = vadd.f32 %v7467_v19, %v7466_v31  ;;  %v7573_v35 = vpop.f32.mrf.mxu0  ;;  %v12765_v31 = vld [vmem:[#allocation31_spill] sm:$0xff] }
 0x30b   : > { %v7574_v22 = vadd.f32 %v7573_v35, %v7572_v39  ;;  %v7469_v20 = vpop.f32.mrf.mxu1  ;;  %4084 = vmatmul.mubr.bf16.gmra.mxu1 %v10654_v17  ;;  %12764 = vst [vmem:[#allocation28_spill] sm:$0xff] %v10672_v51  ;;  %v9035_v35 = vld [vmem:[#allocation9 + $0x220] sm:$0xff]   ;;  %v1266_v61 = vsel %vm1208_vm1, %v1264_v29, %v1265_v57  ;;  %v1270_v29 = vrot.slane %v10503_v43, 1 }
 0x30c   : > { %v3005_v30 = vadd.f32 %v7468_v0, %v10233_v62  ;;  %v7575_v44 = vpop.f32.mrf.mxu0  ;;  %4173 = vmatmul.mubr.bf16.vlgmr.msra.gmra.mxu0 %v12762_v49  ;;  %4091 = vmatprep.mubr.bf16.mxu1 %v10510_v42  ;;  %v9027_v62 = vld [vmem:[#allocation9 + $0x228] sm:$0xff]  }
 0x30d   : > { %8688 = vmatpush3.bf16.msra.mxu0 %v12763_v58  ;;  %v7470_v3 = vpop.f32.mrf.mxu1  ;;  %4180 = vmatprep.mubr.bf16.mxu0 %v10437_v26  ;;  %v10670_v11 = vadd.f32 %v7574_v22, %v2997_v21 }
 0x30e   : > { %v7471_v2 = vadd.f32 %v7470_v3, %v7469_v20  ;;  %v7576_v18 = vpop.f32.mrf.mxu0  ;;  %8689 = vmatprep.subr.bf16.mxu0 %v9024_v47 }
 0x30f   : > { %v7577_v45 = vadd.f32 %v7576_v18, %v7575_v44  ;;  %v7472_v50 = vpop.f32.mrf.mxu1  ;;  %v12766_v44 = vld [vmem:[#allocation33_spill] sm:$0xff] }
 0x310   : > { %v3010_v1 = vadd.f32 %v7471_v2, %v12765_v31  ;;  %v7578_v37 = vpop.f32.mrf.mxu0  ;;  %v9039_v2 = vld [vmem:[#allocation9 + $0x218] sm:$0xff]   ;;  %v1269_v31 = vrot.slane %v10500_v15, 1 }
 0x311   : > { %v7473_v39 = vpop.f32.mrf.mxu1  ;;  %8690 = vmatpush3.bf16.msra.mxu0 %v9024_v47  ;;  %v10677_v19 = vadd.f32 %v7577_v45, %v3002_v36  ;;  %v1268_v36 = vsel %vm1208_vm1, %v1265_v57, %v9695_v38 }
 0x312   : > { %v7474_v21 = vadd.f32 %v7473_v39, %v7472_v50  ;;  %v7579_v0 = vpop.f32.mrf.mxu0  ;;  %8691 = vmatprep.subr.bf16.mxu0 %v9027_v62  ;;  %v10689_v50 = vpack.c.bf16 %v1268_v36, %v1266_v61  ;;  %v12771_v36 = vld [vmem:[#allocation32_spill] sm:$0xff]  ;;  %v1271_v43 = vsel %vm1208_vm1, %v1269_v31, %v1270_v29  ;;  %v1275_v31 = vrot.slane %v10537_v28, 1 }
 0x313   : > { %v7580_v22 = vadd.f32 %v7579_v0, %v7578_v37  ;;  %v7475_v20 = vpop.f32.mrf.mxu1  ;;  %4092 = vmatmul.mubr.bf16.gmra.mxu1 %v10672_v51  ;;  %v12769_v37 = vld [vmem:[#allocation35_spill] sm:$0xff] }
 0x314   : > { %v3013_v49 = vadd.f32 %v7474_v21, %v12766_v44  ;;  %v7581_v34 = vpop.f32.mrf.mxu0  ;;  %4181 = vmatmul.mubr.bf16.gmra.mxu0 %v12767_v4  ;;  %4099 = vmatprep.mubr.bf16.mxu1 %v10544_v10  ;;  %12768 = vst [vmem:[#allocation38_spill] sm:$0xff] %v10689_v50 }
 0x315   : > { %v7476_v47 = vpop.f32.mrf.mxu1  ;;  %4188 = vmatprep.mubr.bf16.mxu0 %v10471_v63  ;;  %8692 = vmatpush3.bf16.msra.mxu0 %v9027_v62  ;;  %v10687_v14 = vadd.f32 %v7580_v22, %v3005_v30  ;;  %v9040_v22 = vld [vmem:[#allocation9 + $0x210] sm:$0xff]  }
 0x316   : > { %v7477_v58 = vadd.f32 %v7476_v47, %v7475_v20  ;;  %v7582_v3 = vpop.f32.mrf.mxu0  ;;  %8693 = vmatprep.subr.bf16.mxu0 %v9035_v35 }
 0x317   : > { %v7583_v18 = vadd.f32 %v7582_v3, %v7581_v34  ;;  %v7478_v45 = vpop.f32.mrf.mxu1  ;;  %v12770_v34 = vld [vmem:[#allocation37_spill] sm:$0xff] }
 0x318   : > { %v3018_v57 = vadd.f32 %v7477_v58, %v12769_v37  ;;  %v7584_v39 = vpop.f32.mrf.mxu0 }
 0x319   : > { %v7479_v21 = vpop.f32.mrf.mxu1  ;;  %8694 = vmatpush3.bf16.msra.mxu0 %v9035_v35  ;;  %v10694_v62 = vadd.f32 %v7583_v18, %v3010_v1  ;;  %v1273_v1 = vsel %vm1208_vm1, %v1270_v29, %v9695_v38  ;;  %v9041_v18 = vld [vmem:[#allocation9 + $0x208] sm:$0xff]  }
 0x31a   : > { %v7480_v30 = vadd.f32 %v7479_v21, %v7478_v45  ;;  %v7585_v0 = vpop.f32.mrf.mxu0  ;;  %8695 = vmatprep.subr.bf16.mxu0 %v9039_v2  ;;  %v1274_v21 = vrot.slane %v10534_v32, 1  ;;  %v12773_v32 = vld [vmem:[#allocation42_spill] sm:$0xff] }
 0x31b   : > { %v7586_v20 = vadd.f32 %v7585_v0, %v7584_v39  ;;  %v7481_v44 = vpop.f32.mrf.mxu1  ;;  %4100 = vmatmul.mubr.bf16.gmra.mxu1 %v10689_v50  ;;  %v10706_v39 = vpack.c.bf16 %v1273_v1, %v1271_v43 }
 0x31c   : > { %v3021_v61 = vadd.f32 %v7480_v30, %v12770_v34  ;;  %v7587_v15 = vpop.f32.mrf.mxu0  ;;  %4189 = vmatmul.mubr.bf16.gmra.mxu0 %v12771_v36  ;;  %4107 = vmatprep.mubr.bf16.mxu1 %v10578_v6  ;;  %v12772_v30 = vld [vmem:[#allocation40_spill] sm:$0xff] }
 0x31d   : > { %v7482_v35 = vpop.f32.mrf.mxu1  ;;  %4196 = vmatprep.mubr.bf16.mxu0 %v10505_v33  ;;  %8696 = vmatpush3.bf16.msra.mxu0 %v9039_v2  ;;  %v10704_v47 = vadd.f32 %v7586_v20, %v3013_v49 }
 0x31e   : > { %v7483_v58 = vadd.f32 %v7482_v35, %v7481_v44  ;;  %v7588_v3 = vpop.f32.mrf.mxu0  ;;  %8697 = vmatprep.subr.bf16.mxu0 %v9040_v22  ;;  %v9042_v44 = vld [vmem:[#allocation9 + $0x200] sm:$0xff]  }
 0x31f   : > { %v7589_v45 = vadd.f32 %v7588_v3, %v7587_v15  ;;  %v7484_v37 = vpop.f32.mrf.mxu1  ;;  %v12774_v35 = vld [vmem:[#allocation36_spill] sm:$0xff] }
 0x320   : > { %v3026_v29 = vadd.f32 %v7483_v58, %v12772_v30  ;;  %v7590_v0 = vpop.f32.mrf.mxu0  ;;  %v10724_v30 = vld [vmem:[%s9637_s24 + $0xf0] sm:$0xff] }
 0x321   : > { %v7485_v34 = vpop.f32.mrf.mxu1  ;;  %8698 = vmatpush3.bf16.msra.mxu0 %v9040_v22  ;;  %v10711_v2 = vadd.f32 %v7589_v45, %v3018_v57  ;;  %v1276_v57 = vsel %vm1208_vm1, %v1274_v21, %v1275_v31  ;;  %v1278_v22 = vsel %vm1208_vm1, %v1275_v31, %v9695_v38  ;;  %v1279_v21 = vrot.slane %v10568_v13, 1  ;;  %v12776_v13 = vld [vmem:[#allocation46_spill] sm:$0xff] }
 0x322   : > { %v7486_v49 = vadd.f32 %v7485_v34, %v7484_v37  ;;  %v7591_v20 = vpop.f32.mrf.mxu0  ;;  %8699 = vmatprep.subr.bf16.mxu0 %v9041_v18  ;;  %v1280_v31 = vrot.slane %v10571_v52, 1 }
 0x323   : > { %v7592_v15 = vadd.f32 %v7591_v20, %v7590_v0  ;;  %v7487_v43 = vpop.f32.mrf.mxu1  ;;  %4108 = vmatmul.mubr.bf16.gmra.mxu1 %v10706_v39  ;;  %v10727_v0 = vld [vmem:[%s9637_s24 + $0xf8] sm:$0xff]  ;;  %v10729_v20 = vpack.c.bf16 %v1278_v22, %v1276_v57  ;;  %s12543_s24 = scalar_lea.hbm %s12600_s10, %s7150_s2 }
 0x324   : > { %v3029_v1 = vadd.f32 %v7486_v49, %v12773_v32  ;;  %v7593_v28 = vpop.f32.mrf.mxu0  ;;  %4197 = vmatmul.mubr.bf16.gmra.mxu0 %v12774_v35  ;;  %4115 = vmatprep.mubr.bf16.mxu1 %v10612_v54  ;;  %v12775_v32 = vld [vmem:[#allocation44_spill] sm:$0xff] }
 0x325   : > { %v7488_v58 = vpop.f32.mrf.mxu1  ;;  %4204 = vmatprep.mubr.bf16.mxu0 %v10539_v9  ;;  %8700 = vmatpush3.bf16.msra.mxu0 %v9041_v18  ;;  %v10721_v3 = vadd.f32 %v7592_v15, %v3021_v61  ;;  %v1341_v15 = vrot.slane %v10724_v30, 7  ;;  %v12777_v9 = vld [vmem:[#allocation41_spill] sm:$0xff] }
 0x326   : > { %v7489_v45 = vadd.f32 %v7488_v58, %v7487_v43  ;;  %v7594_v37 = vpop.f32.mrf.mxu0  ;;  %8701 = vmatprep.subr.bf16.mxu0 %v9042_v44  ;;  %v1343_v43 = vrot.slane %v10727_v0, 7 }
 0x327   : > { %v7595_v34 = vadd.f32 %v7594_v37, %v7593_v28  ;;  %v7490_v49 = vpop.f32.mrf.mxu1 }
 0x328   : > { %v3034_v54 = vadd.f32 %v7489_v45, %v12775_v32  ;;  %v7596_v18 = vpop.f32.mrf.mxu0  ;;  %v1281_v45 = vsel %vm1208_vm1, %v1279_v21, %v1280_v31  ;;  %v1284_v21 = vrot.slane %v10602_v25, 1  ;;  %v12781_v25 = vld [vmem:[#allocation45_spill] sm:$0xff] }
 0x329   : > { %v7491_v61 = vpop.f32.mrf.mxu1  ;;  %v10736_v58 = vadd.f32 %v7595_v34, %v3026_v29  ;;  %8702 = vmatpush3.bf16.msra.mxu0 %v9042_v44  ;;  %v1283_v29 = vsel %vm1208_vm1, %v1280_v31, %v9695_v38  ;;  %v1342_v44 = vsel %vm1047_vm0, %v9679_v7, %v1341_v15  ;;  %v1285_v31 = vrot.slane %v10605_v23, 1 }
 0x32a   : > { %v7492_v6 = vadd.f32 %v7491_v61, %v7490_v49  ;;  %v7597_v28 = vpop.f32.mrf.mxu0  ;;  %v1344_v49 = vsel %vm1047_vm0, %v1341_v15, %v1343_v43 }
 0x32b   : > { %v7598_v37 = vadd.f32 %v7597_v28, %v7596_v18  ;;  %v7493_v57 = vpop.f32.mrf.mxu1  ;;  %4116 = vmatmul.mubr.bf16.gmra.mxu1 %v10729_v20  ;;  %v10756_v33 = vpack.c.bf16 %v1344_v49, %v1342_v44  ;;  %v1288_v23 = vsel %vm1208_vm1, %v1285_v31, %v9695_v38 }
 0x32c   : > { %v3037_v22 = vadd.f32 %v7492_v6, %v12776_v13  ;;  %v7599_v52 = vpop.f32.mrf.mxu0  ;;  %4205 = vmatmul.mubr.bf16.gmra.mxu0 %v12777_v9  ;;  %4123 = vmatprep.mubr.bf16.mxu1 %v10640_v27  ;;  %v10751_v13 = vpack.c.bf16 %v1283_v29, %v1281_v45  ;;  %v12778_v27 = vld [vmem:[#allocation48_spill] sm:$0xff] }
 0x32d   : > { %v7494_v34 = vpop.f32.mrf.mxu1  ;;  %4212 = vmatprep.mubr.bf16.mxu0 %v10573_v41  ;;  %v10749_v32 = vadd.f32 %v7598_v37, %v3029_v1  ;;  %12779 = vst [vmem:[#allocation31_spill] sm:$0xff] %v10756_v33 }
 0x32e   : > { %v7495_v6 = vadd.f32 %v7494_v34, %v7493_v57  ;;  %v7600_v18 = vpop.f32.mrf.mxu0  ;;  %v12780_v57 = vld [vmem:[#allocation50_spill] sm:$0xff] }
 0x32f   : > { %v7601_v61 = vadd.f32 %v7600_v18, %v7599_v52  ;;  %v7496_v28 = vpop.f32.mrf.mxu1 }
 0x330   : > { %v3042_v10 = vadd.f32 %v7495_v6, %v12778_v27  ;;  %v7602_v41 = vpop.f32.mrf.mxu0  ;;  %v1286_v27 = vsel %vm1208_vm1, %v1284_v21, %v1285_v31  ;;  %v12783_v6 = vld [vmem:[#allocation52_spill] sm:$0xff] }
 0x331   : > { %v7497_v7 = vpop.f32.mrf.mxu1  ;;  %v10758_v63 = vadd.f32 %v7601_v61, %v3034_v54  ;;  %v10770_v49 = vpack.c.bf16 %v1288_v23, %v1286_v27 }
 0x332   : > { %v7498_v1 = vadd.f32 %v7497_v7, %v7496_v28  ;;  %v7603_v15 = vpop.f32.mrf.mxu0 }
 0x333   : > { %v7604_v43 = vadd.f32 %v7603_v15, %v7602_v41  ;;  %v7499_v37 = vpop.f32.mrf.mxu1  ;;  %4124 = vmatmul.mubr.bf16.gmra.mxu1 %v10751_v13  ;;  %12782 = vst [vmem:[#allocation33_spill] sm:$0xff] %v10770_v49 }
 0x334   : > { %v3045_v52 = vadd.f32 %v7498_v1, %v12780_v57  ;;  %v7605_v45 = vpop.f32.mrf.mxu0  ;;  %4213 = vmatmul.mubr.bf16.gmra.mxu0 %v12781_v25  ;;  %4131 = vmatprep.mubr.bf16.mxu1 %v10756_v33  ;;  %v12787_v33 = vld [vmem:[#allocation57_spill] sm:$0xff] }
 0x335   : > { %v7500_v54 = vpop.f32.mrf.mxu1  ;;  %4220 = vmatprep.mubr.bf16.mxu0 %v10607_v46  ;;  %v10768_v7 = vadd.f32 %v7604_v43, %v3037_v22  ;;  %v12784_v22 = vld [vmem:[#allocation54_spill] sm:$0xff] }
 0x336   : > { %v7501_v41 = vadd.f32 %v7500_v54, %v7499_v37  ;;  %v7606_v29 = vpop.f32.mrf.mxu0  ;;  %v12785_v54 = vld [vmem:[#allocation49_spill] sm:$0xff] }
 0x337   : > { %v7607_v34 = vadd.f32 %v7606_v29, %v7605_v45  ;;  %v7502_v44 = vpop.f32.mrf.mxu1 }
 0x338   : > { %v3050_v18 = vadd.f32 %v7501_v41, %v12783_v6  ;;  %v7608_v61 = vpop.f32.mrf.mxu0 }
 0x339   : > { %v7503_v28 = vpop.f32.mrf.mxu1  ;;  %v10773_v1 = vadd.f32 %v7607_v34, %v3042_v10 }
 0x33a   : > { %v7504_v21 = vadd.f32 %v7503_v28, %v7502_v44  ;;  %v7609_v15 = vpop.f32.mrf.mxu0 }
 0x33b   : > { %v7610_v31 = vadd.f32 %v7609_v15, %v7608_v61  ;;  %v7505_v57 = vpop.f32.mrf.mxu1  ;;  %4132 = vmatmul.mubr.bf16.gmra.mxu1 %v10770_v49 }
 0x33c   : > { %v3053_v43 = vadd.f32 %v7504_v21, %v12784_v22  ;;  %v7611_v37 = vpop.f32.mrf.mxu0  ;;  %4221 = vmatmul.mubr.bf16.gmra.mxu0 %v12785_v54  ;;  %4333 = vmatprep.mubr.bf16.mxu1 %v12767_v4  ;;  %v12786_v4 = vld [vmem:[#allocation30_spill] sm:$0xff] }
 0x33d   : > { %v7506_v45 = vpop.f32.mrf.mxu1  ;;  %4228 = vmatprep.mubr.bf16.mxu0 %v10635_v59  ;;  %v10780_v27 = vadd.f32 %v7610_v31, %v3045_v52 }
 0x33e   : > { %v7507_v10 = vadd.f32 %v7506_v45, %v7505_v57  ;;  %v7612_v23 = vpop.f32.mrf.mxu0  ;;  %v12788_v57 = vld [vmem:[#allocation53_spill] sm:$0xff] }
 0x33f   : > { %v7613_v41 = vadd.f32 %v7612_v23, %v7611_v37  ;;  %v7508_v29 = vpop.f32.mrf.mxu1  ;;  %v12789_v37 = vld [vmem:[#allocation60_spill] sm:$0xff] }
 0x340   : > { %v3058_v34 = vadd.f32 %v7507_v10, %v10410_v56  ;;  %v7614_v44 = vpop.f32.mrf.mxu0 }
 0x341   : > { %v7509_v6 = vpop.f32.mrf.mxu1  ;;  %v10783_v61 = vadd.f32 %v7613_v41, %v3050_v18 }
 0x342   : > { %v7510_v28 = vadd.f32 %v7509_v6, %v7508_v29  ;;  %v7615_v21 = vpop.f32.mrf.mxu0  ;;  %v12790_v6 = vld [vmem:[#allocation61_spill] sm:$0xff] }
 0x343   : > { %v7616_v15 = vadd.f32 %v7615_v21, %v7614_v44  ;;  %v8657_v22 = vpop.f32.mrf.mxu1  ;;  %4334 = vmatmul.mubr.bf16.vlgmr.msra.gmra.mxu1 %v12786_v4  ;;  %v12791_v4 = vld [vmem:[#allocation34_spill] sm:$0xff] }
 0x344   : > { %v3061_v59 = vadd.f32 %v7510_v28, %v12787_v33  ;;  %v3268_v52 = vadd.f32 %v8657_v22, %v10484_v48  ;;  %v7617_v31 = vpop.f32.mrf.mxu0  ;;  %4229 = vmatmul.mubr.bf16.gmra.mxu0 %v12788_v57  ;;  %4341 = vmatprep.mubr.bf16.mxu1 %v12771_v36 }
 0x345   : > { %v3259_v56 = vpop.f32.mrf.mxu1  ;;  %4236 = vmatprep.mubr.bf16.mxu0 %v10654_v17  ;;  %v10791_v18 = vadd.f32 %v7616_v15, %v3053_v43 }
 0x346   : > { %v3260_v45 = vadd.f32 %v3259_v56, %v12789_v37  ;;  %v7618_v10 = vpop.f32.mrf.mxu0  ;;  %v12792_v56 = vld [vmem:[#allocation56_spill] sm:$0xff] }
 0x347   : > { %v7619_v23 = vadd.f32 %v7618_v10, %v7617_v31  ;;  %v8658_v41 = vpop.f32.mrf.mxu1 }
 0x348   : > { %v3271_v29 = vadd.f32 %v8658_v41, %v10497_v16  ;;  %v7620_v33 = vpop.f32.mrf.mxu0 }
 0x349   : > { %v3262_v44 = vpop.f32.mrf.mxu1  ;;  %v10795_v48 = vadd.f32 %v7619_v23, %v3058_v34 }
 0x34a   : > { %v3263_v28 = vadd.f32 %v3262_v44, %v12790_v6  ;;  %v7621_v21 = vpop.f32.mrf.mxu0  ;;  %v12793_v6 = vld [vmem:[#allocation66_spill] sm:$0xff] }
 0x34b   : > { %v7622_v36 = vadd.f32 %v7621_v21, %v7620_v33  ;;  %v8661_v22 = vpop.f32.mrf.mxu1  ;;  %4342 = vmatmul.mubr.bf16.gmra.mxu1 %v12791_v4 }
 0x34c   : > { %v10800_v43 = vadd.f32 %v8661_v22, %v10552_v55  ;;  %v7663_v15 = vpop.f32.mrf.mxu0  ;;  %4237 = vmatmul.mubr.bf16.gmra.mxu0 %v12792_v56  ;;  %4349 = vmatprep.mubr.bf16.mxu1 %v12774_v35 }
 0x34d   : > { %v3275_v16 = vpop.f32.mrf.mxu1  ;;  %4244 = vmatprep.mubr.bf16.mxu0 %v10672_v51  ;;  %v10805_v34 = vadd.f32 %v7622_v36, %v3061_v59  ;;  %v12794_v51 = vld [vmem:[#allocation39_spill] sm:$0xff]  ;;  %v12795_v59 = vld [vmem:[#allocation77_spill] sm:$0xff] }
 0x34e   : > { %v3276_v31 = vadd.f32 %v3275_v16, %v10518_v24  ;;  %v7664_v37 = vpop.f32.mrf.mxu0  ;;  %v12797_v16 = vld [vmem:[#allocation73_spill] sm:$0xff] }
 0x34f   : > { %v7665_v10 = vadd.f32 %v7664_v37, %v7663_v15  ;;  %v8662_v23 = vpop.f32.mrf.mxu1  ;;  %v12796_v15 = vld [vmem:[#allocation59_spill] sm:$0xff] }
 0x350   : > { %v10809_v41 = vadd.f32 %v8662_v23, %v10565_v53  ;;  %v7666_v55 = vpop.f32.mrf.mxu0 }
 0x351   : > { %v10811_v33 = vadd.f32 %v7665_v10, %v3260_v45  ;;  %v3278_v44 = vpop.f32.mrf.mxu1 }
 0x352   : > { %v3279_v21 = vadd.f32 %v3278_v44, %v12793_v6  ;;  %v7667_v35 = vpop.f32.mrf.mxu0 }
 0x353   : > { %v7668_v22 = vadd.f32 %v7667_v35, %v7666_v55  ;;  %v8665_v4 = vpop.f32.mrf.mxu1  ;;  %4350 = vmatmul.mubr.bf16.gmra.mxu1 %v12794_v51 }
 0x354   : > { %v10816_v36 = vadd.f32 %v8665_v4, %v12795_v59  ;;  %v7669_v24 = vpop.f32.mrf.mxu0  ;;  %4245 = vmatmul.mubr.bf16.gmra.mxu0 %v12796_v15  ;;  %4357 = vmatprep.mubr.bf16.mxu1 %v12777_v9  ;;  %v9043_v4 = vld [vmem:[#allocation12 + $0x78] sm:$0xff]  }
 0x355   : > { %v10820_v53 = vadd.f32 %v7668_v22, %v3263_v28  ;;  %v3291_v45 = vpop.f32.mrf.mxu1  ;;  %4252 = vmatprep.mubr.bf16.mxu0 %v10689_v50  ;;  %v9044_v9 = vld [vmem:[#allocation12 + $0x38] sm:$0xff]   ;;  %v12798_v28 = vld [vmem:[#allocation74_spill] sm:$0xff]  ;;  %8119 = vmatprep.subr.bf16.mxu1 %v9043_v4 }
 0x356   : > { %v10824_v37 = vadd.f32 %v3291_v45, %v12797_v16  ;;  %v7670_v10 = vpop.f32.mrf.mxu0  ;;  %v12799_v45 = vld [vmem:[#allocation43_spill] sm:$0xff]  ;;  %8120 = vmatpush3.bf16.msra.mxu1 %v9044_v9 }
 0x357   : > { %v7671_v23 = vadd.f32 %v7670_v10, %v7669_v24  ;;  %v8666_v55 = vpop.f32.mrf.mxu1  ;;  %v12800_v16 = vld [vmem:[#allocation63_spill] sm:$0xff] }
 0x358   : > { %v10827_v51 = vadd.f32 %v8666_v55, %v10633_v40  ;;  %v7672_v44 = vpop.f32.mrf.mxu0  ;;  %v12801_v9 = vld [vmem:[#allocation47_spill] sm:$0xff] }
 0x359   : > { %v10829_v6 = vadd.f32 %v7671_v23, %v3268_v52  ;;  %v3294_v35 = vpop.f32.mrf.mxu1 }
 0x35a   : > { %v10832_v22 = vadd.f32 %v3294_v35, %v12798_v28  ;;  %v7673_v59 = vpop.f32.mrf.mxu0 }
 0x35b   : > { %v7674_v50 = vadd.f32 %v7673_v59, %v7672_v44  ;;  %v8669_v17 = vpop.f32.mrf.mxu1  ;;  %4358 = vmatmul.mubr.bf16.gmra.mxu1 %v12799_v45 }
 0x35c   : > { %v10836_v24 = vadd.f32 %v8669_v17, %v10659_v5  ;;  %v7675_v40 = vpop.f32.mrf.mxu0  ;;  %4253 = vmatmul.mubr.bf16.gmra.mxu0 %v12800_v16  ;;  %4365 = vmatprep.mubr.bf16.mxu1 %v12781_v25 }
 0x35d   : > { %v10840_v52 = vadd.f32 %v7674_v50, %v3271_v29  ;;  %v3307_v10 = vpop.f32.mrf.mxu1  ;;  %4260 = vmatprep.mubr.bf16.mxu0 %v10706_v39 }
 0x35e   : > { %v10844_v23 = vadd.f32 %v3307_v10, %v10642_v8  ;;  %v7676_v55 = vpop.f32.mrf.mxu0 }
 0x35f   : > { %v7677_v44 = vadd.f32 %v7676_v55, %v7675_v40  ;;  %v8670_v35 = vpop.f32.mrf.mxu1  ;;  %v12802_v40 = vld [vmem:[#allocation65_spill] sm:$0xff] }
 0x360   : > { %v10847_v17 = vadd.f32 %v8670_v35, %v10670_v11  ;;  %v7678_v5 = vpop.f32.mrf.mxu0 }
 0x361   : > { %v10849_v4 = vadd.f32 %v7677_v44, %v3276_v31  ;;  %v3310_v28 = vpop.f32.mrf.mxu1 }
 0x362   : > { %v10852_v50 = vadd.f32 %v3310_v28, %v10652_v12  ;;  %v7679_v25 = vpop.f32.mrf.mxu0 }
 0x363   : > { %v7680_v29 = vadd.f32 %v7679_v25, %v7678_v5  ;;  %v8673_v59 = vpop.f32.mrf.mxu1  ;;  %4366 = vmatmul.mubr.bf16.gmra.mxu1 %v12801_v9  ;;  %v12803_v9 = vld [vmem:[#allocation51_spill] sm:$0xff] }
 0x364   : > { %v10856_v8 = vadd.f32 %v8673_v59, %v10694_v62  ;;  %v7681_v45 = vpop.f32.mrf.mxu0  ;;  %4261 = vmatmul.mubr.bf16.gmra.mxu0 %v12802_v40  ;;  %4373 = vmatprep.mubr.bf16.mxu1 %v12785_v54  ;;  %v9045_v54 = vld [vmem:[#allocation12 + $0x70] sm:$0xff]  }
 0x365   : > { %v10860_v11 = vadd.f32 %v7680_v29, %v3279_v21  ;;  %v3323_v31 = vpop.f32.mrf.mxu1  ;;  %4268 = vmatprep.mubr.bf16.mxu0 %v10729_v20  ;;  %v9046_v21 = vld [vmem:[#allocation12 + $0x30] sm:$0xff]   ;;  %8121 = vmatprep.subr.bf16.mxu1 %v9045_v54 }
 0x366   : > { %v10864_v12 = vadd.f32 %v3323_v31, %v10677_v19  ;;  %v7682_v10 = vpop.f32.mrf.mxu0  ;;  %v12804_v31 = vld [vmem:[#allocation69_spill] sm:$0xff]  ;;  %8122 = vmatpush3.bf16.msra.mxu1 %v9046_v21  ;;  %v1350_v21 = vrot.slane %v10724_v30, 1 }
 0x367   : > { %v7683_v55 = vadd.f32 %v7682_v10, %v7681_v45  ;;  %v8674_v44 = vpop.f32.mrf.mxu1 }
 0x368   : > { %v10867_v35 = vadd.f32 %v8674_v44, %v10704_v47  ;;  %v7684_v62 = vpop.f32.mrf.mxu0 }
 0x369   : > { %v10870_v5 = vadd.f32 %v7683_v55, %v10800_v43  ;;  %v3326_v28 = vpop.f32.mrf.mxu1 }
 0x36a   : > { %v10873_v25 = vadd.f32 %v3326_v28, %v10687_v14  ;;  %v7685_v29 = vpop.f32.mrf.mxu0 }
 0x36b   : > { %v7686_v59 = vadd.f32 %v7685_v29, %v7684_v62  ;;  %v8677_v19 = vpop.f32.mrf.mxu1  ;;  %4374 = vmatmul.mubr.bf16.gmra.mxu1 %v12803_v9  ;;  %v12805_v9 = vld [vmem:[#allocation55_spill] sm:$0xff] }
 0x36c   : > { %v10877_v45 = vadd.f32 %v8677_v19, %v10736_v58  ;;  %v7687_v47 = vpop.f32.mrf.mxu0  ;;  %4269 = vmatmul.mubr.bf16.gmra.mxu0 %v12804_v31  ;;  %4381 = vmatprep.mubr.bf16.mxu1 %v12788_v57 }
 0x36d   : > { %v10882_v43 = vadd.f32 %v7686_v59, %v10809_v41  ;;  %v3339_v10 = vpop.f32.mrf.mxu1  ;;  %4276 = vmatprep.mubr.bf16.mxu0 %v10751_v13 }
 0x36e   : > { %v10886_v14 = vadd.f32 %v3339_v10, %v10711_v2  ;;  %v7688_v55 = vpop.f32.mrf.mxu0  ;;  %v1351_v2 = vrot.slane %v10727_v0, 1  ;;  %v12806_v10 = vld [vmem:[#allocation72_spill] sm:$0xff] }
 0x36f   : > { %v7689_v44 = vadd.f32 %v7688_v55, %v7687_v47  ;;  %v8678_v62 = vpop.f32.mrf.mxu1 }
 0x370   : > { %v10889_v58 = vadd.f32 %v8678_v62, %v10749_v32  ;;  %v7690_v28 = vpop.f32.mrf.mxu0  ;;  %v1352_v62 = vsel %vm1208_vm1, %v1350_v21, %v1351_v2 }
 0x371   : > { %v10892_v54 = vadd.f32 %v7689_v44, %v10824_v37  ;;  %v3342_v57 = vpop.f32.mrf.mxu1 }
 0x372   : > { %v10895_v41 = vadd.f32 %v3342_v57, %v10721_v3  ;;  %v7691_v29 = vpop.f32.mrf.mxu0 }
 0x373   : > { %v7692_v59 = vadd.f32 %v7691_v29, %v7690_v28  ;;  %v8681_v19 = vpop.f32.mrf.mxu1  ;;  %4382 = vmatmul.mubr.bf16.gmra.mxu1 %v12805_v9  ;;  %v9048_v9 = vld [vmem:[#allocation12 + $0x28] sm:$0xff]  }
 0x374   : > { %v10901_v32 = vadd.f32 %v8681_v19, %v10773_v1  ;;  %v7693_v47 = vpop.f32.mrf.mxu0  ;;  %4277 = vmatmul.mubr.bf16.gmra.mxu0 %v12806_v10  ;;  %4389 = vmatprep.mubr.bf16.mxu1 %v12792_v56  ;;  %v1354_v1 = vsel %vm1208_vm1, %v1351_v2, %v9695_v38 }
 0x375   : > { %v10906_v3 = vadd.f32 %v7692_v59, %v10832_v22  ;;  %v3355_v37 = vpop.f32.mrf.mxu1  ;;  %4284 = vmatprep.mubr.bf16.mxu0 %v10770_v49  ;;  %v10921_v19 = vpack.c.bf16 %v1354_v1, %v1352_v62 }
 0x376   : > { %v10910_v55 = vadd.f32 %v3355_v37, %v10758_v63  ;;  %v7694_v44 = vpop.f32.mrf.mxu0  ;;  %v9047_v63 = vld [vmem:[#allocation12 + $0x68] sm:$0xff]  }
 0x377   : > { %v7695_v28 = vadd.f32 %v7694_v44, %v7693_v47  ;;  %v8682_v57 = vpop.f32.mrf.mxu1  ;;  %v12807_v47 = vld [vmem:[#allocation58_spill] sm:$0xff]  ;;  %8123 = vmatprep.subr.bf16.mxu1 %v9047_v63 }
 0x378   : > { %v10916_v29 = vadd.f32 %v8682_v57, %v10780_v27  ;;  %v7696_v56 = vpop.f32.mrf.mxu0  ;;  %8124 = vmatpush3.bf16.msra.mxu1 %v9048_v9 }
 0x379   : > { %v10919_v22 = vadd.f32 %v7695_v28, %v10816_v36  ;;  %v3358_v59 = vpop.f32.mrf.mxu1  ;;  %v12808_v36 = vld [vmem:[#allocation76_spill] sm:$0xff] }
 0x37a   : > { %v10924_v37 = vadd.f32 %v3358_v59, %v10768_v7  ;;  %v7697_v21 = vpop.f32.mrf.mxu0 }
 0x37b   : > { %v7698_v49 = vadd.f32 %v7697_v21, %v7696_v56  ;;  %v8685_v2 = vpop.f32.mrf.mxu1  ;;  %4390 = vmatmul.mubr.bf16.gmra.mxu1 %v12807_v47 }
 0x37c   : > { %v10928_v27 = vadd.f32 %v8685_v2, %v10795_v48  ;;  %v7699_v44 = vpop.f32.mrf.mxu0  ;;  %4285 = vmatmul.mubr.bf16.gmra.mxu0 %v12808_v36  ;;  %4397 = vmatprep.mubr.bf16.mxu1 %v12796_v15  ;;  %v10944_v15 = vpack.c.bf16 %v10727_v0, %v10724_v30 }
 0x37d   : > { %v10933_v62 = vadd.f32 %v7698_v49, %v10827_v51  ;;  %v3371_v1 = vpop.f32.mrf.mxu1  ;;  %4292 = vmatprep.mubr.bf16.mxu0 %v10921_v19 }
 0x37e   : > { %v10937_v7 = vadd.f32 %v3371_v1, %v10783_v61  ;;  %v7700_v28 = vpop.f32.mrf.mxu0 }
 0x37f   : > { %v7701_v57 = vadd.f32 %v7700_v28, %v7699_v44  ;;  %v8686_v56 = vpop.f32.mrf.mxu1 }
 0x380   : > { %v10940_v48 = vadd.f32 %v8686_v56, %v10805_v34  ;;  %v7702_v59 = vpop.f32.mrf.mxu0 }
 0x381   : > { %v10947_v49 = vadd.f32 %v7701_v57, %v10844_v23  ;;  %v3374_v51 = vpop.f32.mrf.mxu1  ;;  %v9049_v57 = vld [vmem:[#allocation12 + $0x60] sm:$0xff]  }
 0x382   : > { %v10950_v63 = vadd.f32 %v3374_v51, %v10791_v18  ;;  %v7703_v61 = vpop.f32.mrf.mxu0  ;;  %8125 = vmatprep.subr.bf16.mxu1 %v9049_v57  ;;  %v12811_v57 = vld [vmem:[#allocation68_spill] sm:$0xff] }
 0x383   : > { %v7704_v9 = vadd.f32 %v7703_v61, %v7702_v59  ;;  %v7775_v21 = vpop.f32.mrf.mxu1  ;;  %4398 = vmatmul.mubr.bf16.gmra.mxu1 %v10476_v60 }
 0x384   : > { %v7705_v2 = vpop.f32.mrf.mxu0  ;;  %4293 = vmatmul.mubr.bf16.gmra.mxu0 %v10944_v15  ;;  %4405 = vmatprep.mubr.bf16.mxu1 %v12800_v16  ;;  %v9050_v16 = vld [vmem:[#allocation12 + $0x20] sm:$0xff]  }
 0x385   : > { %v10956_v30 = vadd.f32 %v7704_v9, %v10852_v50  ;;  %v7776_v0 = vpop.f32.mrf.mxu1  ;;  %8703 = vmatprep.mubr.bf16.mxu0 %v10437_v26  ;;  %8126 = vmatpush3.bf16.msra.mxu1 %v9050_v16 }
 0x386   : > { %v7777_v34 = vadd.f32 %v7776_v0, %v7775_v21  ;;  %v7706_v23 = vpop.f32.mrf.mxu0  ;;  %v12810_v21 = vld [vmem:[#allocation64_spill] sm:$0xff] }
 0x387   : > { %v7707_v18 = vadd.f32 %v7706_v23, %v7705_v2  ;;  %v7778_v47 = vpop.f32.mrf.mxu1 }
 0x388   : > { %v10960_v44 = vadd.f32 %v7777_v34, %v10811_v33  ;;  %v7708_v1 = vpop.f32.mrf.mxu0  ;;  %v12809_v33 = vld [vmem:[#allocation62_spill] sm:$0xff] }
 0x389   : > { %v10963_v60 = vadd.f32 %v7707_v18, %v10836_v24  ;;  %v7779_v28 = vpop.f32.mrf.mxu1 }
 0x38a   : > { %v7780_v56 = vadd.f32 %v7779_v28, %v7778_v47  ;;  %v7709_v50 = vpop.f32.mrf.mxu0 }
 0x38b   : > { %v7710_v59 = vadd.f32 %v7709_v50, %v7708_v1  ;;  %v7781_v51 = vpop.f32.mrf.mxu1  ;;  %4406 = vmatmul.mubr.bf16.gmra.mxu1 %v10510_v42  ;;  %v12812_v50 = vld [vmem:[#allocation67_spill] sm:$0xff] }
 0x38c   : > { %v10967_v26 = vadd.f32 %v7780_v56, %v10820_v53  ;;  %v7711_v61 = vpop.f32.mrf.mxu0  ;;  %8704 = vmatmul.mubr.bf16.vlgmr.msra.gmra.mxu0 %v12809_v33  ;;  %4413 = vmatprep.mubr.bf16.mxu1 %v12802_v40 }
 0x38d   : > { %v10972_v24 = vadd.f32 %v7710_v59, %v10847_v17  ;;  %v7782_v9 = vpop.f32.mrf.mxu1  ;;  %8707 = vmatprep.mubr.bf16.mxu0 %v12810_v21  ;;  %v12813_v59 = vld [vmem:[#allocation70_spill] sm:$0xff] }
 0x38e   : > { %v7783_v2 = vadd.f32 %v7782_v9, %v7781_v51  ;;  %v7712_v0 = vpop.f32.mrf.mxu0 }
 0x38f   : > { %v7713_v34 = vadd.f32 %v7712_v0, %v7711_v61  ;;  %v7784_v42 = vpop.f32.mrf.mxu1 }
 0x390   : > { %v10976_v23 = vadd.f32 %v7783_v2, %v10829_v6  ;;  %v7714_v53 = vpop.f32.mrf.mxu0 }
 0x391   : > { %v10979_v18 = vadd.f32 %v7713_v34, %v10864_v12  ;;  %v7785_v47 = vpop.f32.mrf.mxu1  ;;  %v9051_v34 = vld [vmem:[#allocation12 + $0x58] sm:$0xff]  }
 0x392   : > { %v7786_v40 = vadd.f32 %v7785_v47, %v7784_v42  ;;  %v7715_v1 = vpop.f32.mrf.mxu0  ;;  %8127 = vmatprep.subr.bf16.mxu1 %v9051_v34  ;;  %v12817_v34 = vld [vmem:[#allocation80_spill] sm:$0xff] }
 0x393   : > { %v7716_v17 = vadd.f32 %v7715_v1, %v7714_v53  ;;  %v7787_v28 = vpop.f32.mrf.mxu1  ;;  %4414 = vmatmul.mubr.bf16.gmra.mxu1 %v12811_v57 }
 0x394   : > { %v10983_v16 = vadd.f32 %v7786_v40, %v10840_v52  ;;  %v7717_v56 = vpop.f32.mrf.mxu0  ;;  %8708 = vmatmul.mubr.bf16.gmra.mxu0 %v12812_v50  ;;  %4421 = vmatprep.mubr.bf16.mxu1 %v12804_v31  ;;  %v9052_v31 = vld [vmem:[#allocation12 + $0x18] sm:$0xff]  }
 0x395   : > { %v10988_v6 = vadd.f32 %v7716_v17, %v10873_v25  ;;  %v7788_v12 = vpop.f32.mrf.mxu1  ;;  %8711 = vmatprep.mubr.bf16.mxu0 %v12813_v59  ;;  %v12814_v40 = vld [vmem:[#allocation71_spill] sm:$0xff]  ;;  %8128 = vmatpush3.bf16.msra.mxu1 %v9052_v31  ;;  %v12818_v31 = vld [vmem:[#allocation28_spill] sm:$0xff] }
 0x396   : > { %v7789_v51 = vadd.f32 %v7788_v12, %v7787_v28  ;;  %v7718_v61 = vpop.f32.mrf.mxu0  ;;  %v12815_v28 = vld [vmem:[#allocation78_spill] sm:$0xff] }
 0x397   : > { %v7719_v33 = vadd.f32 %v7718_v61, %v7717_v56  ;;  %v7790_v9 = vpop.f32.mrf.mxu1 }
 0x398   : > { %v10992_v21 = vadd.f32 %v7789_v51, %v10849_v4  ;;  %v7720_v52 = vpop.f32.mrf.mxu0 }
 0x399   : > { %v10995_v2 = vadd.f32 %v7719_v33, %v10856_v8  ;;  %v7791_v0 = vpop.f32.mrf.mxu1 }
 0x39a   : > { %v7792_v42 = vadd.f32 %v7791_v0, %v7790_v9  ;;  %v7721_v25 = vpop.f32.mrf.mxu0  ;;  %v12816_v9 = vld [vmem:[#allocation75_spill] sm:$0xff] }
 0x39b   : > { %v7722_v53 = vadd.f32 %v7721_v25, %v7720_v52  ;;  %v7793_v47 = vpop.f32.mrf.mxu1  ;;  %4422 = vmatmul.mubr.bf16.gmra.mxu1 %v12814_v40 }
 0x39c   : > { %v10999_v1 = vadd.f32 %v7792_v42, %v10860_v11  ;;  %v7723_v17 = vpop.f32.mrf.mxu0  ;;  %8712 = vmatmul.mubr.bf16.gmra.mxu0 %v10607_v46  ;;  %4429 = vmatprep.mubr.bf16.mxu1 %v12806_v10 }
 0x39d   : > { %v11004_v4 = vadd.f32 %v7722_v53, %v10867_v35  ;;  %v7794_v8 = vpop.f32.mrf.mxu1  ;;  %8715 = vmatprep.mubr.bf16.mxu0 %v12815_v28  ;;  %v9053_v28 = vld [vmem:[#allocation12 + $0x50] sm:$0xff]  }
 0x39e   : > { %v7795_v57 = vadd.f32 %v7794_v8, %v7793_v47  ;;  %v7724_v56 = vpop.f32.mrf.mxu0  ;;  %8129 = vmatprep.subr.bf16.mxu1 %v9053_v28 }
 0x39f   : > { %v7725_v50 = vadd.f32 %v7724_v56, %v7723_v17  ;;  %v7796_v12 = vpop.f32.mrf.mxu1 }
 0x3a0   : > { %v11008_v59 = vadd.f32 %v7795_v57, %v10870_v5  ;;  %v7726_v11 = vpop.f32.mrf.mxu0 }
 0x3a1   : > { %v11011_v51 = vadd.f32 %v7725_v50, %v10886_v14  ;;  %v7797_v46 = vpop.f32.mrf.mxu1 }
 0x3a2   : > { %v7798_v10 = vadd.f32 %v7797_v46, %v7796_v12  ;;  %v7727_v61 = vpop.f32.mrf.mxu0  ;;  %v12819_v12 = vld [vmem:[#allocation79_spill] sm:$0xff] }
 0x3a3   : > { %v7728_v35 = vadd.f32 %v7727_v61, %v7726_v11  ;;  %v7799_v33 = vpop.f32.mrf.mxu1  ;;  %4430 = vmatmul.mubr.bf16.gmra.mxu1 %v12816_v9 }
 0x3a4   : > { %v11015_v52 = vadd.f32 %v7798_v10, %v10882_v43  ;;  %v7729_v0 = vpop.f32.mrf.mxu0  ;;  %8716 = vmatmul.mubr.bf16.gmra.mxu0 %v12817_v34  ;;  %4437 = vmatprep.mubr.bf16.mxu1 %v12808_v36  ;;  %v9054_v36 = vld [vmem:[#allocation12 + $0x10] sm:$0xff]  }
 0x3a5   : > { %v11020_v5 = vadd.f32 %v7728_v35, %v10895_v41  ;;  %v7800_v14 = vpop.f32.mrf.mxu1  ;;  %8719 = vmatprep.mubr.bf16.mxu0 %v12818_v31  ;;  %8130 = vmatpush3.bf16.msra.mxu1 %v9054_v36 }
 0x3a6   : > { %v7801_v42 = vadd.f32 %v7800_v14, %v7799_v33  ;;  %v7730_v25 = vpop.f32.mrf.mxu0 }
 0x3a7   : > { %v7731_v53 = vadd.f32 %v7730_v25, %v7729_v0  ;;  %v7802_v47 = vpop.f32.mrf.mxu1  ;;  %v12821_v25 = vld [vmem:[#allocation31_spill] sm:$0xff] }
 0x3a8   : > { %v11024_v40 = vadd.f32 %v7801_v42, %v10892_v54  ;;  %v7732_v43 = vpop.f32.mrf.mxu0  ;;  %v12820_v54 = vld [vmem:[#allocation38_spill] sm:$0xff] }
 0x3a9   : > { %v11027_v17 = vadd.f32 %v7731_v53, %v10877_v45  ;;  %v7803_v8 = vpop.f32.mrf.mxu1 }
 0x3aa   : > { %v7804_v57 = vadd.f32 %v7803_v8, %v7802_v47  ;;  %v7733_v41 = vpop.f32.mrf.mxu0  ;;  %v12822_v47 = vmov 0.0|0.0  }
 0x3ab   : > { %v7734_v56 = vadd.f32 %v7733_v41, %v7732_v43  ;;  %v7805_v50 = vpop.f32.mrf.mxu1  ;;  %4438 = vmatmul.mubr.bf16.gmra.mxu1 %v12819_v12 }
 0x3ac   : > { %v11031_v11 = vadd.f32 %v7804_v57, %v10906_v3  ;;  %v7735_v46 = vpop.f32.mrf.mxu0  ;;  %8720 = vmatmul.mubr.bf16.gmra.mxu0 %v12820_v54  ;;  %4445 = vmatprep.mubr.bf16.mxu1 %v10944_v15 }
 0x3ad   : > { %v11036_v45 = vadd.f32 %v7734_v56, %v10889_v58  ;;  %v7806_v10 = vpop.f32.mrf.mxu1  ;;  %8723 = vmatprep.mubr.bf16.mxu0 %v10706_v39  ;;  %v9055_v56 = vld [vmem:[#allocation12 + $0x48] sm:$0xff]  }
 0x3ae   : > { %v7807_v61 = vadd.f32 %v7806_v10, %v7805_v50  ;;  %v7736_v35 = vpop.f32.mrf.mxu0  ;;  %v9056_v50 = vld [vmem:[#allocation12 + $0x8] sm:$0xff]   ;;  %8131 = vmatprep.subr.bf16.mxu1 %v9055_v56  ;;  %v9060_v56 = vld [vmem:[#allocation12 + $0xb0] sm:$0xff]  }
 0x3af   : > { %v7737_v33 = vadd.f32 %v7736_v35, %v7735_v46  ;;  %v7808_v9 = vpop.f32.mrf.mxu1  ;;  %v12823_v10 = vld [vmem:[#allocation25_spill] sm:$0xff]  ;;  %8132 = vmatpush3.bf16.msra.mxu1 %v9056_v50 }
 0x3b0   : > { %v11040_v0 = vadd.f32 %v7807_v61, %v10919_v22  ;;  %v7738_v3 = vpop.f32.mrf.mxu0 }
 0x3b1   : > { %v11043_v34 = vadd.f32 %v7737_v33, %v10910_v55  ;;  %v7809_v14 = vpop.f32.mrf.mxu1 }
 0x3b2   : > { %v7810_v15 = vadd.f32 %v7809_v14, %v7808_v9  ;;  %v7739_v31 = vpop.f32.mrf.mxu0 }
 0x3b3   : > { %v7740_v58 = vadd.f32 %v7739_v31, %v7738_v3  ;;  %v7811_v42 = vpop.f32.mrf.mxu1  ;;  %4446 = vmatmul.mubr.bf16.gmra.mxu1 %v12821_v25 }
 0x3b4   : > { %v11047_v39 = vadd.f32 %v7810_v15, %v10933_v62  ;;  %v7741_v53 = vpop.f32.mrf.mxu0  ;;  %8724 = vmatmul.mubr.bf16.gmra.mxu0 %v10729_v20  ;;  %4453 = vmatprep.mubr.bf16.mxu1 %v12822_v47 }
 0x3b5   : > { %v11052_v22 = vadd.f32 %v7740_v58, %v10924_v37  ;;  %v7812_v55 = vpop.f32.mrf.mxu1  ;;  %8727 = vmatprep.mubr.bf16.mxu0 %v10751_v13 }
 0x3b6   : > { %v7813_v43 = vadd.f32 %v7812_v55, %v7811_v42  ;;  %v7742_v8 = vpop.f32.mrf.mxu0  ;;  %v9057_v42 = vld [vmem:[#allocation12 + $0xf8] sm:$0xff]  }
 0x3b7   : > { %v7743_v28 = vadd.f32 %v7742_v8, %v7741_v53  ;;  %v7814_v36 = vpop.f32.mrf.mxu1  ;;  %v9058_v53 = vld [vmem:[#allocation12 + $0xb8] sm:$0xff]   ;;  %8231 = vmatprep.subr.bf16.mxu0 %v9057_v42  ;;  %v9065_v42 = vld [vmem:[#allocation12 + $0xe0] sm:$0xff]  }
 0x3b8   : > { %v11056_v57 = vadd.f32 %v7813_v43, %v10947_v49  ;;  %v7744_v62 = vpop.f32.mrf.mxu0  ;;  %v12824_v49 = vld [vmem:[#allocation33_spill] sm:$0xff]  ;;  %8232 = vmatpush3.bf16.msra.mxu0 %v9058_v53  ;;  %v9066_v53 = vld [vmem:[#allocation12 + $0xa0] sm:$0xff]  }
 0x3b9   : > { %v11059_v41 = vadd.f32 %v7743_v28, %v10901_v32  ;;  %v7815_v20 = vpop.f32.mrf.mxu1  ;;  %v12825_v28 = vld [vmem:[#allocation27_spill] sm:$0xff] }
 0x3ba   : > { %v7816_v12 = vadd.f32 %v7815_v20, %v7814_v36  ;;  %v7745_v37 = vpop.f32.mrf.mxu0 }
 0x3bb   : > { %v7746_v46 = vadd.f32 %v7745_v37, %v7744_v62  ;;  %v7817_v54 = vpop.f32.mrf.mxu1  ;;  %4454 = vmatmul.mubr.bf16.gmra.mxu1 %v12823_v10 }
 0x3bc   : > { %v11063_v13 = vadd.f32 %v7816_v12, %v10956_v30  ;;  %v7747_v61 = vpop.f32.mrf.mxu0  ;;  %8728 = vmatmul.mubr.bf16.gmra.mxu0 %v12824_v49  ;;  %5823 = vmatprep.mubr.bf16.mxu1 %v12822_v47  ;;  %v9063_v49 = vld [vmem:[#allocation12 + $0xe8] sm:$0xff]  }
 0x3bd   : > { %v11067_v32 = vadd.f32 %v7746_v46, %v10916_v29  ;;  %v7818_v35 = vpop.f32.mrf.mxu1  ;;  %8731 = vmatprep.mubr.bf16.mxu0 %v10921_v19 }
 0x3be   : > { %v7819_v33 = vadd.f32 %v7818_v35, %v7817_v54  ;;  %v7748_v9 = vpop.f32.mrf.mxu0 }
 0x3bf   : > { %v7749_v3 = vadd.f32 %v7748_v9, %v7747_v61  ;;  %v7820_v14 = vpop.f32.mrf.mxu1  ;;  %v9062_v61 = vld [vmem:[#allocation12] sm:$0xff]   ;;  %v9064_v9 = vld [vmem:[#allocation12 + $0xa8] sm:$0xff]  }
 0x3c0   : > { %v11072_v15 = vadd.f32 %v7819_v33, %v10963_v60  ;;  %v7750_v30 = vpop.f32.mrf.mxu0 }
 0x3c1   : > { %v11075_v31 = vadd.f32 %v7749_v3, %v10937_v7  ;;  %v7821_v58 = vpop.f32.mrf.mxu1  ;;  %v9059_v7 = vld [vmem:[#allocation12 + $0xf0] sm:$0xff]  }
 0x3c2   : > { %v7822_v29 = vadd.f32 %v7821_v58, %v7820_v14  ;;  %v7751_v25 = vpop.f32.mrf.mxu0  ;;  %8233 = vmatprep.subr.bf16.mxu0 %v9059_v7  ;;  %v9067_v7 = vld [vmem:[#allocation12 + $0xd8] sm:$0xff]  }
 0x3c3   : > { %v7752_v55 = vadd.f32 %v7751_v25, %v7750_v30  ;;  %v7823_v19 = vpop.f32.mrf.mxu1  ;;  %8234 = vmatpush3.bf16.msra.mxu0 %v9060_v56  ;;  %v9068_v56 = vld [vmem:[#allocation12 + $0x98] sm:$0xff]  }
 0x3c4   : > { %v11078_v43 = vadd.f32 %v7822_v29, %v10972_v24  ;;  %v7753_v8 = vpop.f32.mrf.mxu0  ;;  %8732 = vmatmul.mubr.bf16.gmra.mxu0 %v12825_v28  ;;  %8235 = vmatprep.subr.bf16.mxu0 %v9063_v49 }
 0x3c5   : > { %v11082_v60 = vadd.f32 %v7752_v55, %v10950_v63  ;;  %v7824_v36 = vpop.f32.mrf.mxu1  ;;  %v9061_v63 = vld [vmem:[#allocation12 + $0x40] sm:$0xff]  }
 0x3c6   : > { %v7825_v62 = vadd.f32 %v7824_v36, %v7823_v19  ;;  %v7754_v20 = vpop.f32.mrf.mxu0  ;;  %8133 = vmatprep.subr.bf16.mxu1 %v9061_v63 }
 0x3c7   : > { %v7755_v50 = vadd.f32 %v7754_v20, %v7753_v8  ;;  %v7826_v12 = vpop.f32.mrf.mxu1  ;;  %8134 = vmatpush3.bf16.msra.mxu1 %v9062_v61  ;;  %8236 = vmatpush3.bf16.msra.mxu0 %v9064_v9 }
 0x3c8   : > { %v11085_v37 = vadd.f32 %v7825_v62, %v10979_v18  ;;  %v7756_v24 = vpop.f32.mrf.mxu0  ;;  %8237 = vmatprep.subr.bf16.mxu0 %v9065_v42 }
 0x3c9   : > { %v11088_v46 = vadd.f32 %v7755_v50, %v10928_v27  ;;  %v7827_v54 = vpop.f32.mrf.mxu1 }
 0x3ca   : > { %v7828_v35 = vadd.f32 %v7827_v54, %v7826_v12  ;;  %v7757_v33 = vpop.f32.mrf.mxu0  ;;  %5824 = vmatmul.mubr.bf16.vlgmr.msra.gmra.mxu1 %v12823_v10 }
 0x3cb   : > { %v7758_v3 = vadd.f32 %v7757_v33, %v7756_v24  ;;  %v7829_v14 = vpop.f32.mrf.mxu1  ;;  %8238 = vmatpush3.bf16.msra.mxu0 %v9066_v53 }
 0x3cc   : > { %v11091_v30 = vadd.f32 %v7828_v35, %v10988_v6  ;;  %v7887_v18 = vpop.f32.mrf.mxu0  ;;  %8239 = vmatprep.subr.bf16.mxu0 %v9067_v7  ;;  %v9070_v35 = vld [vmem:[#allocation12 + $0x90] sm:$0xff]  }
 0x3cd   : > { %v11094_v27 = vadd.f32 %v7758_v3, %v10940_v48  ;;  %v7830_v58 = vpop.f32.mrf.mxu1 }
 0x3ce   : > { %v7831_v29 = vadd.f32 %v7830_v58, %v7829_v14  ;;  %v7888_v25 = vpop.f32.mrf.mxu0 }
 0x3cf   : > { %v7889_v55 = vadd.f32 %v7888_v25, %v7887_v18  ;;  %v7832_v19 = vpop.f32.mrf.mxu1  ;;  %8240 = vmatpush3.bf16.msra.mxu0 %v9068_v56 }
 0x3d0   : > { %v11098_v8 = vadd.f32 %v7831_v29, %v10995_v2  ;;  %v7890_v6 = vpop.f32.mrf.mxu0  ;;  %v9074_v29 = vld [vmem:[#allocation12 + $0x88] sm:$0xff]  }
 0x3d1   : > { %v11101_v36 = vadd.f32 %v7889_v55, %v10960_v44  ;;  %v7833_v48 = vpop.f32.mrf.mxu1  ;;  %v9069_v44 = vld [vmem:[#allocation12 + $0xd0] sm:$0xff]  }
 0x3d2   : > { %v7834_v62 = vadd.f32 %v7833_v48, %v7832_v19  ;;  %v7891_v20 = vpop.f32.mrf.mxu0  ;;  %8241 = vmatprep.subr.bf16.mxu0 %v9069_v44 }
 0x3d3   : > { %v7892_v50 = vadd.f32 %v7891_v20, %v7890_v6  ;;  %v7835_v12 = vpop.f32.mrf.mxu1  ;;  %8242 = vmatpush3.bf16.msra.mxu0 %v9070_v35 }
 0x3d4   : > { %v11104_v24 = vadd.f32 %v7834_v62, %v11004_v4  ;;  %v7893_v54 = vpop.f32.mrf.mxu0  ;;  %v9076_v62 = vld [vmem:[#allocation12 + $0x80] sm:$0xff]  }
 0x3d5   : > { %v11107_v2 = vadd.f32 %v7892_v50, %v10967_v26  ;;  %v7836_v63 = vpop.f32.mrf.mxu1  ;;  %v9073_v26 = vld [vmem:[#allocation12 + $0xc8] sm:$0xff]  }
 0x3d6   : > { %v7837_v61 = vadd.f32 %v7836_v63, %v7835_v12  ;;  %v7894_v49 = vpop.f32.mrf.mxu0  ;;  %8243 = vmatprep.subr.bf16.mxu0 %v9073_v26 }
 0x3d7   : > { %v7895_v33 = vadd.f32 %v7894_v49, %v7893_v54  ;;  %v7838_v9 = vpop.f32.mrf.mxu1  ;;  %8244 = vmatpush3.bf16.msra.mxu0 %v9074_v29  ;;  %v9071_v54 = vld [vmem:[#allocation12 + $0x178] sm:$0xff]  }
 0x3d8   : > { %v11110_v3 = vadd.f32 %v7837_v61, %v11011_v51  ;;  %v7896_v14 = vpop.f32.mrf.mxu0  ;;  %8343 = vmatprep.subr.bf16.mxu1 %v9071_v54  ;;  %v9077_v54 = vld [vmem:[#allocation12 + $0x170] sm:$0xff]  }
 0x3d9   : > { %v11113_v4 = vadd.f32 %v7895_v33, %v10976_v23  ;;  %v7839_v18 = vpop.f32.mrf.mxu1  ;;  %v9075_v23 = vld [vmem:[#allocation12 + $0xc0] sm:$0xff]  }
 0x3da   : > { %v7840_v58 = vadd.f32 %v7839_v18, %v7838_v9  ;;  %v7897_v42 = vpop.f32.mrf.mxu0  ;;  %8245 = vmatprep.subr.bf16.mxu0 %v9075_v23 }
 0x3db   : > { %v7898_v25 = vadd.f32 %v7897_v42, %v7896_v14  ;;  %v7841_v53 = vpop.f32.mrf.mxu1  ;;  %8246 = vmatpush3.bf16.msra.mxu0 %v9076_v62 }
 0x3dc   : > { %v11116_v55 = vadd.f32 %v7840_v58, %v11020_v5  ;;  %v7899_v19 = vpop.f32.mrf.mxu0 }
 0x3dd   : > { %v11119_v51 = vadd.f32 %v7898_v25, %v10983_v16  ;;  %v7842_v6 = vpop.f32.mrf.mxu1  ;;  %v9072_v16 = vld [vmem:[#allocation12 + $0x138] sm:$0xff]  }
 0x3de   : > { %v7843_v48 = vadd.f32 %v7842_v6, %v7841_v53  ;;  %v7900_v7 = vpop.f32.mrf.mxu0  ;;  %8344 = vmatpush3.bf16.msra.mxu1 %v9072_v16 }
 0x3df   : > { %v7901_v20 = vadd.f32 %v7900_v7, %v7899_v19  ;;  %v7844_v56 = vpop.f32.mrf.mxu1  ;;  %8345 = vmatprep.subr.bf16.mxu1 %v9077_v54 }
 0x3e0   : > { %v11122_v50 = vadd.f32 %v7843_v48, %v11027_v17  ;;  %v7902_v12 = vpop.f32.mrf.mxu0 }
 0x3e1   : > { %v11125_v5 = vadd.f32 %v7901_v20, %v10992_v21  ;;  %v7845_v63 = vpop.f32.mrf.mxu1 }
 0x3e2   : > { %v7846_v44 = vadd.f32 %v7845_v63, %v7844_v56  ;;  %v7903_v61 = vpop.f32.mrf.mxu0 }
 0x3e3   : > { %v7904_v49 = vadd.f32 %v7903_v61, %v7902_v12  ;;  %v7847_v35 = vpop.f32.mrf.mxu1 }
 0x3e4   : > { %v11128_v33 = vadd.f32 %v7846_v44, %v11036_v45  ;;  %v7905_v9 = vpop.f32.mrf.mxu0 }
 0x3e5   : > { %v11131_v17 = vadd.f32 %v7904_v49, %v10999_v1  ;;  %v7848_v14 = vpop.f32.mrf.mxu1 }
 0x3e6   : > { %v7849_v18 = vadd.f32 %v7848_v14, %v7847_v35  ;;  %v7906_v21 = vpop.f32.mrf.mxu0 }
 0x3e7   : > { %v7907_v26 = vadd.f32 %v7906_v21, %v7905_v9  ;;  %v7850_v58 = vpop.f32.mrf.mxu1 }
 0x3e8   : > { %v11134_v42 = vadd.f32 %v7849_v18, %v11043_v34  ;;  %v7908_v29 = vpop.f32.mrf.mxu0 }
 0x3e9   : > { %v11137_v25 = vadd.f32 %v7907_v26, %v11008_v59  ;;  %v7851_v53 = vpop.f32.mrf.mxu1 }
 0x3ea   : > { %v7852_v19 = vadd.f32 %v7851_v53, %v7850_v58  ;;  %v7909_v45 = vpop.f32.mrf.mxu0 }
 0x3eb   : > { %v7910_v6 = vadd.f32 %v7909_v45, %v7908_v29  ;;  %v7853_v23 = vpop.f32.mrf.mxu1 }
 0x3ec   : > { %v11140_v1 = vadd.f32 %v7852_v19, %v11052_v22  ;;  %v7911_v48 = vpop.f32.mrf.mxu0  ;;  %v9078_v22 = vld [vmem:[#allocation12 + $0x130] sm:$0xff]  }
 0x3ed   : > { %v11143_v7 = vadd.f32 %v7910_v6, %v11015_v52  ;;  %v7854_v62 = vpop.f32.mrf.mxu1  ;;  %8346 = vmatpush3.bf16.msra.mxu1 %v9078_v22 }
 0x3ee   : > { %v7855_v20 = vadd.f32 %v7854_v62, %v7853_v23  ;;  %v7912_v34 = vpop.f32.mrf.mxu0 }
 0x3ef   : > { %v7913_v56 = vadd.f32 %v7912_v34, %v7911_v48  ;;  %v7856_v12 = vpop.f32.mrf.mxu1 }
 0x3f0   : > { %v11146_v59 = vadd.f32 %v7855_v20, %v11059_v41  ;;  %v7914_v63 = vpop.f32.mrf.mxu0 }
 0x3f1   : > { %v11149_v16 = vadd.f32 %v7913_v56, %v11024_v40  ;;  %v7857_v44 = vpop.f32.mrf.mxu1 }
 0x3f2   : > { %v7858_v61 = vadd.f32 %v7857_v44, %v7856_v12  ;;  %v7915_v49 = vpop.f32.mrf.mxu0 }
 0x3f3   : > { %v7916_v52 = vadd.f32 %v7915_v49, %v7914_v63  ;;  %v7859_v35 = vpop.f32.mrf.mxu1  ;;  %v9079_v63 = vld [vmem:[#allocation12 + $0x168] sm:$0xff]  }
 0x3f4   : > { %v11152_v9 = vadd.f32 %v7858_v61, %v11067_v32  ;;  %v7917_v14 = vpop.f32.mrf.mxu0  ;;  %8347 = vmatprep.subr.bf16.mxu1 %v9079_v63 }
 0x3f5   : > { %v11155_v18 = vadd.f32 %v7916_v52, %v11031_v11  ;;  %v7860_v41 = vpop.f32.mrf.mxu1 }
 0x3f6   : > { %v7861_v21 = vadd.f32 %v7860_v41, %v7859_v35  ;;  %v7918_v26 = vpop.f32.mrf.mxu0 }
 0x3f7   : > { %v7919_v40 = vadd.f32 %v7918_v26, %v7917_v14  ;;  %v7862_v58 = vpop.f32.mrf.mxu1 }
 0x3f8   : > { %v11158_v29 = vadd.f32 %v7861_v21, %v11075_v31  ;;  %v7920_v53 = vpop.f32.mrf.mxu0 }
 0x3f9   : > { %v11161_v19 = vadd.f32 %v7919_v40, %v11040_v0  ;;  %v7863_v45 = vpop.f32.mrf.mxu1 }
 0x3fa   : > { %v7864_v6 = vadd.f32 %v7863_v45, %v7862_v58  ;;  %v7921_v32 = vpop.f32.mrf.mxu0 }
 0x3fb   : > { %v7922_v23 = vadd.f32 %v7921_v32, %v7920_v53  ;;  %v7865_v48 = vpop.f32.mrf.mxu1 }
 0x3fc   : > { %v11164_v11 = vadd.f32 %v7864_v6, %v11082_v60  ;;  %v7923_v62 = vpop.f32.mrf.mxu0  ;;  %v9080_v60 = vld [vmem:[#allocation12 + $0x128] sm:$0xff]  }
 0x3fd   : > { %v11167_v20 = vadd.f32 %v7922_v23, %v11047_v39  ;;  %v7866_v34 = vpop.f32.mrf.mxu1  ;;  %8348 = vmatpush3.bf16.msra.mxu1 %v9080_v60  ;;  %v9083_v60 = vld [vmem:[#allocation12 + $0x1f8] sm:$0xff]  }
 0x3fe   : > { %v7867_v56 = vadd.f32 %v7866_v34, %v7865_v48  ;;  %v7924_v31 = vpop.f32.mrf.mxu0  ;;  %8455 = vmatprep.subr.bf16.mxu0 %v9083_v60 }
 0x3ff   : > { %v7925_v12 = vadd.f32 %v7924_v31, %v7923_v62  ;;  %v7868_v54 = vpop.f32.mrf.mxu1  ;;  %v9081_v31 = vld [vmem:[#allocation12 + $0x160] sm:$0xff]  }
 0x400   : > { %v11170_v0 = vadd.f32 %v7867_v56, %v11088_v46  ;;  %v7926_v44 = vpop.f32.mrf.mxu0  ;;  %8349 = vmatprep.subr.bf16.mxu1 %v9081_v31 }
 0x401   : > { %v11173_v22 = vadd.f32 %v7925_v12, %v11056_v57  ;;  %v7869_v61 = vpop.f32.mrf.mxu1 }
 0x402   : > { %v7870_v49 = vadd.f32 %v7869_v61, %v7868_v54  ;;  %v7927_v52 = vpop.f32.mrf.mxu0 }
 0x403   : > { %12826 = vst [vmem:[#allocation29_spill] sm:$0xff] %v11173_v22  ;;  %v7928_v39 = vadd.f32 %v7927_v52, %v7926_v44  ;;  %v11175_v35 = vpop.f32.mrf.mxu1  ;;  %v9097_v22 = vld [vmem:[#allocation12 + $0x140] sm:$0xff]  }
 0x404   : > { %v11178_v14 = vadd.f32 %v7870_v49, %v11094_v27  ;;  %v7929_v41 = vpop.f32.mrf.mxu0  ;;  %v9085_v49 = vld [vmem:[#allocation12 + $0x158] sm:$0xff]  }
 0x405   : > { %v11181_v46 = vadd.f32 %v7928_v39, %v11063_v13  ;;  %v11183_v21 = vpop.f32.mrf.mxu1 }
 0x406   : > { %v7930_v57 = vpop.f32.mrf.mxu0 }
 0x407   : > { %12827 = vst [vmem:[#allocation35_spill] sm:$0xff] %v11181_v46  ;;  %v7931_v26 = vadd.f32 %v7930_v57, %v7929_v41  ;;  %v11185_v40 = vpop.f32.mrf.mxu1 }
 0x408   : > { %v7932_v58 = vpop.f32.mrf.mxu0 }
 0x409   : > { %v11188_v53 = vadd.f32 %v7931_v26, %v11072_v15  ;;  %v11190_v45 = vpop.f32.mrf.mxu1  ;;  %v9082_v15 = vld [vmem:[#allocation12 + $0x120] sm:$0xff]  }
 0x40a   : > { %v7933_v6 = vpop.f32.mrf.mxu0  ;;  %8350 = vmatpush3.bf16.msra.mxu1 %v9082_v15 }
 0x40b   : > { %v7934_v32 = vadd.f32 %v7933_v6, %v7932_v58  ;;  %v11192_v27 = vpop.f32.mrf.mxu1  ;;  %8351 = vmatprep.subr.bf16.mxu1 %v9085_v49  ;;  %v9086_v6 = vld [vmem:[#allocation12 + $0x118] sm:$0xff]  }
 0x40c   : > { %v7935_v23 = vpop.f32.mrf.mxu0 }
 0x40d   : > { %v11195_v13 = vadd.f32 %v7934_v32, %v11078_v43  ;;  %v11197_v48 = vpop.f32.mrf.mxu1 }
 0x40e   : > { %v7936_v62 = vpop.f32.mrf.mxu0  ;;  %8352 = vmatpush3.bf16.msra.mxu1 %v9086_v6  ;;  %v9089_v6 = vld [vmem:[#allocation12 + $0x150] sm:$0xff]  }
 0x40f   : > { %12828 = vst [vmem:[#allocation37_spill] sm:$0xff] %v11195_v13  ;;  %v7937_v34 = vadd.f32 %v7936_v62, %v7935_v23  ;;  %v11199_v56 = vpop.f32.mrf.mxu1  ;;  %8353 = vmatprep.subr.bf16.mxu1 %v9089_v6 }
 0x410   : > { %v7938_v12 = vpop.f32.mrf.mxu0 }
 0x411   : > { %v11202_v54 = vadd.f32 %v7937_v34, %v11085_v37  ;;  %v11204_v63 = vpop.f32.mrf.mxu1 }
 0x412   : > { %v7939_v44 = vpop.f32.mrf.mxu0 }
 0x413   : > { %12829 = vst [vmem:[#allocation32_spill] sm:$0xff] %v11202_v54  ;;  %v7940_v61 = vadd.f32 %v7939_v44, %v7938_v12  ;;  %v11206_v43 = vpop.f32.mrf.mxu1 }
 0x414   : > { %v7941_v52 = vpop.f32.mrf.mxu0 }
 0x415   : > { %v11209_v39 = vadd.f32 %v7940_v61, %v11091_v30  ;;  %v11211_v41 = vpop.f32.mrf.mxu1 }
 0x416   : > { %v7942_v37 = vpop.f32.mrf.mxu0 }
 0x417   : > { %12830 = vst [vmem:[#allocation40_spill] sm:$0xff] %v11209_v39  ;;  %v7943_v57 = vadd.f32 %v7942_v37, %v7941_v52  ;;  %v11213_v26 = vpop.f32.mrf.mxu1 }
 0x418   : > { %v7944_v58 = vpop.f32.mrf.mxu0 }
 0x419   : > { %v11216_v32 = vadd.f32 %v7943_v57, %v11098_v8  ;;  %v11218_v23 = vpop.f32.mrf.mxu1 }
 0x41a   : > { %v7945_v62 = vpop.f32.mrf.mxu0 }
 0x41b   : > { %12831 = vst [vmem:[#allocation42_spill] sm:$0xff] %v11216_v32  ;;  %v7946_v34 = vadd.f32 %v7945_v62, %v7944_v58  ;;  %v11220_v30 = vpop.f32.mrf.mxu1 }
 0x41c   : > { %v7947_v31 = vpop.f32.mrf.mxu0 }
 0x41d   : > { %v11223_v12 = vadd.f32 %v7946_v34, %v11104_v24  ;;  %v11225_v15 = vpop.f32.mrf.mxu1 }
 0x41e   : > { %v7948_v44 = vpop.f32.mrf.mxu0 }
 0x41f   : > { %12832 = vst [vmem:[#allocation36_spill] sm:$0xff] %v11223_v12  ;;  %v7949_v61 = vadd.f32 %v7948_v44, %v7947_v31  ;;  %v11227_v60 = vpop.f32.mrf.mxu1 }
 0x420   : > { %v7950_v49 = vpop.f32.mrf.mxu0 }
 0x421   : > { %v11230_v8 = vadd.f32 %v7949_v61, %v11110_v3  ;;  %v11232_v52 = vpop.f32.mrf.mxu1  ;;  %v9090_v61 = vld [vmem:[#allocation12 + $0x110] sm:$0xff]  }
 0x422   : > { %v7951_v37 = vpop.f32.mrf.mxu0  ;;  %8354 = vmatpush3.bf16.msra.mxu1 %v9090_v61 }
 0x423   : > { %12833 = vst [vmem:[#allocation44_spill] sm:$0xff] %v11230_v8  ;;  %v7952_v57 = vadd.f32 %v7951_v37, %v7950_v49  ;;  %v11234_v58 = vpop.f32.mrf.mxu1 }
 0x424   : > { %v7953_v62 = vpop.f32.mrf.mxu0 }
 0x425   : > { %v11237_v24 = vadd.f32 %v7952_v57, %v11116_v55  ;;  %v11239_v34 = vpop.f32.mrf.mxu1 }
 0x426   : > { %v7954_v31 = vpop.f32.mrf.mxu0 }
 0x427   : > { %12834 = vst [vmem:[#allocation46_spill] sm:$0xff] %v11237_v24  ;;  %v7955_v44 = vadd.f32 %v7954_v31, %v7953_v62  ;;  %v11241_v10 = vpop.f32.mrf.mxu1 }
 0x428   : > { %v7956_v3 = vpop.f32.mrf.mxu0 }
 0x429   : > { %v11244_v47 = vadd.f32 %v7955_v44, %v11122_v50  ;;  %v11246_v49 = vpop.f32.mrf.mxu1 }
 0x42a   : > { %v7957_v37 = vpop.f32.mrf.mxu0 }
 0x42b   : > { %12835 = vst [vmem:[#allocation41_spill] sm:$0xff] %v11244_v47  ;;  %v7958_v28 = vadd.f32 %v7957_v37, %v7956_v3  ;;  %v11248_v38 = vpop.f32.mrf.mxu1  ;;  %v9093_v47 = vld [vmem:[#allocation12 + $0x148] sm:$0xff]  }
 0x42c   : > { %v7959_v55 = vpop.f32.mrf.mxu0  ;;  %8355 = vmatprep.subr.bf16.mxu1 %v9093_v47 }
 0x42d   : > { %v11251_v57 = vadd.f32 %v7958_v28, %v11128_v33  ;;  %v11253_v6 = vpop.f32.mrf.mxu1 }
 0x42e   : > { %v7960_v62 = vpop.f32.mrf.mxu0 }
 0x42f   : > { %12836 = vst [vmem:[#allocation48_spill] sm:$0xff] %v11251_v57  ;;  %v7961_v31 = vadd.f32 %v7960_v62, %v7959_v55  ;;  %v11255_v24 = vpop.f32.mrf.mxu1 }
 0x430   : > { %v7962_v8 = vpop.f32.mrf.mxu0 }
 0x431   : > { %v11258_v50 = vadd.f32 %v7961_v31, %v11134_v42  ;;  %v11260_v44 = vpop.f32.mrf.mxu1  ;;  %v9094_v31 = vld [vmem:[#allocation12 + $0x108] sm:$0xff]  }
 0x432   : > { %v7963_v61 = vpop.f32.mrf.mxu0  ;;  %8356 = vmatpush3.bf16.msra.mxu1 %v9094_v31 }
 0x433   : > { %12837 = vst [vmem:[#allocation50_spill] sm:$0xff] %v11258_v50  ;;  %v7964_v3 = vadd.f32 %v7963_v61, %v7962_v8  ;;  %v11262_v37 = vpop.f32.mrf.mxu1  ;;  %8357 = vmatprep.subr.bf16.mxu1 %v9097_v22  ;;  %v8016_v22 = vadd.f32 %v11218_v23, %v11213_v26  ;;  %v8028_v26 = vadd.f32 %v11246_v49, %v11241_v10 }
 0x434   : > { %v7965_v12 = vpop.f32.mrf.mxu0  ;;  %v8031_v23 = vadd.f32 %v11253_v6, %v11248_v38  ;;  %v8034_v38 = vadd.f32 %v11260_v44, %v11255_v24 }
 0x435   : > { %v11265_v28 = vadd.f32 %v7964_v3, %v11140_v1  ;;  %v11267_v33 = vpop.f32.mrf.mxu1  ;;  %v11320_v10 = vadd.f32 %v8016_v22, %v11131_v17 }
 0x436   : > { %v7966_v55 = vpop.f32.mrf.mxu0 }
 0x437   : > { %12838 = vst [vmem:[#allocation45_spill] sm:$0xff] %v11265_v28  ;;  %v7967_v62 = vadd.f32 %v7966_v55, %v7965_v12  ;;  %v11269_v57 = vpop.f32.mrf.mxu1 }
 0x438   : > { %v7968_v42 = vpop.f32.mrf.mxu0 }
 0x439   : > { %v11272_v50 = vadd.f32 %v7967_v62, %v11146_v59  ;;  %v8039_v8 = vpop.f32.mrf.mxu1 }
 0x43a   : > { %v7969_v61 = vpop.f32.mrf.mxu0 }
 0x43b   : > { %12839 = vst [vmem:[#allocation52_spill] sm:$0xff] %v11272_v50  ;;  %v7970_v39 = vadd.f32 %v7969_v61, %v7968_v42  ;;  %v8041_v54 = vpop.f32.mrf.mxu1 }
 0x43c   : > { %v7971_v32 = vpop.f32.mrf.mxu0 }
 0x43d   : > { %v11275_v1 = vadd.f32 %v7970_v39, %v11152_v9  ;;  %v8042_v3 = vpop.f32.mrf.mxu1  ;;  %v8001_v9 = vadd.f32 %v11183_v21, %v11175_v35  ;;  %v8004_v39 = vadd.f32 %v11190_v45, %v11185_v40  ;;  %v8019_v35 = vadd.f32 %v11225_v15, %v11220_v30  ;;  %v9098_v40 = vld [vmem:[#allocation12 + $0x100] sm:$0xff]  }
 0x43e   : > { %v7972_v47 = vpop.f32.mrf.mxu0  ;;  %v8022_v45 = vadd.f32 %v11232_v52, %v11227_v60  ;;  %8358 = vmatpush3.bf16.msra.mxu1 %v9098_v40  ;;  %v11314_v52 = vld [vmem:[%s12595_s5] ss:$0 sm:$0xff] }
 0x43f   : > { %v7973_v28 = vadd.f32 %v7972_v47, %v7971_v32  ;;  %v8044_v12 = vpop.f32.mrf.mxu1 }
 0x440   : > { %v7974_v55 = vpop.f32.mrf.mxu0  ;;  %v4363_v6 = vadd.f32 %v8022_v45, %v11143_v7  ;;  %v11341_v7 = vadd.f32 %v8031_v23, %v11161_v19  ;;  %v12844_v45 = vld [vmem:[#allocation32_spill] sm:$0xff] }
 0x441   : > { %v11278_v13 = vadd.f32 %v7973_v28, %v11158_v29  ;;  %v8045_v46 = vpop.f32.mrf.mxu1  ;;  %v8007_v29 = vadd.f32 %v11197_v48, %v11192_v27 }
 0x442   : > { %v7975_v59 = vpop.f32.mrf.mxu0 }
 0x443   : > { %v7976_v62 = vadd.f32 %v7975_v59, %v7974_v55  ;;  %v8047_v50 = vpop.f32.mrf.mxu1  ;;  %v8010_v55 = vadd.f32 %v11204_v63, %v11199_v56  ;;  %v8025_v56 = vadd.f32 %v11239_v34, %v11234_v58  ;;  %v8043_v59 = vadd.f32 %v8042_v3, %v8041_v54 }
 0x444   : > { %v7977_v31 = vpop.f32.mrf.mxu0  ;;  %v8046_v54 = vadd.f32 %v8045_v46, %v8044_v12 }
 0x445   : > { %v11281_v42 = vadd.f32 %v7976_v62, %v11164_v11  ;;  %v8048_v61 = vpop.f32.mrf.mxu1  ;;  %v8013_v11 = vadd.f32 %v11211_v41, %v11206_v43  ;;  %v4336_v43 = vadd.f32 %v8001_v9, %v11101_v36  ;;  %v4339_v41 = vadd.f32 %v8004_v39, %v11107_v2 }
 0x446   : > { %v7978_v32 = vpop.f32.mrf.mxu0  ;;  %v4347_v36 = vadd.f32 %v8010_v55, %v11119_v51  ;;  %v4360_v2 = vadd.f32 %v8019_v35, %v11137_v25  ;;  %v8037_v51 = vadd.f32 %v11267_v33, %v11262_v37  ;;  %v8040_v25 = vadd.f32 %v8039_v8, %v11269_v57  ;;  %v12842_v35 = vld [vmem:[#allocation37_spill] sm:$0xff] }
 0x447   : > { %v7979_v28 = vadd.f32 %v7978_v32, %v7977_v31  ;;  %v8050_v47 = vpop.f32.mrf.mxu1  ;;  %v4352_v58 = vadd.f32 %v8013_v11, %v11125_v5  ;;  %v11334_v5 = vld [vmem:[%s12596_s6] ss:$0 sm:$0xff]  ;;  %v11337_v24 = vadd.f32 %v8025_v56, %v11149_v16  ;;  %v11344_v37 = vadd.f32 %v8028_v26, %v11155_v18  ;;  %v12840_v18 = vld [vmem:[#allocation29_spill] sm:$0xff] }
 0x448   : > { %v7980_v21 = vpop.f32.mrf.mxu0  ;;  %v8049_v57 = vadd.f32 %v8048_v61, %v8047_v50  ;;  %v11349_v32 = vadd.f32 %v8034_v38, %v11167_v20  ;;  %v11355_v46 = vadd.f32 %v8037_v51, %v12840_v18  ;;  %v12841_v50 = vld [vmem:[#allocation35_spill] sm:$0xff]  ;;  %v12845_v56 = vld [vmem:[#allocation40_spill] sm:$0xff] }
 0x449   : > { %v11300_v27 = vadd.f32 %v7979_v28, %v11170_v0  ;;  %v8051_v48 = vpop.f32.mrf.mxu1  ;;  %v4344_v0 = vadd.f32 %v8007_v29, %v11113_v4  ;;  %v11352_v28 = vadd.f32 %v8043_v59, %v11188_v53  ;;  %v11358_v12 = vadd.f32 %v8040_v25, %v12841_v50  ;;  %v12843_v53 = vld [vmem:[#allocation42_spill] sm:$0xff] }
 0x44a   : > { %v7981_v63 = vpop.f32.mrf.mxu0  ;;  %v8052_v33 = vadd.f32 %v8051_v48, %v8050_v47  ;;  %v11371_v48 = vadd.f32 %v8049_v57, %v12844_v45 }
 0x44b   : > { %v7982_v30 = vadd.f32 %v7981_v63, %v7980_v21  ;;  %v8053_v15 = vpop.f32.mrf.mxu1  ;;  %v11365_v21 = vadd.f32 %v8046_v54, %v12842_v35 }
 0x44c   : > { %v8705_v60 = vpop.f32.mrf.mxu0  ;;  %v11374_v63 = vadd.f32 %v8052_v33, %v12845_v56  ;;  %v12848_v33 = vld [vmem:[#allocation44_spill] sm:$0xff] }
 0x44d   : > { %v11325_v4 = vadd.f32 %v7982_v30, %v11178_v14  ;;  %v4505_v34 = vadd.f32 %v8705_v60, %v4344_v0  ;;  %v8054_v49 = vpop.f32.mrf.mxu1 }
 0x44e   : > { %v4496_v17 = vpop.f32.mrf.mxu0  ;;  %v8055_v8 = vadd.f32 %v8054_v49, %v8053_v15  ;;  %v12846_v15 = vld [vmem:[#allocation36_spill] sm:$0xff] }
 0x44f   : > { %v4632_v14 = vmul.f32 %v11314_v52, %v4505_v34  ;;  %v4497_v44 = vadd.f32 %v4496_v17, %v4336_v43  ;;  %v8056_v62 = vpop.f32.mrf.mxu1  ;;  %v11376_v43 = vld [vmem:[#allocation12 + $0x238] sm:$0xff]  }
 0x450   : > { %v8706_v3 = vpop.f32.mrf.mxu0  ;;  %v11368_v40 = vadd.f32 %v8055_v8, %v12843_v53  ;;  %8735 = vmatprep.subr.bf16.mxu1 %v11376_v43 }
 0x451   : > { %v4671_v31 = vadd.f32 %v11334_v5, %v4632_v14  ;;  %v4630_v16 = vmul.f32 %v11314_v52, %v4497_v44  ;;  %v4508_v9 = vadd.f32 %v8706_v3, %v4347_v36  ;;  %v8057_v39 = vpop.f32.mrf.mxu1 }
 0x452   : > { %v8058_v29 = vadd.f32 %v8057_v39, %v8056_v62  ;;  %v4499_v19 = vpop.f32.mrf.mxu0 }
 0x453   : > { %v11360_v61 = vmax.f32 %v4671_v31, 0.0  ;;  %v4669_v47 = vadd.f32 %v11334_v5, %v4630_v16  ;;  %v4633_v55 = vmul.f32 %v11314_v52, %v4508_v9  ;;  %v4500_v11 = vadd.f32 %v4499_v19, %v4339_v41  ;;  %v8059_v20 = vpop.f32.mrf.mxu1 }
 0x454   : > { %v8709_v22 = vpop.f32.mrf.mxu0  ;;  %v11383_v0 = vadd.f32 %v8058_v29, %v12846_v15 }
 0x455   : > { %v11378_v26 = vmax.f32 %v4669_v47, 0.0  ;;  %v4672_v41 = vadd.f32 %v11334_v5, %v4633_v55  ;;  %v4631_v23 = vmul.f32 %v11314_v52, %v4500_v11  ;;  %v8060_v30 = vpop.f32.mrf.mxu1  ;;  %v5055_v60 = vrot.slane %v11360_v61, 1 }
 0x456   : > { %v4521_v36 = vadd.f32 %v8709_v22, %v4360_v2  ;;  %v8061_v38 = vadd.f32 %v8060_v30, %v8059_v20  ;;  %v4512_v34 = vpop.f32.mrf.mxu0  ;;  %v4896_v49 = vrot.slane %v11360_v61, 7  ;;  %v12847_v2 = vld [vmem:[#allocation24_spill] sm:$0xff] }
 0x457   : > { %v4891_v51 = vrot.slane %v11378_v26, 7  ;;  %v5050_v25 = vrot.slane %v11378_v26, 1  ;;  %v11390_v59 = vmax.f32 %v4672_v41, 0.0  ;;  %v4670_v17 = vadd.f32 %v11334_v5, %v4631_v23  ;;  %v8062_v14 = vpop.f32.mrf.mxu1 }
 0x458   : > { %v4636_v44 = vmul.f32 %v11314_v52, %v4521_v36  ;;  %v4513_v62 = vadd.f32 %v4512_v34, %v4352_v58  ;;  %v8710_v54 = vpop.f32.mrf.mxu0  ;;  %v4897_v57 = vsel %vm1047_vm0, %v12847_v2, %v4896_v49  ;;  %v11397_v8 = vadd.f32 %v8061_v38, %v12848_v33  ;;  %v9087_v33 = vld [vmem:[#allocation12 + $0x1f0] sm:$0xff]  }
 0x459   : > { %v5056_v3 = vrot.slane %v11390_v59, 1  ;;  %v4702_v31 = vmax.f32 %v4670_v17, 0.0  ;;  %v4524_v16 = vadd.f32 %v8710_v54, %v4363_v6  ;;  %v8063_v9 = vpop.f32.mrf.mxu1  ;;  %v4892_v39 = vsel %vm1047_vm0, %v12847_v2, %v4891_v51 }
 0x45a   : > { %v4675_v29 = vadd.f32 %v11334_v5, %v4636_v44  ;;  %v4634_v19 = vmul.f32 %v11314_v52, %v4513_v62  ;;  %v11404_v58 = vadd.f32 %v8063_v9, %v8062_v14  ;;  %v4515_v18 = vpop.f32.mrf.mxu0  ;;  %v11408_v50 = vpack.c.bf16 %v11390_v59, %v11360_v61  ;;  %v9084_v14 = vld [vmem:[#allocation12 + $0x1b8] sm:$0xff]  }
 0x45b   : > { %v4893_v47 = vrot.slane %v4702_v31, 7  ;;  %v5051_v55 = vrot.slane %v4702_v31, 1  ;;  %v4637_v11 = vmul.f32 %v11314_v52, %v4524_v16  ;;  %v4516_v6 = vadd.f32 %v4515_v18, %v11320_v10  ;;  %v8065_v20 = vpop.f32.mrf.mxu1 }
 0x45c   : > { %v11412_v22 = vmax.f32 %v4675_v29, 0.0  ;;  %v4673_v35 = vadd.f32 %v11334_v5, %v4634_v19  ;;  %v8713_v53 = vpop.f32.mrf.mxu0  ;;  %v11416_v45 = vpack.c.bf16 %v4702_v31, %v11378_v26  ;;  %v4898_v56 = vrot.slane %v11390_v59, 7  ;;  %v12849_v29 = vld [vmem:[#allocation26_spill] sm:$0xff] }
 0x45d   : > { %v4676_v41 = vadd.f32 %v11334_v5, %v4637_v11  ;;  %v4635_v23 = vmul.f32 %v11314_v52, %v4516_v6  ;;  %v4537_v30 = vadd.f32 %v8713_v53, %v11341_v7  ;;  %v8066_v15 = vpop.f32.mrf.mxu1  ;;  %v4894_v10 = vsel %vm1047_vm0, %v4891_v51, %v4893_v47 }
 0x45e   : > { %v11424_v38 = vmax.f32 %v4673_v35, 0.0  ;;  %v11426_v34 = vadd.f32 %v8066_v15, %v8065_v20  ;;  %5831 = vmatprep.mubr.bf16.mxu1 %v11416_v45  ;;  %v4528_v26 = vpop.f32.mrf.mxu0  ;;  %v4998_v17 = vpack.c.bf16 %v4894_v10, %v4892_v39  ;;  %v4899_v9 = vsel %vm1047_vm0, %v4896_v49, %v4898_v56  ;;  %v12850_v20 = vld [vmem:[#allocation27_spill] sm:$0xff]  ;;  %v9088_v56 = vld [vmem:[#allocation12 + $0x1b0] sm:$0xff]  }
 0x45f   : > { %v11429_v44 = vmax.f32 %v4676_v41, 0.0  ;;  %v4674_v62 = vadd.f32 %v11334_v5, %v4635_v23  ;;  %v4640_v7 = vmul.f32 %v11314_v52, %v4537_v30  ;;  %v4529_v54 = vadd.f32 %v4528_v26, %v11337_v24  ;;  %v8068_v51 = vpop.f32.mrf.mxu1 }
 0x460   : > { %v5060_v31 = vrot.slane %v11424_v38, 1  ;;  %v8714_v16 = vpop.f32.mrf.mxu0  ;;  %5832 = vmatmul.mubr.bf16.gmra.mxu1 %v4998_v17  ;;  %5984 = vmatprep.mubr.bf16.mxu0 %v4998_v17  ;;  %v5052_v39 = vsel %vm1208_vm1, %v5050_v25, %v5051_v55  ;;  %v5054_v19 = vsel %vm1208_vm1, %v5051_v55, %v12849_v29  ;;  %v11449_v53 = vpack.c.bf16 %v4899_v9, %v4897_v57 }
 0x461   : > { %v5066_v18 = vrot.slane %v11429_v44, 1  ;;  %v11440_v47 = vmax.f32 %v4674_v62, 0.0  ;;  %v4679_v24 = vadd.f32 %v11334_v5, %v4640_v7  ;;  %v4638_v11 = vmul.f32 %v11314_v52, %v4529_v54  ;;  %v8069_v6 = vpop.f32.mrf.mxu1  ;;  %5839 = vmatprep.mubr.bf16.mxu1 %v11408_v50  ;;  %5985 = vmatmul.mubr.bf16.vlgmr.msra.gmra.mxu0 %v12850_v20 }
 0x462   : > { %v4540_v49 = vadd.f32 %v8714_v16, %v11349_v32  ;;  %v11447_v35 = vadd.f32 %v8069_v6, %v8068_v51  ;;  %v4531_v25 = vpop.f32.mrf.mxu0  ;;  %v11451_v55 = vpack.c.bf16 %v5054_v19, %v5052_v39  ;;  %8456 = vmatpush3.bf16.msra.mxu0 %v9084_v14  ;;  %v9091_v32 = vld [vmem:[#allocation12 + $0x1e8] sm:$0xff]   ;;  %5992 = vmatprep.mubr.bf16.mxu0 %v11449_v53  ;;  %v4901_v14 = vrot.slane %v11424_v38, 7 }
 0x463   : > { %v5061_v41 = vrot.slane %v11440_v47, 1  ;;  %v11454_v23 = vmax.f32 %v4679_v24, 0.0  ;;  %v4677_v30 = vadd.f32 %v11334_v5, %v4638_v11  ;;  %v4532_v15 = vadd.f32 %v4531_v25, %v11344_v37  ;;  %v8071_v10 = vpop.f32.mrf.mxu1  ;;  %8457 = vmatprep.subr.bf16.mxu0 %v9087_v33  ;;  %v9092_v11 = vld [vmem:[#allocation12 + $0x1a8] sm:$0xff]  }
 0x464   : > { %v4641_v26 = vmul.f32 %v11314_v52, %v4540_v49  ;;  %v8717_v57 = vpop.f32.mrf.mxu0  ;;  %v11462_v17 = vpack.c.bf16 %v11440_v47, %v11424_v38  ;;  %v4903_v62 = vrot.slane %v11440_v47, 7  ;;  %v4902_v19 = vsel %vm1047_vm0, %v12847_v2, %v4901_v14  ;;  %v9104_v38 = vld [vmem:[#allocation12 + $0x1c8] sm:$0xff]   ;;  %v12853_v47 = vld [vmem:[#allocation46_spill] sm:$0xff] }
 0x465   : > { %v11467_v54 = vmax.f32 %v4677_v30, 0.0  ;;  %v4639_v37 = vmul.f32 %v11314_v52, %v4532_v15  ;;  %v4553_v51 = vadd.f32 %v8717_v57, %v11352_v28  ;;  %v8072_v33 = vpop.f32.mrf.mxu1  ;;  %v9095_v15 = vld [vmem:[#allocation12 + $0x1e0] sm:$0xff]  }
 0x466   : > { %v4680_v16 = vadd.f32 %v11334_v5, %v4641_v26  ;;  %v11472_v9 = vadd.f32 %v8072_v33, %v8071_v10  ;;  %v4544_v39 = vpop.f32.mrf.mxu0  ;;  %v4904_v24 = vsel %vm1047_vm0, %v4901_v14, %v4903_v62  ;;  %8458 = vmatpush3.bf16.msra.mxu0 %v9088_v56  ;;  %v11488_v56 = vpack.c.bf16 %v11429_v44, %v11412_v22 }
 0x467   : > { %v4678_v49 = vadd.f32 %v11334_v5, %v4639_v37  ;;  %v4644_v25 = vmul.f32 %v11314_v52, %v4553_v51  ;;  %v4545_v28 = vadd.f32 %v4544_v39, %v11355_v46  ;;  %v8074_v30 = vpop.f32.mrf.mxu1  ;;  %8459 = vmatprep.subr.bf16.mxu0 %v9091_v32  ;;  %v11484_v57 = vpack.c.bf16 %v4904_v24, %v4902_v19  ;;  %v9100_v19 = vld [vmem:[#allocation12 + $0x198] sm:$0xff]  }
 0x468   : > { %v11481_v10 = vmax.f32 %v4680_v16, 0.0  ;;  %v8718_v26 = vpop.f32.mrf.mxu0  ;;  %5840 = vmatmul.mubr.bf16.gmra.mxu1 %v11449_v53  ;;  %v5057_v46 = vsel %vm1208_vm1, %v5055_v60, %v5056_v3  ;;  %v5059_v60 = vsel %vm1208_vm1, %v5056_v3, %v12849_v29  ;;  %v4906_v39 = vrot.slane %v11412_v22, 7 }
 0x469   : > { %v11495_v14 = vmax.f32 %v4678_v49, 0.0  ;;  %v4683_v32 = vadd.f32 %v11334_v5, %v4644_v25  ;;  %v4642_v62 = vmul.f32 %v11314_v52, %v4545_v28  ;;  %v4556_v37 = vadd.f32 %v8718_v26, %v11365_v21  ;;  %v8075_v51 = vpop.f32.mrf.mxu1  ;;  %5847 = vmatprep.mubr.bf16.mxu1 %v11462_v17  ;;  %5993 = vmatmul.mubr.bf16.gmra.mxu0 %v11451_v55  ;;  %v9096_v21 = vld [vmem:[#allocation12 + $0x1a0] sm:$0xff]  }
 0x46a   : > { %v11503_v16 = vadd.f32 %v8075_v51, %v8074_v30  ;;  %v4547_v61 = vpop.f32.mrf.mxu0  ;;  %6000 = vmatprep.mubr.bf16.mxu0 %v11484_v57  ;;  %8460 = vmatpush3.bf16.msra.mxu0 %v9092_v11  ;;  %v9099_v30 = vld [vmem:[#allocation12 + $0x1d8] sm:$0xff]   ;;  %v11517_v51 = vpack.c.bf16 %v5059_v60, %v5057_v46  ;;  %v4907_v3 = vsel %vm1047_vm0, %v12847_v2, %v4906_v39  ;;  %v4908_v11 = vrot.slane %v11429_v44, 7  ;;  %v12851_v60 = vld [vmem:[#allocation41_spill] sm:$0xff] }
 0x46b   : > { %v11512_v24 = vmax.f32 %v4683_v32, 0.0  ;;  %v4681_v49 = vadd.f32 %v11334_v5, %v4642_v62  ;;  %v4645_v25 = vmul.f32 %v11314_v52, %v4556_v37  ;;  %v8077_v28 = vpop.f32.mrf.mxu1  ;;  %8461 = vmatprep.subr.bf16.mxu0 %v9095_v15  ;;  %v4548_v26 = vadd.f32 %v4547_v61, %v11358_v12 }
 0x46c   : > { %v8721_v59 = vpop.f32.mrf.mxu0  ;;  %v4909_v61 = vsel %vm1047_vm0, %v4906_v39, %v4908_v11  ;;  %v4424_v6 = vadd.f32 %v11426_v34, %v12851_v60  ;;  %v12852_v34 = vld [vmem:[#allocation48_spill] sm:$0xff]  ;;  %v11546_v11 = vpack.c.bf16 %v11495_v14, %v11467_v54  ;;  %v9102_v60 = vld [vmem:[#allocation12 + $0x190] sm:$0xff]  }
 0x46d   : > { %v11523_v7 = vmax.f32 %v4681_v49, 0.0  ;;  %v4684_v62 = vadd.f32 %v11334_v5, %v4645_v25  ;;  %v4569_v37 = vadd.f32 %v8721_v59, %v11368_v40  ;;  %v8078_v15 = vpop.f32.mrf.mxu1  ;;  %v4643_v33 = vmul.f32 %v11314_v52, %v4548_v26 }
 0x46e   : > { %v11528_v12 = vadd.f32 %v8078_v15, %v8077_v28  ;;  %v4560_v46 = vpop.f32.mrf.mxu0  ;;  %8462 = vmatpush3.bf16.msra.mxu0 %v9096_v21  ;;  %v9101_v28 = vld [vmem:[#allocation12 + $0x1d0] sm:$0xff]   ;;  %v11540_v39 = vpack.c.bf16 %v4909_v61, %v4907_v3  ;;  %v4427_v21 = vadd.f32 %v11447_v35, %v12852_v34  ;;  %v5062_v61 = vsel %vm1208_vm1, %v5060_v31, %v5061_v41 }
 0x46f   : > { %v11534_v32 = vmax.f32 %v4684_v62, 0.0  ;;  %v4648_v25 = vmul.f32 %v11314_v52, %v4569_v37  ;;  %v4561_v40 = vadd.f32 %v4560_v46, %v11371_v48  ;;  %v8080_v59 = vpop.f32.mrf.mxu1  ;;  %8463 = vmatprep.subr.bf16.mxu0 %v9099_v30  ;;  %v4682_v26 = vadd.f32 %v11334_v5, %v4643_v33 }
 0x470   : > { %v8722_v15 = vpop.f32.mrf.mxu0  ;;  %5848 = vmatmul.mubr.bf16.gmra.mxu1 %v11484_v57 }
 0x471   : > { %v4687_v48 = vadd.f32 %v11334_v5, %v4648_v25  ;;  %v4646_v30 = vmul.f32 %v11314_v52, %v4561_v40  ;;  %v4572_v33 = vadd.f32 %v8722_v15, %v11383_v0  ;;  %v8081_v37 = vpop.f32.mrf.mxu1  ;;  %5855 = vmatprep.mubr.bf16.mxu1 %v11488_v56  ;;  %6001 = vmatmul.mubr.bf16.gmra.mxu0 %v11517_v51  ;;  %v11554_v3 = vmax.f32 %v4682_v26, 0.0 }
 0x472   : > { %v8082_v35 = vadd.f32 %v8081_v37, %v8080_v59  ;;  %v4563_v46 = vpop.f32.mrf.mxu0  ;;  %6008 = vmatprep.mubr.bf16.mxu0 %v11540_v39  ;;  %v5064_v0 = vsel %vm1208_vm1, %v5061_v41, %v12849_v29  ;;  %8464 = vmatpush3.bf16.msra.mxu0 %v9100_v19  ;;  %v4419_v41 = vadd.f32 %v11404_v58, %v12853_v47  ;;  %v4911_v19 = vrot.slane %v11467_v54, 7  ;;  %v12855_v47 = vld [vmem:[#allocation50_spill] sm:$0xff] }
 0x473   : > { %v11566_v25 = vmax.f32 %v4687_v48, 0.0  ;;  %v4685_v40 = vadd.f32 %v11334_v5, %v4646_v30  ;;  %v4649_v59 = vmul.f32 %v11314_v52, %v4572_v33  ;;  %v4564_v26 = vadd.f32 %v4563_v46, %v11374_v63  ;;  %v8083_v15 = vpop.f32.mrf.mxu1  ;;  %8465 = vmatprep.subr.bf16.mxu0 %v9101_v28 }
 0x474   : > { %v8725_v34 = vpop.f32.mrf.mxu0  ;;  %v11572_v37 = vpack.c.bf16 %v5064_v0, %v5062_v61  ;;  %v4912_v61 = vsel %vm1047_vm0, %v12847_v2, %v4911_v19  ;;  %v4913_v58 = vrot.slane %v11495_v14, 7  ;;  %v9105_v0 = vld [vmem:[#allocation12 + $0x188] sm:$0xff]  }
 0x475   : > { %v11578_v30 = vmax.f32 %v4685_v40, 0.0  ;;  %v4688_v33 = vadd.f32 %v11334_v5, %v4649_v59  ;;  %v4647_v63 = vmul.f32 %v11314_v52, %v4564_v26  ;;  %v8084_v28 = vpop.f32.mrf.mxu1  ;;  %v4585_v46 = vadd.f32 %v8725_v34, %v4424_v6  ;;  %v9106_v6 = vld [vmem:[#allocation12 + $0x1c0] sm:$0xff]  }
 0x476   : > { %v11582_v62 = vadd.f32 %v8084_v28, %v8083_v15  ;;  %v4576_v49 = vpop.f32.mrf.mxu0  ;;  %8466 = vmatpush3.bf16.msra.mxu0 %v9102_v60  ;;  %v4914_v28 = vsel %vm1047_vm0, %v4911_v19, %v4913_v58  ;;  %v12854_v60 = vld [vmem:[#allocation52_spill] sm:$0xff] }
 0x477   : > { %v11588_v40 = vmax.f32 %v4688_v33, 0.0  ;;  %v4686_v59 = vadd.f32 %v11334_v5, %v4647_v63  ;;  %v4577_v26 = vadd.f32 %v4576_v49, %v11397_v8  ;;  %v8086_v48 = vpop.f32.mrf.mxu1  ;;  %8467 = vmatprep.subr.bf16.mxu0 %v9104_v38  ;;  %v4652_v15 = vmul.f32 %v11314_v52, %v4585_v46 }
 0x478   : > { %v8726_v34 = vpop.f32.mrf.mxu0  ;;  %5856 = vmatmul.mubr.bf16.gmra.mxu1 %v11540_v39  ;;  %v4440_v31 = vadd.f32 %v11528_v12, %v12854_v60  ;;  %v4432_v33 = vadd.f32 %v11472_v9, %v12855_v47  ;;  %v11608_v58 = vpack.c.bf16 %v4914_v28, %v4912_v61  ;;  %v4443_v9 = vadd.f32 %v8082_v35, %v11275_v1  ;;  %v9107_v47 = vld [vmem:[#allocation12 + $0x180] sm:$0xff]  }
 0x479   : > { %v11600_v36 = vmax.f32 %v4686_v59, 0.0  ;;  %v4650_v8 = vmul.f32 %v11314_v52, %v4577_v26  ;;  %v4588_v49 = vadd.f32 %v8726_v34, %v4427_v21  ;;  %v8087_v38 = vpop.f32.mrf.mxu1  ;;  %5863 = vmatprep.mubr.bf16.mxu1 %v11546_v11  ;;  %6009 = vmatmul.mubr.bf16.gmra.mxu0 %v11572_v37  ;;  %v4691_v19 = vadd.f32 %v11334_v5, %v4652_v15 }
 0x47a   : > { %v11606_v46 = vadd.f32 %v8087_v38, %v8086_v48  ;;  %v4579_v12 = vpop.f32.mrf.mxu0  ;;  %8468 = vmatpush3.bf16.msra.mxu0 %v9105_v0  ;;  %6016 = vmatprep.mubr.bf16.mxu0 %v11608_v58  ;;  %v11619_v61 = vpack.c.bf16 %v11481_v10, %v11454_v23  ;;  %v12856_v1 = vrot.slane %v11412_v22, 1 }
 0x47b   : > { %v5091_v59 = vrot.slane %v11600_v36, 1  ;;  %v4689_v21 = vadd.f32 %v11334_v5, %v4650_v8  ;;  %v4653_v26 = vmul.f32 %v11314_v52, %v4588_v49  ;;  %v4580_v34 = vadd.f32 %v4579_v12, %v4419_v41  ;;  %v8089_v60 = vpop.f32.mrf.mxu1  ;;  %8469 = vmatprep.subr.bf16.mxu0 %v9106_v6  ;;  %v12857_v12 = vld [vmem:[#allocation45_spill] sm:$0xff] }
 0x47c   : > { %v11614_v63 = vmax.f32 %v4691_v19, 0.0  ;;  %v8729_v48 = vpop.f32.mrf.mxu0  ;;  %v5067_v35 = vsel %vm1208_vm1, %v12856_v1, %v5066_v18  ;;  %v5069_v41 = vsel %vm1208_vm1, %v5066_v18, %v12849_v29  ;;  %v4435_v1 = vadd.f32 %v11503_v16, %v12857_v12 }
 0x47d   : > { %v11630_v0 = vmax.f32 %v4689_v21, 0.0  ;;  %v4692_v6 = vadd.f32 %v11334_v5, %v4653_v26  ;;  %v4651_v15 = vmul.f32 %v11314_v52, %v4580_v34  ;;  %v4601_v28 = vadd.f32 %v8729_v48, %v4440_v31  ;;  %v8090_v8 = vpop.f32.mrf.mxu1 }
 0x47e   : > { %v8091_v38 = vadd.f32 %v8090_v8, %v8089_v60  ;;  %v4592_v19 = vpop.f32.mrf.mxu0  ;;  %v11635_v22 = vpack.c.bf16 %v5069_v41, %v5067_v35  ;;  %8470 = vmatpush3.bf16.msra.mxu0 %v9107_v47  ;;  %v4916_v60 = vrot.slane %v11454_v23, 7  ;;  %v4918_v35 = vrot.slane %v11481_v10, 7 }
 0x47f   : > { %v11640_v18 = vmax.f32 %v4692_v6, 0.0  ;;  %v4690_v21 = vadd.f32 %v11334_v5, %v4651_v15  ;;  %v4656_v26 = vmul.f32 %v11314_v52, %v4601_v28  ;;  %v8092_v31 = vpop.f32.mrf.mxu1  ;;  %v4593_v34 = vadd.f32 %v4592_v19, %v4432_v33 }
 0x480   : > { %v8730_v48 = vpop.f32.mrf.mxu0  ;;  %5864 = vmatmul.mubr.bf16.gmra.mxu1 %v11608_v58  ;;  %v4456_v16 = vadd.f32 %v8091_v38, %v11300_v27  ;;  %v4917_v12 = vsel %vm1047_vm0, %v12847_v2, %v4916_v60  ;;  %v4919_v27 = vsel %vm1047_vm0, %v4916_v60, %v4918_v35 }
 0x481   : > { %v11649_v41 = vmax.f32 %v4690_v21, 0.0  ;;  %v4695_v6 = vadd.f32 %v11334_v5, %v4656_v26  ;;  %v4604_v15 = vadd.f32 %v8730_v48, %v4443_v9  ;;  %v8093_v8 = vpop.f32.mrf.mxu1  ;;  %5871 = vmatprep.mubr.bf16.mxu1 %v11619_v61  ;;  %6017 = vmatmul.mubr.bf16.gmra.mxu0 %v11635_v22  ;;  %v4654_v33 = vmul.f32 %v11314_v52, %v4593_v34 }
 0x482   : > { %v8094_v28 = vadd.f32 %v8093_v8, %v8092_v31  ;;  %v4595_v19 = vpop.f32.mrf.mxu0  ;;  %v11663_v49 = vpack.c.bf16 %v4919_v27, %v4917_v12  ;;  %v4448_v31 = vadd.f32 %v11582_v62, %v11278_v13  ;;  %v12858_v13 = vrot.slane %v11495_v14, 1 }
 0x483   : > { %v5101_v38 = vrot.slane %v11649_v41, 1  ;;  %v11659_v21 = vmax.f32 %v4695_v6, 0.0  ;;  %v4657_v9 = vmul.f32 %v11314_v52, %v4604_v15  ;;  %v4596_v26 = vadd.f32 %v4595_v19, %v4435_v1 }
 0x484   : > { %v4693_v48 = vadd.f32 %v11334_v5, %v4654_v33  ;;  %v8733_v47 = vpop.f32.mrf.mxu0  ;;  %v4459_v34 = vadd.f32 %v8094_v28, %v11325_v4  ;;  %6024 = vmatprep.mubr.bf16.mxu0 %v11663_v49  ;;  %v11676_v15 = vpack.c.bf16 %v11554_v3, %v11523_v7  ;;  %v12859_v4 = vrot.slane %v11467_v54, 1 }
 0x485   : > { %v4696_v60 = vadd.f32 %v11334_v5, %v4657_v9  ;;  %v4655_v35 = vmul.f32 %v11314_v52, %v4596_v26  ;;  %v4617_v6 = vadd.f32 %v8733_v47, %v4456_v16  ;;  %v12860_v33 = vmov %v12858_v13 }
 0x486   : > { %v11671_v44 = vmax.f32 %v4693_v48, 0.0  ;;  %v4608_v1 = vpop.f32.mrf.mxu0  ;;  %v5072_v62 = vsel %vm1208_vm1, %v12859_v4, %v12858_v13  ;;  %v5074_v16 = vsel %vm1208_vm1, %v12860_v33, %v12849_v29  ;;  %v4451_v26 = vadd.f32 %v11606_v46, %v11281_v42 }
 0x487   : > { %v11687_v47 = vmax.f32 %v4696_v60, 0.0  ;;  %v4694_v28 = vadd.f32 %v11334_v5, %v4655_v35  ;;  %v4660_v19 = vmul.f32 %v11314_v52, %v4617_v6  ;;  %v4609_v12 = vadd.f32 %v4608_v1, %v4448_v31 }
 0x488   : > { %v8734_v9 = vpop.f32.mrf.mxu0  ;;  %5872 = vmatmul.mubr.bf16.gmra.mxu1 %v11663_v49  ;;  %v11693_v54 = vpack.c.bf16 %v5074_v16, %v5072_v62  ;;  %v4921_v14 = vrot.slane %v11523_v7, 7  ;;  %v4923_v42 = vrot.slane %v11554_v3, 7  ;;  %v11710_v46 = vpack.c.bf16 %v11534_v32, %v11512_v24 }
 0x489   : > { %v11699_v60 = vmax.f32 %v4694_v28, 0.0  ;;  %v4699_v35 = vadd.f32 %v11334_v5, %v4660_v19  ;;  %v4658_v31 = vmul.f32 %v11314_v52, %v4609_v12  ;;  %5879 = vmatprep.mubr.bf16.mxu1 %v11676_v15  ;;  %v4620_v6 = vadd.f32 %v8734_v9, %v4459_v34 }
 0x48a   : > { %6025 = vmatmul.mubr.bf16.gmra.mxu0 %v11693_v54  ;;  %v4611_v1 = vpop.f32.mrf.mxu0  ;;  %v4922_v13 = vsel %vm1047_vm0, %v12847_v2, %v4921_v14  ;;  %v4924_v28 = vsel %vm1047_vm0, %v4921_v14, %v4923_v42  ;;  %v12861_v19 = vrot.slane %v11481_v10, 1  ;;  %v12862_v12 = vrot.slane %v11454_v23, 1 }
 0x48b   : > { %v5111_v4 = vrot.slane %v11699_v60, 1  ;;  %v11713_v62 = vmax.f32 %v4699_v35, 0.0  ;;  %v4697_v33 = vadd.f32 %v11334_v5, %v4658_v31  ;;  %v4612_v16 = vadd.f32 %v4611_v1, %v4451_v26 }
 0x48c   : > { %v4661_v34 = vmul.f32 %v11314_v52, %v4620_v6  ;;  %v5077_v9 = vsel %vm1208_vm1, %v12862_v12, %v12861_v19  ;;  %v12863_v8 = vmov %v12861_v19  ;;  %v11730_v26 = vpack.c.bf16 %v4924_v28, %v4922_v13 }
 0x48d   : > { %v5079_v48 = vsel %vm1208_vm1, %v12863_v8, %v12849_v29  ;;  %v11727_v35 = vmax.f32 %v4697_v33, 0.0  ;;  %v4659_v31 = vmul.f32 %v11314_v52, %v4612_v16  ;;  %v4926_v1 = vrot.slane %v11512_v24, 7 }
 0x48e   : > { %v11732_v6 = vpack.c.bf16 %v5079_v48, %v5077_v9  ;;  %v4700_v14 = vadd.f32 %v11334_v5, %v4661_v34  ;;  %v4928_v23 = vrot.slane %v11534_v32, 7  ;;  %v11739_v42 = vpack.c.bf16 %v11600_v36, %v11578_v30  ;;  %6032 = vmatprep.mubr.bf16.mxu0 %v11730_v26 }
 0x48f   : > { %v4698_v8 = vadd.f32 %v11334_v5, %v4659_v31  ;;  %v12864_v52 = vrot.slane %v11554_v3, 1  ;;  %v12865_v48 = vrot.slane %v11523_v7, 1  ;;  %v4927_v5 = vsel %vm1047_vm0, %v12847_v2, %v4926_v1 }
 0x490   : > { %v11753_v34 = vmax.f32 %v4700_v14, 0.0  ;;  %5880 = vmatmul.mubr.bf16.gmra.mxu1 %v11730_v26  ;;  %v4929_v28 = vsel %vm1047_vm0, %v4926_v1, %v4928_v23  ;;  %v4931_v3 = vrot.slane %v11578_v30, 7  ;;  %v4933_v9 = vrot.slane %v11600_v36, 7 }
 0x491   : > { %v5082_v13 = vsel %vm1208_vm1, %v12865_v48, %v12864_v52  ;;  %v12866_v33 = vmov %v12864_v52  ;;  %v11761_v12 = vmax.f32 %v4698_v8, 0.0  ;;  %5887 = vmatprep.mubr.bf16.mxu1 %v11710_v46  ;;  %v11764_v7 = vpack.c.bf16 %v4929_v28, %v4927_v5 }
 0x492   : > { %v5084_v16 = vsel %vm1208_vm1, %v12866_v33, %v12849_v29  ;;  %6033 = vmatmul.mubr.bf16.gmra.mxu0 %v11732_v6  ;;  %v11771_v31 = vpack.c.bf16 %v11588_v40, %v11566_v25  ;;  %v12867_v14 = vrot.slane %v11534_v32, 1  ;;  %v12868_v1 = vrot.slane %v11512_v24, 1 }
 0x493   : > { %v11759_v19 = vpack.c.bf16 %v5084_v16, %v5082_v13  ;;  %v4936_v48 = vrot.slane %v11566_v25, 7  ;;  %6040 = vmatprep.mubr.bf16.mxu0 %v11764_v7  ;;  %v4932_v33 = vsel %vm1047_vm0, %v12847_v2, %v4931_v3  ;;  %v4934_v16 = vsel %vm1047_vm0, %v4931_v3, %v4933_v9 }
 0x494   : > { %v5087_v23 = vsel %vm1208_vm1, %v12868_v1, %v12867_v14  ;;  %v12869_v8 = vmov %v12867_v14  ;;  %v11790_v24 = vpack.c.bf16 %v4934_v16, %v4932_v33  ;;  %v4938_v28 = vrot.slane %v11588_v40, 7 }
 0x495   : > { %v5089_v52 = vsel %vm1208_vm1, %v12869_v8, %v12849_v29  ;;  %v4937_v32 = vsel %vm1047_vm0, %v12847_v2, %v4936_v48  ;;  %v11797_v14 = vpack.c.bf16 %v11649_v41, %v11630_v0  ;;  %v12870_v1 = vrot.slane %v11578_v30, 1 }
 0x496   : > { %v11788_v5 = vpack.c.bf16 %v5089_v52, %v5087_v23  ;;  %v5094_v3 = vsel %vm1208_vm1, %v5091_v59, %v12849_v29  ;;  %v4941_v9 = vrot.slane %v11630_v0, 7  ;;  %v4943_v23 = vrot.slane %v11649_v41, 7 }
 0x497   : > { %v5092_v8 = vsel %vm1208_vm1, %v12870_v1, %v5091_v59  ;;  %v4939_v52 = vsel %vm1047_vm0, %v4936_v48, %v4938_v28  ;;  %v11815_v16 = vpack.c.bf16 %v11640_v18, %v11614_v63  ;;  %v12871_v30 = vrot.slane %v11588_v40, 1 }
 0x498   : > { %v11811_v33 = vpack.c.bf16 %v5094_v3, %v5092_v8  ;;  %v12872_v1 = vrot.slane %v11566_v25, 1  ;;  %v11822_v10 = vpack.c.bf16 %v4939_v52, %v4937_v32  ;;  %v4942_v59 = vsel %vm1047_vm0, %v12847_v2, %v4941_v9  ;;  %5888 = vmatmul.mubr.bf16.gmra.mxu1 %v11764_v7 }
 0x499   : > { %v4944_v13 = vsel %vm1047_vm0, %v4941_v9, %v4943_v23  ;;  %v12873_v48 = vmov %v12871_v30  ;;  %v4946_v25 = vrot.slane %v11614_v63, 7  ;;  %v4948_v32 = vrot.slane %v11640_v18, 7  ;;  %5895 = vmatprep.mubr.bf16.mxu1 %v11739_v42 }
 0x49a   : > { %v5097_v36 = vsel %vm1208_vm1, %v12872_v1, %v12871_v30  ;;  %v5099_v28 = vsel %vm1208_vm1, %v12873_v48, %v12849_v29  ;;  %v11832_v8 = vpack.c.bf16 %v4944_v13, %v4942_v59  ;;  %v11841_v9 = vpack.c.bf16 %v11699_v60, %v11671_v44  ;;  %6041 = vmatmul.mubr.bf16.gmra.mxu0 %v11759_v19 }
 0x49b   : > { %v11834_v3 = vpack.c.bf16 %v5099_v28, %v5097_v36  ;;  %v12874_v40 = vrot.slane %v11630_v0, 1  ;;  %v5104_v13 = vsel %vm1208_vm1, %v5101_v38, %v12849_v29  ;;  %v4951_v52 = vrot.slane %v11671_v44, 7  ;;  %6048 = vmatprep.mubr.bf16.mxu0 %v11790_v24 }
 0x49c   : > { %v4947_v30 = vsel %vm1047_vm0, %v12847_v2, %v4946_v25  ;;  %v4949_v1 = vsel %vm1047_vm0, %v4946_v25, %v4948_v32  ;;  %v4953_v0 = vrot.slane %v11699_v60, 7  ;;  %v12875_v48 = vrot.slane %v11640_v18, 1 }
 0x49d   : > { %v5102_v23 = vsel %vm1208_vm1, %v12874_v40, %v5101_v38  ;;  %v11861_v59 = vpack.c.bf16 %v4949_v1, %v4947_v30  ;;  %v4952_v41 = vsel %vm1047_vm0, %v12847_v2, %v4951_v52  ;;  %v11867_v38 = vpack.c.bf16 %v11687_v47, %v11659_v21 }
 0x49e   : > { %v11857_v36 = vpack.c.bf16 %v5104_v13, %v5102_v23  ;;  %v12876_v28 = vrot.slane %v11614_v63, 1  ;;  %v4954_v32 = vsel %vm1047_vm0, %v4951_v52, %v4953_v0  ;;  %v12877_v40 = vmov %v12875_v48 }
 0x49f   : > { %v5109_v23 = vsel %vm1208_vm1, %v12877_v40, %v12849_v29  ;;  %v4956_v13 = vrot.slane %v11659_v21, 7  ;;  %v4958_v30 = vrot.slane %v11687_v47, 7  ;;  %v11881_v1 = vpack.c.bf16 %v4954_v32, %v4952_v41 }
 0x4a0   : > { %v5107_v25 = vsel %vm1208_vm1, %v12876_v28, %v12875_v48  ;;  %v11887_v63 = vpack.c.bf16 %v11761_v12, %v11727_v35  ;;  %v12878_v52 = vrot.slane %v11671_v44, 1  ;;  %v5114_v41 = vsel %vm1208_vm1, %v5111_v4, %v12849_v29  ;;  %5896 = vmatmul.mubr.bf16.gmra.mxu1 %v11790_v24 }
 0x4a1   : > { %v11883_v27 = vpack.c.bf16 %v5109_v23, %v5107_v25  ;;  %v4957_v0 = vsel %vm1047_vm0, %v12847_v2, %v4956_v13  ;;  %v4959_v48 = vsel %vm1047_vm0, %v4956_v13, %v4958_v30  ;;  %v4961_v28 = vrot.slane %v11727_v35, 7  ;;  %v8135_v25 = vpop.f32.mrf.mxu1  ;;  %5903 = vmatprep.mubr.bf16.mxu1 %v11771_v31 }
 0x4a2   : > { %v5112_v18 = vsel %vm1208_vm1, %v12878_v52, %v5111_v4  ;;  %v11902_v32 = vpack.c.bf16 %v4959_v48, %v4957_v0  ;;  %v4963_v44 = vrot.slane %v11761_v12, 7  ;;  %v12879_v23 = vrot.slane %v11687_v47, 1  ;;  %6049 = vmatmul.mubr.bf16.gmra.mxu0 %v11788_v5 }
 0x4a3   : > { %v11904_v40 = vpack.c.bf16 %v5114_v41, %v5112_v18  ;;  %v12880_v52 = vrot.slane %v11659_v21, 1  ;;  %v4962_v60 = vsel %vm1047_vm0, %v12847_v2, %v4961_v28  ;;  %v5177_v18 = vrot.slane %v11713_v62, 7  ;;  %6056 = vmatprep.mubr.bf16.mxu0 %v11822_v10 }
 0x4a4   : > { %v12881_v4 = vmov %v12879_v23  ;;  %v5179_v0 = vrot.slane %v11753_v34, 7  ;;  %v4964_v21 = vsel %vm1047_vm0, %v4961_v28, %v4963_v44  ;;  %v12882_v41 = vrot.slane %v11761_v12, 1 }
 0x4a5   : > { %v5117_v13 = vsel %vm1208_vm1, %v12880_v52, %v12879_v23  ;;  %v5119_v30 = vsel %vm1208_vm1, %v12881_v4, %v12849_v29  ;;  %v12883_v23 = vrot.slane %v11727_v35, 1  ;;  %v11935_v20 = vpack.c.bf16 %v4964_v21, %v4962_v60 }
 0x4a6   : > { %v11923_v48 = vpack.c.bf16 %v5119_v30, %v5117_v13  ;;  %v12884_v47 = vmov %v12882_v41  ;;  %v5178_v28 = vsel %vm1047_vm0, %v12847_v2, %v5177_v18  ;;  %v5180_v44 = vsel %vm1047_vm0, %v5177_v18, %v5179_v0  ;;  %v8136_v30 = vpop.f32.mrf.mxu1 }
 0x4a7   : > { %v5122_v52 = vsel %vm1208_vm1, %v12883_v23, %v12882_v41  ;;  %v5124_v4 = vsel %vm1208_vm1, %v12884_v47, %v12849_v29  ;;  %v11943_v35 = vpack.c.bf16 %v5180_v44, %v5178_v28  ;;  %v11945_v41 = vadd.f32 %v8136_v30, %v8135_v25 }
 0x4a8   : > { %v11940_v13 = vpack.c.bf16 %v5124_v4, %v5122_v52  ;;  %v5186_v12 = vrot.slane %v11713_v62, 1  ;;  %v5187_v23 = vrot.slane %v11753_v34, 1  ;;  %v11951_v60 = vpack.c.bf16 %v11753_v34, %v11713_v62  ;;  %5904 = vmatmul.mubr.bf16.gmra.mxu1 %v11822_v10  ;;  %v9109_v62 = vld [vmem:[#allocation12 + $0x228] sm:$0xff]  }
 0x4a9   : > { %5911 = vmatprep.mubr.bf16.mxu1 %v11797_v14 }
 0x4aa   : > { %v5188_v2 = vsel %vm1208_vm1, %v5186_v12, %v5187_v23  ;;  %v5190_v18 = vsel %vm1208_vm1, %v5187_v23, %v12849_v29  ;;  %6057 = vmatmul.mubr.bf16.gmra.mxu0 %v11811_v33  ;;  %v9108_v29 = vld [vmem:[#allocation12 + $0x230] sm:$0xff]  }
 0x4ab   : > { %v11956_v0 = vpack.c.bf16 %v5190_v18, %v5188_v2  ;;  %6064 = vmatprep.mubr.bf16.mxu0 %v11832_v8 }
 0x4b0   : > { %5912 = vmatmul.mubr.bf16.gmra.mxu1 %v11832_v8 }
 0x4b1   : > { %5919 = vmatprep.mubr.bf16.mxu1 %v11815_v16 }
 0x4b2   : > { %6065 = vmatmul.mubr.bf16.gmra.mxu0 %v11834_v3 }
 0x4b3   : > { %6072 = vmatprep.mubr.bf16.mxu0 %v11861_v59 }
 0x4b8   : > { %5920 = vmatmul.mubr.bf16.gmra.mxu1 %v11861_v59 }
 0x4b9   : > { %5927 = vmatprep.mubr.bf16.mxu1 %v11841_v9 }
 0x4ba   : > { %6073 = vmatmul.mubr.bf16.gmra.mxu0 %v11857_v36 }
 0x4bb   : > { %6080 = vmatprep.mubr.bf16.mxu0 %v11881_v1 }
 0x4c0   : > { %5928 = vmatmul.mubr.bf16.gmra.mxu1 %v11881_v1 }
 0x4c1   : > { %5935 = vmatprep.mubr.bf16.mxu1 %v11867_v38 }
 0x4c2   : > { %6081 = vmatmul.mubr.bf16.gmra.mxu0 %v11883_v27 }
 0x4c3   : > { %6088 = vmatprep.mubr.bf16.mxu0 %v11902_v32 }
 0x4c8   : > { %5936 = vmatmul.mubr.bf16.gmra.mxu1 %v11902_v32 }
 0x4c9   : > { %5943 = vmatprep.mubr.bf16.mxu1 %v11887_v63 }
 0x4ca   : > { %6089 = vmatmul.mubr.bf16.gmra.mxu0 %v11904_v40 }
 0x4cb   : > { %6096 = vmatprep.mubr.bf16.mxu0 %v11935_v20 }
 0x4d0   : > { %5944 = vmatmul.mubr.bf16.gmra.mxu1 %v11935_v20 }
 0x4d1   : > { %6145 = vmatprep.mubr.bf16.mxu1 %v11451_v55  ;;  %v9110_v55 = vld [vmem:[#allocation12 + $0x220] sm:$0xff]  }
 0x4d2   : > { %6097 = vmatmul.mubr.bf16.gmra.mxu0 %v11923_v48 }
 0x4d3   : > { %6104 = vmatprep.mubr.bf16.mxu0 %v11943_v35 }
 0x4d8   : > { %6146 = vmatmul.mubr.bf16.vlgmr.msra.gmra.mxu1 %v11416_v45  ;;  %v9112_v45 = vld [vmem:[#allocation12 + $0x210] sm:$0xff]  }
 0x4d9   : > { %8736 = vmatpush3.bf16.msra.mxu1 %v11376_v43  ;;  %6153 = vmatprep.mubr.bf16.mxu1 %v11517_v51  ;;  %v9111_v43 = vld [vmem:[#allocation12 + $0x218] sm:$0xff]  }
 0x4da   : > { %6105 = vmatmul.mubr.bf16.gmra.mxu0 %v11940_v13  ;;  %8737 = vmatprep.subr.bf16.mxu1 %v9108_v29 }
 0x4db   : > { %6306 = vmatprep.mubr.bf16.mxu0 %v11408_v50 }
 0x4dd   : > { %8738 = vmatpush3.bf16.msra.mxu1 %v9108_v29 }
 0x4de   : > { %8739 = vmatprep.subr.bf16.mxu1 %v9109_v62 }
 0x4e0   : > { %6154 = vmatmul.mubr.bf16.gmra.mxu1 %v11408_v50  ;;  %v9113_v50 = vld [vmem:[#allocation12 + $0x208] sm:$0xff]  }
 0x4e1   : > { %6161 = vmatprep.mubr.bf16.mxu1 %v11572_v37  ;;  %8740 = vmatpush3.bf16.msra.mxu1 %v9109_v62 }
 0x4e2   : > { %6307 = vmatmul.mubr.bf16.vlgmr.msra.gmra.mxu0 %v11449_v53  ;;  %8741 = vmatprep.subr.bf16.mxu1 %v9110_v55  ;;  %v9114_v53 = vld [vmem:[#allocation12 + $0x200] sm:$0xff]  }
 0x4e3   : > { %6314 = vmatprep.mubr.bf16.mxu0 %v11462_v17 }
 0x4e5   : > { %8742 = vmatpush3.bf16.msra.mxu1 %v9110_v55 }
 0x4e6   : > { %8743 = vmatprep.subr.bf16.mxu1 %v9111_v43 }
 0x4e8   : > { %6162 = vmatmul.mubr.bf16.gmra.mxu1 %v11462_v17  ;;  %v8138_v17 = vpop.f32.mrf.mxu1 }
 0x4e9   : > { %6169 = vmatprep.mubr.bf16.mxu1 %v11635_v22  ;;  %8744 = vmatpush3.bf16.msra.mxu1 %v9111_v43 }
 0x4ea   : > { %6315 = vmatmul.mubr.bf16.gmra.mxu0 %v11484_v57  ;;  %8745 = vmatprep.subr.bf16.mxu1 %v9112_v45  ;;  %v8139_v57 = vpop.f32.mrf.mxu1 }
 0x4eb   : > { %6322 = vmatprep.mubr.bf16.mxu0 %v11488_v56 }
 0x4ed   : > { %8746 = vmatpush3.bf16.msra.mxu1 %v9112_v45 }
 0x4ee   : > { %8747 = vmatprep.subr.bf16.mxu1 %v9113_v50 }
 0x4f0   : > { %6170 = vmatmul.mubr.bf16.gmra.mxu1 %v11488_v56 }
 0x4f1   : > { %6177 = vmatprep.mubr.bf16.mxu1 %v11693_v54  ;;  %8748 = vmatpush3.bf16.msra.mxu1 %v9113_v50 }
 0x4f2   : > { %6323 = vmatmul.mubr.bf16.gmra.mxu0 %v11540_v39  ;;  %8749 = vmatprep.subr.bf16.mxu1 %v9114_v53 }
 0x4f3   : > { %6330 = vmatprep.mubr.bf16.mxu0 %v11546_v11 }
 0x4f5   : > { %8750 = vmatpush3.bf16.msra.mxu1 %v9114_v53 }
 0x4f8   : > { %6178 = vmatmul.mubr.bf16.gmra.mxu1 %v11546_v11 }
 0x4f9   : > { %6185 = vmatprep.mubr.bf16.mxu1 %v11732_v6 }
 0x4fa   : > { %6331 = vmatmul.mubr.bf16.gmra.mxu0 %v11608_v58 }
 0x4fb   : > { %6338 = vmatprep.mubr.bf16.mxu0 %v11619_v61 }
 0x500   : > { %6186 = vmatmul.mubr.bf16.gmra.mxu1 %v11619_v61 }
 0x501   : > { %6193 = vmatprep.mubr.bf16.mxu1 %v11759_v19 }
 0x502   : > { %6339 = vmatmul.mubr.bf16.gmra.mxu0 %v11663_v49 }
 0x503   : > { %6346 = vmatprep.mubr.bf16.mxu0 %v11676_v15 }
 0x508   : > { %6194 = vmatmul.mubr.bf16.gmra.mxu1 %v11676_v15 }
 0x509   : > { %6201 = vmatprep.mubr.bf16.mxu1 %v11788_v5 }
 0x50a   : > { %6347 = vmatmul.mubr.bf16.gmra.mxu0 %v11730_v26 }
 0x50b   : > { %6354 = vmatprep.mubr.bf16.mxu0 %v11710_v46 }
 0x510   : > { %6202 = vmatmul.mubr.bf16.gmra.mxu1 %v11710_v46 }
 0x511   : > { %6209 = vmatprep.mubr.bf16.mxu1 %v11811_v33 }
 0x512   : > { %6355 = vmatmul.mubr.bf16.gmra.mxu0 %v11764_v7 }
 0x513   : > { %6362 = vmatprep.mubr.bf16.mxu0 %v11739_v42 }
 0x518   : > { %6210 = vmatmul.mubr.bf16.gmra.mxu1 %v11739_v42 }
 0x519   : > { %6217 = vmatprep.mubr.bf16.mxu1 %v11834_v3 }
 0x51a   : > { %6363 = vmatmul.mubr.bf16.gmra.mxu0 %v11790_v24 }
 0x51b   : > { %6370 = vmatprep.mubr.bf16.mxu0 %v11771_v31 }
 0x520   : > { %v8141_v56 = vpop.f32.mrf.mxu1  ;;  %6218 = vmatmul.mubr.bf16.gmra.mxu1 %v11771_v31  ;;  %v8140_v31 = vadd.f32 %v8139_v57, %v8138_v17 }
 0x521   : > { %v8247_v39 = vpop.f32.mrf.mxu0  ;;  %6225 = vmatprep.mubr.bf16.mxu1 %v11857_v36 }
 0x522   : > { %6371 = vmatmul.mubr.bf16.gmra.mxu0 %v11822_v10  ;;  %v8142_v11 = vpop.f32.mrf.mxu1 }
 0x523   : > { %v8143_v58 = vadd.f32 %v8142_v11, %v8141_v56  ;;  %6378 = vmatprep.mubr.bf16.mxu0 %v11797_v14  ;;  %v8248_v61 = vpop.f32.mrf.mxu0 }
 0x524   : > { %v8249_v49 = vadd.f32 %v8248_v61, %v8247_v39  ;;  %v8144_v15 = vpop.f32.mrf.mxu1 }
 0x525   : > { %v8250_v46 = vpop.f32.mrf.mxu0 }
 0x526   : > { %v12024_v26 = vadd.f32 %v8249_v49, %v11945_v41  ;;  %v8145_v42 = vpop.f32.mrf.mxu1 }
 0x527   : > { %v8146_v34 = vadd.f32 %v8145_v42, %v8144_v15  ;;  %v8251_v7 = vpop.f32.mrf.mxu0 }
 0x528   : > { %v8252_v24 = vadd.f32 %v8251_v7, %v8250_v46  ;;  %v8147_v25 = vpop.f32.mrf.mxu1  ;;  %6226 = vmatmul.mubr.bf16.gmra.mxu1 %v11797_v14 }
 0x529   : > { %v8253_v10 = vpop.f32.mrf.mxu0  ;;  %6233 = vmatprep.mubr.bf16.mxu1 %v11883_v27 }
 0x52a   : > { %v12028_v21 = vadd.f32 %v8252_v24, %v8140_v31  ;;  %6379 = vmatmul.mubr.bf16.gmra.mxu0 %v11832_v8  ;;  %v8148_v52 = vpop.f32.mrf.mxu1 }
 0x52b   : > { %v8149_v47 = vadd.f32 %v8148_v52, %v8147_v25  ;;  %6386 = vmatprep.mubr.bf16.mxu0 %v11815_v16  ;;  %v8254_v4 = vpop.f32.mrf.mxu0 }
 0x52c   : > { %v8255_v28 = vadd.f32 %v8254_v4, %v8253_v10  ;;  %v8150_v44 = vpop.f32.mrf.mxu1 }
 0x52d   : > { %v8256_v30 = vpop.f32.mrf.mxu0 }
 0x52e   : > { %v12032_v41 = vadd.f32 %v8255_v28, %v8143_v58  ;;  %v8151_v12 = vpop.f32.mrf.mxu1 }
 0x52f   : > { %v8152_v23 = vadd.f32 %v8151_v12, %v8150_v44  ;;  %v8257_v14 = vpop.f32.mrf.mxu0 }
 0x530   : > { %v8258_v2 = vadd.f32 %v8257_v14, %v8256_v30  ;;  %v8153_v18 = vpop.f32.mrf.mxu1  ;;  %6234 = vmatmul.mubr.bf16.gmra.mxu1 %v11815_v16 }
 0x531   : > { %v8259_v29 = vpop.f32.mrf.mxu0  ;;  %6241 = vmatprep.mubr.bf16.mxu1 %v11904_v40 }
 0x532   : > { %v12036_v8 = vadd.f32 %v8258_v2, %v8146_v34  ;;  %6387 = vmatmul.mubr.bf16.gmra.mxu0 %v11861_v59  ;;  %v8154_v62 = vpop.f32.mrf.mxu1 }
 0x533   : > { %v8155_v55 = vadd.f32 %v8154_v62, %v8153_v18  ;;  %6394 = vmatprep.mubr.bf16.mxu0 %v11841_v9  ;;  %v8260_v43 = vpop.f32.mrf.mxu0 }
 0x534   : > { %v8261_v45 = vadd.f32 %v8260_v43, %v8259_v29  ;;  %v8156_v50 = vpop.f32.mrf.mxu1 }
 0x535   : > { %v8262_v53 = vpop.f32.mrf.mxu0 }
 0x536   : > { %v12040_v17 = vadd.f32 %v8261_v45, %v8149_v47  ;;  %v8157_v57 = vpop.f32.mrf.mxu1 }
 0x537   : > { %v8158_v56 = vadd.f32 %v8157_v57, %v8156_v50  ;;  %v8263_v16 = vpop.f32.mrf.mxu0 }
 0x538   : > { %v8264_v39 = vadd.f32 %v8263_v16, %v8262_v53  ;;  %v8159_v11 = vpop.f32.mrf.mxu1  ;;  %6242 = vmatmul.mubr.bf16.gmra.mxu1 %v11841_v9 }
 0x539   : > { %v8265_v58 = vpop.f32.mrf.mxu0  ;;  %6249 = vmatprep.mubr.bf16.mxu1 %v11923_v48 }
 0x53a   : > { %v12044_v59 = vadd.f32 %v8264_v39, %v8152_v23  ;;  %6395 = vmatmul.mubr.bf16.gmra.mxu0 %v11881_v1  ;;  %v8160_v61 = vpop.f32.mrf.mxu1 }
 0x53b   : > { %v8161_v49 = vadd.f32 %v8160_v61, %v8159_v11  ;;  %6402 = vmatprep.mubr.bf16.mxu0 %v11867_v38  ;;  %v8266_v15 = vpop.f32.mrf.mxu0 }
 0x53c   : > { %v8267_v46 = vadd.f32 %v8266_v15, %v8265_v58  ;;  %v8162_v42 = vpop.f32.mrf.mxu1 }
 0x53d   : > { %v8268_v34 = vpop.f32.mrf.mxu0 }
 0x53e   : > { %v12048_v7 = vadd.f32 %v8267_v46, %v8155_v55  ;;  %v8163_v31 = vpop.f32.mrf.mxu1  ;;  %v12885_v46 = vmov 0.0|0.0  }
 0x53f   : > { %v8164_v24 = vadd.f32 %v8163_v31, %v8162_v42  ;;  %v8269_v9 = vpop.f32.mrf.mxu0 }
 0x540   : > { %v8270_v25 = vadd.f32 %v8269_v9, %v8268_v34  ;;  %v8165_v10 = vpop.f32.mrf.mxu1  ;;  %6250 = vmatmul.mubr.bf16.gmra.mxu1 %v11867_v38 }
 0x541   : > { %v8271_v52 = vpop.f32.mrf.mxu0  ;;  %6257 = vmatprep.mubr.bf16.mxu1 %v11940_v13 }
 0x542   : > { %v12052_v1 = vadd.f32 %v8270_v25, %v8158_v56  ;;  %6403 = vmatmul.mubr.bf16.gmra.mxu0 %v11902_v32  ;;  %v8166_v47 = vpop.f32.mrf.mxu1 }
 0x543   : > { %v8167_v4 = vadd.f32 %v8166_v47, %v8165_v10  ;;  %6410 = vmatprep.mubr.bf16.mxu0 %v11887_v63  ;;  %v8272_v28 = vpop.f32.mrf.mxu0  ;;  %v12886_v47 = vld [vmem:[#allocation25_spill] sm:$0xff] }
 0x544   : > { %v8273_v44 = vadd.f32 %v8272_v28, %v8271_v52  ;;  %v8168_v30 = vpop.f32.mrf.mxu1 }
 0x545   : > { %v8274_v12 = vpop.f32.mrf.mxu0 }
 0x546   : > { %v12056_v23 = vadd.f32 %v8273_v44, %v8161_v49  ;;  %v8169_v14 = vpop.f32.mrf.mxu1 }
 0x547   : > { %v8170_v2 = vadd.f32 %v8169_v14, %v8168_v30  ;;  %v8275_v38 = vpop.f32.mrf.mxu0 }
 0x548   : > { %v8276_v18 = vadd.f32 %v8275_v38, %v8274_v12  ;;  %v8171_v29 = vpop.f32.mrf.mxu1  ;;  %6258 = vmatmul.mubr.bf16.gmra.mxu1 %v11887_v63 }
 0x549   : > { %6265 = vmatprep.mubr.bf16.mxu1 %v11956_v0 }
 0x54a   : > { %v12060_v32 = vadd.f32 %v8276_v18, %v8164_v24  ;;  %v8277_v62 = vpop.f32.mrf.mxu0  ;;  %6411 = vmatmul.mubr.bf16.gmra.mxu0 %v11935_v20  ;;  %v8172_v55 = vpop.f32.mrf.mxu1 }
 0x54b   : > { %v8173_v43 = vadd.f32 %v8172_v55, %v8171_v29  ;;  %6418 = vmatprep.mubr.bf16.mxu0 %v11951_v60 }
 0x54c   : > { %v8278_v45 = vpop.f32.mrf.mxu0  ;;  %v8174_v50 = vpop.f32.mrf.mxu1 }
 0x54d   : > { %v8279_v53 = vadd.f32 %v8278_v45, %v8277_v62 }
 0x54e   : > { %v8280_v57 = vpop.f32.mrf.mxu0  ;;  %v8175_v56 = vpop.f32.mrf.mxu1 }
 0x54f   : > { %v12064_v16 = vadd.f32 %v8279_v53, %v8167_v4  ;;  %v8176_v39 = vadd.f32 %v8175_v56, %v8174_v50 }
 0x550   : > { %v8281_v63 = vpop.f32.mrf.mxu0  ;;  %v8177_v11 = vpop.f32.mrf.mxu1  ;;  %6266 = vmatmul.mubr.bf16.gmra.mxu1 %v11951_v60 }
 0x551   : > { %v8282_v58 = vadd.f32 %v8281_v63, %v8280_v57  ;;  %8751 = vmatprep.mubr.bf16.mxu1 %v11517_v51 }
 0x552   : > { %v8283_v20 = vpop.f32.mrf.mxu0  ;;  %6419 = vmatmul.mubr.bf16.gmra.mxu0 %v11943_v35  ;;  %v8178_v61 = vpop.f32.mrf.mxu1 }
 0x553   : > { %v12069_v49 = vadd.f32 %v8282_v58, %v8170_v2  ;;  %v8179_v15 = vadd.f32 %v8178_v61, %v8177_v11  ;;  %6426 = vmatprep.mubr.bf16.mxu0 %v12885_v46 }
 0x554   : > { %v8284_v42 = vpop.f32.mrf.mxu0  ;;  %v8180_v34 = vpop.f32.mrf.mxu1 }
 0x555   : > { %v8285_v31 = vadd.f32 %v8284_v42, %v8283_v20 }
 0x556   : > { %v8286_v24 = vpop.f32.mrf.mxu0  ;;  %v8181_v9 = vpop.f32.mrf.mxu1 }
 0x557   : > { %v12072_v25 = vadd.f32 %v8285_v31, %v8173_v43  ;;  %v8182_v60 = vadd.f32 %v8181_v9, %v8180_v34 }
 0x558   : > { %v8287_v10 = vpop.f32.mrf.mxu0  ;;  %v8183_v52 = vpop.f32.mrf.mxu1  ;;  %8752 = vmatmul.mubr.bf16.vlgmr.msra.gmra.mxu1 %v11572_v37 }
 0x559   : > { %v8288_v51 = vadd.f32 %v8287_v10, %v8286_v24  ;;  %8755 = vmatprep.mubr.bf16.mxu1 %v11635_v22 }
 0x55a   : > { %v8289_v35 = vpop.f32.mrf.mxu0  ;;  %6427 = vmatmul.mubr.bf16.gmra.mxu0 %v12886_v47  ;;  %v8184_v4 = vpop.f32.mrf.mxu1 }
 0x55b   : > { %v12077_v28 = vadd.f32 %v8288_v51, %v8176_v39  ;;  %v8185_v44 = vadd.f32 %v8184_v4, %v8183_v52 }
 0x55c   : > { %v8290_v30 = vpop.f32.mrf.mxu0  ;;  %v8186_v12 = vpop.f32.mrf.mxu1 }
 0x55d   : > { %v8291_v14 = vadd.f32 %v8290_v30, %v8289_v35 }
 0x55e   : > { %v8292_v2 = vpop.f32.mrf.mxu0  ;;  %v8187_v38 = vpop.f32.mrf.mxu1 }
 0x55f   : > { %v12079_v18 = vadd.f32 %v8291_v14, %v8179_v15  ;;  %v8188_v29 = vadd.f32 %v8187_v38, %v8186_v12 }
 0x560   : > { %v8293_v62 = vpop.f32.mrf.mxu0  ;;  %v8189_v37 = vpop.f32.mrf.mxu1  ;;  %8756 = vmatmul.mubr.bf16.gmra.mxu1 %v11693_v54 }
 0x561   : > { %v8294_v22 = vadd.f32 %v8293_v62, %v8292_v2  ;;  %8759 = vmatprep.mubr.bf16.mxu1 %v11732_v6 }
 0x562   : > { %v8295_v55 = vpop.f32.mrf.mxu0  ;;  %v8190_v43 = vpop.f32.mrf.mxu1 }
 0x563   : > { %v12083_v45 = vadd.f32 %v8294_v22, %v8182_v60  ;;  %v8191_v50 = vadd.f32 %v8190_v43, %v8189_v37 }
 0x564   : > { %v8296_v53 = vpop.f32.mrf.mxu0  ;;  %v8192_v57 = vpop.f32.mrf.mxu1 }
 0x565   : > { %v8297_v56 = vadd.f32 %v8296_v53, %v8295_v55 }
 0x566   : > { %v8298_v39 = vpop.f32.mrf.mxu0  ;;  %v8193_v63 = vpop.f32.mrf.mxu1 }
 0x567   : > { %v12085_v11 = vadd.f32 %v8297_v56, %v8185_v44  ;;  %v8194_v58 = vadd.f32 %v8193_v63, %v8192_v57 }
 0x568   : > { %v8299_v20 = vpop.f32.mrf.mxu0  ;;  %v8195_v61 = vpop.f32.mrf.mxu1  ;;  %8760 = vmatmul.mubr.bf16.gmra.mxu1 %v11759_v19 }
 0x569   : > { %v8300_v54 = vadd.f32 %v8299_v20, %v8298_v39  ;;  %8763 = vmatprep.mubr.bf16.mxu1 %v11788_v5 }
 0x56a   : > { %v8301_v6 = vpop.f32.mrf.mxu0  ;;  %v8196_v15 = vpop.f32.mrf.mxu1 }
 0x56b   : > { %v12089_v46 = vadd.f32 %v8300_v54, %v8188_v29  ;;  %v8197_v42 = vadd.f32 %v8196_v15, %v8195_v61 }
 0x56c   : > { %v8302_v34 = vpop.f32.mrf.mxu0  ;;  %v8198_v31 = vpop.f32.mrf.mxu1 }
 0x56d   : > { %v8303_v24 = vadd.f32 %v8302_v34, %v8301_v6 }
 0x56e   : > { %v8304_v9 = vpop.f32.mrf.mxu0  ;;  %v8199_v60 = vpop.f32.mrf.mxu1 }
 0x56f   : > { %v12091_v10 = vadd.f32 %v8303_v24, %v8191_v50  ;;  %v8200_v52 = vadd.f32 %v8199_v60, %v8198_v31 }
 0x570   : > { %v8305_v51 = vpop.f32.mrf.mxu0  ;;  %v8201_v35 = vpop.f32.mrf.mxu1  ;;  %8764 = vmatmul.mubr.bf16.gmra.mxu1 %v11811_v33 }
 0x571   : > { %v8306_v19 = vadd.f32 %v8305_v51, %v8304_v9  ;;  %8767 = vmatprep.mubr.bf16.mxu1 %v11834_v3 }
 0x572   : > { %v8307_v5 = vpop.f32.mrf.mxu0  ;;  %v8202_v47 = vpop.f32.mrf.mxu1 }
 0x573   : > { %v12095_v4 = vadd.f32 %v8306_v19, %v8194_v58  ;;  %v8203_v44 = vadd.f32 %v8202_v47, %v8201_v35 }
 0x574   : > { %v8308_v30 = vpop.f32.mrf.mxu0  ;;  %v8204_v12 = vpop.f32.mrf.mxu1 }
 0x575   : > { %v8309_v14 = vadd.f32 %v8308_v30, %v8307_v5 }
 0x576   : > { %v8310_v2 = vpop.f32.mrf.mxu0  ;;  %v8205_v38 = vpop.f32.mrf.mxu1 }
 0x577   : > { %v12097_v29 = vadd.f32 %v8309_v14, %v8197_v42  ;;  %v8206_v62 = vadd.f32 %v8205_v38, %v8204_v12 }
 0x578   : > { %v8311_v37 = vpop.f32.mrf.mxu0  ;;  %v8207_v22 = vpop.f32.mrf.mxu1  ;;  %8768 = vmatmul.mubr.bf16.gmra.mxu1 %v11857_v36 }
 0x579   : > { %v8312_v33 = vadd.f32 %v8311_v37, %v8310_v2  ;;  %8771 = vmatprep.mubr.bf16.mxu1 %v11883_v27 }
 0x57a   : > { %v8313_v3 = vpop.f32.mrf.mxu0  ;;  %v8208_v55 = vpop.f32.mrf.mxu1 }
 0x57b   : > { %v12101_v43 = vadd.f32 %v8312_v33, %v8200_v52  ;;  %v8209_v50 = vadd.f32 %v8208_v55, %v8207_v22 }
 0x57c   : > { %v8314_v53 = vpop.f32.mrf.mxu0  ;;  %v8210_v57 = vpop.f32.mrf.mxu1 }
 0x57d   : > { %v8315_v56 = vadd.f32 %v8314_v53, %v8313_v3  ;;  %v12887_v3 = vld [vmem:[#allocation27_spill] sm:$0xff] }
 0x57e   : > { %v8316_v39 = vpop.f32.mrf.mxu0  ;;  %v8211_v63 = vpop.f32.mrf.mxu1 }
 0x57f   : > { %v12103_v58 = vadd.f32 %v8315_v56, %v8203_v44  ;;  %v8212_v20 = vadd.f32 %v8211_v63, %v8210_v57 }
 0x580   : > { %v8317_v61 = vpop.f32.mrf.mxu0  ;;  %v8213_v54 = vpop.f32.mrf.mxu1  ;;  %8772 = vmatmul.mubr.bf16.gmra.mxu1 %v11904_v40 }
 0x581   : > { %v8318_v36 = vadd.f32 %v8317_v61, %v8316_v39  ;;  %8775 = vmatprep.mubr.bf16.mxu1 %v11923_v48 }
 0x582   : > { %v8319_v27 = vpop.f32.mrf.mxu0  ;;  %v8214_v6 = vpop.f32.mrf.mxu1 }
 0x583   : > { %v12107_v15 = vadd.f32 %v8318_v36, %v8206_v62  ;;  %v8215_v42 = vadd.f32 %v8214_v6, %v8213_v54 }
 0x584   : > { %v8320_v34 = vpop.f32.mrf.mxu0  ;;  %v8216_v31 = vpop.f32.mrf.mxu1 }
 0x585   : > { %v8321_v24 = vadd.f32 %v8320_v34, %v8319_v27 }
 0x586   : > { %v8322_v9 = vpop.f32.mrf.mxu0  ;;  %v8217_v60 = vpop.f32.mrf.mxu1 }
 0x587   : > { %v12109_v52 = vadd.f32 %v8321_v24, %v8209_v50  ;;  %v8218_v51 = vadd.f32 %v8217_v60, %v8216_v31 }
 0x588   : > { %v8323_v35 = vpop.f32.mrf.mxu0  ;;  %v8219_v19 = vpop.f32.mrf.mxu1  ;;  %8776 = vmatmul.mubr.bf16.gmra.mxu1 %v11940_v13 }
 0x589   : > { %v8324_v40 = vadd.f32 %v8323_v35, %v8322_v9  ;;  %8779 = vmatprep.mubr.bf16.mxu1 %v11956_v0 }
 0x58a   : > { %v8325_v48 = vpop.f32.mrf.mxu0  ;;  %v8220_v5 = vpop.f32.mrf.mxu1 }
 0x58b   : > { %v12113_v47 = vadd.f32 %v8324_v40, %v8212_v20  ;;  %v8221_v44 = vadd.f32 %v8220_v5, %v8219_v19 }
 0x58c   : > { %v8326_v30 = vpop.f32.mrf.mxu0  ;;  %v8222_v12 = vpop.f32.mrf.mxu1 }
 0x58d   : > { %v8327_v14 = vadd.f32 %v8326_v30, %v8325_v48 }
 0x58e   : > { %v8328_v2 = vpop.f32.mrf.mxu0  ;;  %v8223_v38 = vpop.f32.mrf.mxu1 }
 0x58f   : > { %v12115_v62 = vadd.f32 %v8327_v14, %v8215_v42  ;;  %v8224_v37 = vadd.f32 %v8223_v38, %v8222_v12 }
 0x590   : > { %v8329_v22 = vpop.f32.mrf.mxu0  ;;  %v8225_v33 = vpop.f32.mrf.mxu1  ;;  %8780 = vmatmul.mubr.bf16.gmra.mxu1 %v12887_v3 }
 0x591   : > { %v8330_v13 = vadd.f32 %v8329_v22, %v8328_v2 }
 0x592   : > { %v8331_v55 = vpop.f32.mrf.mxu0  ;;  %v8226_v0 = vpop.f32.mrf.mxu1 }
 0x593   : > { %v12118_v50 = vadd.f32 %v8330_v13, %v8218_v51  ;;  %v8227_v53 = vadd.f32 %v8226_v0, %v8225_v33 }
 0x594   : > { %v8332_v57 = vpop.f32.mrf.mxu0  ;;  %v8228_v56 = vpop.f32.mrf.mxu1 }
 0x595   : > { %v8333_v39 = vadd.f32 %v8332_v57, %v8331_v55 }
 0x596   : > { %v8334_v63 = vpop.f32.mrf.mxu0  ;;  %v8229_v20 = vpop.f32.mrf.mxu1 }
 0x597   : > { %v12120_v61 = vadd.f32 %v8333_v39, %v8221_v44  ;;  %v8230_v54 = vadd.f32 %v8229_v20, %v8228_v56 }
 0x598   : > { %v8335_v36 = vpop.f32.mrf.mxu0  ;;  %v8359_v27 = vpop.f32.mrf.mxu1 }
 0x599   : > { %v8336_v6 = vadd.f32 %v8335_v36, %v8334_v63 }
 0x59a   : > { %v8337_v42 = vpop.f32.mrf.mxu0  ;;  %v8360_v34 = vpop.f32.mrf.mxu1 }
 0x59b   : > { %v12122_v31 = vadd.f32 %v8336_v6, %v8224_v37  ;;  %v8361_v24 = vadd.f32 %v8360_v34, %v8359_v27 }
 0x59c   : > { %v8338_v9 = vpop.f32.mrf.mxu0  ;;  %v8362_v60 = vpop.f32.mrf.mxu1 }
 0x59d   : > { %v6148_v51 = vadd.f32 %v8361_v24, %v12024_v26  ;;  %v8339_v35 = vadd.f32 %v8338_v9, %v8337_v42 }
 0x59e   : > { %v8340_v19 = vpop.f32.mrf.mxu0  ;;  %v8363_v40 = vpop.f32.mrf.mxu1 }
 0x59f   : > { %v12125_v48 = vadd.f32 %v8339_v35, %v8227_v53  ;;  %v8364_v5 = vadd.f32 %v8363_v40, %v8362_v60 }
 0x5a0   : > { %v8341_v44 = vpop.f32.mrf.mxu0  ;;  %v8365_v30 = vpop.f32.mrf.mxu1 }
 0x5a1   : > { %12888 = vst [vmem:[#allocation54_spill] sm:$0xff] %v12125_v48  ;;  %v6151_v12 = vadd.f32 %v8364_v5, %v12028_v21  ;;  %v8342_v14 = vadd.f32 %v8341_v44, %v8340_v19 }
 0x5a2   : > { %v8471_v2 = vpop.f32.mrf.mxu0  ;;  %v8366_v38 = vpop.f32.mrf.mxu1 }
 0x5a3   : > { %v12128_v37 = vadd.f32 %v8342_v14, %v8230_v54  ;;  %v8367_v22 = vadd.f32 %v8366_v38, %v8365_v30 }
 0x5a4   : > { %v8472_v33 = vpop.f32.mrf.mxu0  ;;  %v8368_v3 = vpop.f32.mrf.mxu1 }
 0x5a5   : > { %12889 = vst [vmem:[#allocation49_spill] sm:$0xff] %v12128_v37  ;;  %v12131_v26 = vadd.f32 %v8367_v22, %v12032_v41  ;;  %v8473_v13 = vadd.f32 %v8472_v33, %v8471_v2 }
 0x5a6   : > { %v8474_v55 = vpop.f32.mrf.mxu0  ;;  %v8369_v0 = vpop.f32.mrf.mxu1 }
 0x5a7   : > { %v8370_v53 = vadd.f32 %v8369_v0, %v8368_v3  ;;  %v12133_v57 = vadd.f32 %v8473_v13, %v6148_v51 }
 0x5a8   : > { %v8475_v56 = vpop.f32.mrf.mxu0  ;;  %v8371_v39 = vpop.f32.mrf.mxu1 }
 0x5a9   : > { %v12136_v21 = vadd.f32 %v8370_v53, %v12036_v8  ;;  %v8476_v63 = vadd.f32 %v8475_v56, %v8474_v55 }
 0x5aa   : > { %v12138_v20 = vpop.f32.mrf.mxu0  ;;  %v8372_v54 = vpop.f32.mrf.mxu1 }
 0x5ab   : > { %v8373_v36 = vadd.f32 %v8372_v54, %v8371_v39  ;;  %v12140_v27 = vadd.f32 %v8476_v63, %v6151_v12 }
 0x5ac   : > { %v12142_v41 = vpop.f32.mrf.mxu0  ;;  %v8374_v6 = vpop.f32.mrf.mxu1 }
 0x5ad   : > { %v12145_v42 = vadd.f32 %v8373_v36, %v12040_v17 }
 0x5ae   : > { %v12147_v34 = vpop.f32.mrf.mxu0  ;;  %v8375_v24 = vpop.f32.mrf.mxu1 }
 0x5af   : > { %v8376_v9 = vadd.f32 %v8375_v24, %v8374_v6 }
 0x5b0   : > { %v12149_v60 = vpop.f32.mrf.mxu0  ;;  %v8377_v8 = vpop.f32.mrf.mxu1 }
 0x5b1   : > { %v12152_v51 = vadd.f32 %v8376_v9, %v12044_v59 }
 0x5b2   : > { %v12154_v35 = vpop.f32.mrf.mxu0  ;;  %v8378_v19 = vpop.f32.mrf.mxu1 }
 0x5b3   : > { %v8379_v40 = vadd.f32 %v8378_v19, %v8377_v8 }
 0x5b4   : > { %v12156_v5 = vpop.f32.mrf.mxu0  ;;  %v8380_v44 = vpop.f32.mrf.mxu1 }
 0x5b5   : > { %v12159_v17 = vadd.f32 %v8379_v40, %v12048_v7 }
 0x5b6   : > { %v12161_v30 = vpop.f32.mrf.mxu0  ;;  %v8381_v12 = vpop.f32.mrf.mxu1 }
 0x5b7   : > { %v8382_v14 = vadd.f32 %v8381_v12, %v8380_v44 }
 0x5b8   : > { %v12163_v2 = vpop.f32.mrf.mxu0  ;;  %v8383_v38 = vpop.f32.mrf.mxu1 }
 0x5b9   : > { %v12166_v59 = vadd.f32 %v8382_v14, %v12052_v1 }
 0x5ba   : > { %v12168_v22 = vpop.f32.mrf.mxu0  ;;  %v8384_v33 = vpop.f32.mrf.mxu1 }
 0x5bb   : > { %v8385_v3 = vadd.f32 %v8384_v33, %v8383_v38 }
 0x5bc   : > { %v12170_v13 = vpop.f32.mrf.mxu0  ;;  %v8386_v55 = vpop.f32.mrf.mxu1 }
 0x5bd   : > { %v12173_v7 = vadd.f32 %v8385_v3, %v12056_v23 }
 0x5be   : > { %v12175_v0 = vpop.f32.mrf.mxu0  ;;  %v8387_v53 = vpop.f32.mrf.mxu1 }
 0x5bf   : > { %v8388_v56 = vadd.f32 %v8387_v53, %v8386_v55 }
 0x5c0   : > { %v12177_v39 = vpop.f32.mrf.mxu0  ;;  %v8389_v63 = vpop.f32.mrf.mxu1 }
 0x5c1   : > { %v12180_v1 = vadd.f32 %v8388_v56, %v12060_v32 }
 0x5c2   : > { %v12182_v54 = vpop.f32.mrf.mxu0  ;;  %v8390_v36 = vpop.f32.mrf.mxu1 }
 0x5c3   : > { %v8391_v6 = vadd.f32 %v8390_v36, %v8389_v63 }
 0x5c4   : > { %v12184_v24 = vpop.f32.mrf.mxu0  ;;  %v8392_v9 = vpop.f32.mrf.mxu1 }
 0x5c5   : > { %v12187_v23 = vadd.f32 %v8391_v6, %v12064_v16 }
 0x5c6   : > { %v12189_v8 = vpop.f32.mrf.mxu0  ;;  %v8393_v19 = vpop.f32.mrf.mxu1 }
 0x5c7   : > { %v8394_v40 = vadd.f32 %v8393_v19, %v8392_v9 }
 0x5c8   : > { %v12191_v44 = vpop.f32.mrf.mxu0  ;;  %v8395_v12 = vpop.f32.mrf.mxu1 }
 0x5c9   : > { %v12194_v32 = vadd.f32 %v8394_v40, %v12069_v49 }
 0x5ca   : > { %v12196_v14 = vpop.f32.mrf.mxu0  ;;  %v8396_v38 = vpop.f32.mrf.mxu1 }
 0x5cb   : > { %v8397_v33 = vadd.f32 %v8396_v38, %v8395_v12 }
 0x5cc   : > { %v12198_v3 = vpop.f32.mrf.mxu0  ;;  %v8398_v55 = vpop.f32.mrf.mxu1 }
 0x5cd   : > { %v12201_v16 = vadd.f32 %v8397_v33, %v12072_v25 }
 0x5ce   : > { %v12203_v53 = vpop.f32.mrf.mxu0  ;;  %v8399_v56 = vpop.f32.mrf.mxu1 }
 0x5cf   : > { %12890 = vst [vmem:[#allocation30_spill] sm:$0xff] %v12201_v16  ;;  %v8400_v63 = vadd.f32 %v8399_v56, %v8398_v55 }
 0x5d0   : > { %v12205_v36 = vpop.f32.mrf.mxu0  ;;  %v8401_v6 = vpop.f32.mrf.mxu1 }
 0x5d1   : > { %v12208_v49 = vadd.f32 %v8400_v63, %v12077_v28 }
 0x5d2   : > { %v12210_v9 = vpop.f32.mrf.mxu0  ;;  %v8402_v19 = vpop.f32.mrf.mxu1 }
 0x5d3   : > { %12891 = vst [vmem:[#allocation57_spill] sm:$0xff] %v12208_v49  ;;  %v8403_v40 = vadd.f32 %v8402_v19, %v8401_v6 }
 0x5d4   : > { %v12212_v12 = vpop.f32.mrf.mxu0  ;;  %v8404_v38 = vpop.f32.mrf.mxu1 }
 0x5d5   : > { %v12215_v25 = vadd.f32 %v8403_v40, %v12079_v18 }
 0x5d6   : > { %v12217_v33 = vpop.f32.mrf.mxu0  ;;  %v8405_v37 = vpop.f32.mrf.mxu1 }
 0x5d7   : > { %12892 = vst [vmem:[#allocation53_spill] sm:$0xff] %v12215_v25  ;;  %12893 = vst [vmem:[#allocation60_spill] sm:$0xff] %v12217_v33  ;;  %v8406_v55 = vadd.f32 %v8405_v37, %v8404_v38 }
 0x5d8   : > { %v12219_v56 = vpop.f32.mrf.mxu0  ;;  %v8407_v48 = vpop.f32.mrf.mxu1 }
 0x5d9   : > { %12894 = vst [vmem:[#allocation61_spill] sm:$0xff] %v12219_v56  ;;  %v12222_v28 = vadd.f32 %v8406_v55, %v12083_v45 }
 0x5da   : > { %v12224_v63 = vpop.f32.mrf.mxu0  ;;  %v8408_v49 = vpop.f32.mrf.mxu1 }
 0x5db   : > { %12895 = vst [vmem:[#allocation34_spill] sm:$0xff] %v12222_v28  ;;  %v8409_v6 = vadd.f32 %v8408_v49, %v8407_v48 }
 0x5dc   : > { %v12226_v19 = vpop.f32.mrf.mxu0  ;;  %v8410_v16 = vpop.f32.mrf.mxu1 }
 0x5dd   : > { %v12229_v18 = vadd.f32 %v8409_v6, %v12085_v11 }
 0x5de   : > { %v12231_v40 = vpop.f32.mrf.mxu0  ;;  %v8411_v33 = vpop.f32.mrf.mxu1 }
 0x5df   : > { %12896 = vst [vmem:[#allocation56_spill] sm:$0xff] %v12229_v18  ;;  %v8412_v37 = vadd.f32 %v8411_v33, %v8410_v16 }
 0x5e0   : > { %v12233_v38 = vpop.f32.mrf.mxu0  ;;  %v8413_v56 = vpop.f32.mrf.mxu1 }
 0x5e1   : > { %12897 = vst [vmem:[#allocation66_spill] sm:$0xff] %v12233_v38  ;;  %v12236_v45 = vadd.f32 %v8412_v37, %v12089_v46 }
 0x5e2   : > { %v12238_v55 = vpop.f32.mrf.mxu0  ;;  %v8414_v28 = vpop.f32.mrf.mxu1 }
 0x5e3   : > { %12898 = vst [vmem:[#allocation39_spill] sm:$0xff] %v12236_v45  ;;  %v8415_v48 = vadd.f32 %v8414_v28, %v8413_v56 }
 0x5e4   : > { %v12240_v49 = vpop.f32.mrf.mxu0  ;;  %v8416_v25 = vpop.f32.mrf.mxu1 }
 0x5e5   : > { %12899 = vst [vmem:[#allocation77_spill] sm:$0xff] %v12240_v49  ;;  %v12243_v11 = vadd.f32 %v8415_v48, %v12091_v10 }
 0x5e6   : > { %v12245_v6 = vpop.f32.mrf.mxu0  ;;  %v8417_v18 = vpop.f32.mrf.mxu1 }
 0x5e7   : > { %12900 = vst [vmem:[#allocation59_spill] sm:$0xff] %v12243_v11  ;;  %12901 = vst [vmem:[#allocation73_spill] sm:$0xff] %v12245_v6  ;;  %v8418_v16 = vadd.f32 %v8417_v18, %v8416_v25 }
 0x5e8   : > { %v12247_v33 = vpop.f32.mrf.mxu0  ;;  %v8419_v38 = vpop.f32.mrf.mxu1 }
 0x5e9   : > { %12902 = vst [vmem:[#allocation74_spill] sm:$0xff] %v12247_v33  ;;  %v12250_v46 = vadd.f32 %v8418_v16, %v12095_v4 }
 0x5ea   : > { %v12252_v37 = vpop.f32.mrf.mxu0  ;;  %v8420_v45 = vpop.f32.mrf.mxu1 }
 0x5eb   : > { %12903 = vst [vmem:[#allocation43_spill] sm:$0xff] %v12250_v46  ;;  %v8421_v56 = vadd.f32 %v8420_v45, %v8419_v38 }
 0x5ec   : > { %v12254_v28 = vpop.f32.mrf.mxu0  ;;  %v8422_v49 = vpop.f32.mrf.mxu1 }
 0x5ed   : > { %v12257_v10 = vadd.f32 %v8421_v56, %v12097_v29 }
 0x5ee   : > { %v12259_v48 = vpop.f32.mrf.mxu0  ;;  %v8423_v6 = vpop.f32.mrf.mxu1 }
 0x5ef   : > { %12904 = vst [vmem:[#allocation63_spill] sm:$0xff] %v12257_v10  ;;  %v8424_v25 = vadd.f32 %v8423_v6, %v8422_v49 }
 0x5f0   : > { %v12261_v18 = vpop.f32.mrf.mxu0  ;;  %v8425_v33 = vpop.f32.mrf.mxu1 }
 0x5f1   : > { %12905 = vst [vmem:[#allocation47_spill] sm:$0xff] %v12261_v18  ;;  %v12264_v4 = vadd.f32 %v8424_v25, %v12101_v43 }
 0x5f2   : > { %v12266_v16 = vpop.f32.mrf.mxu0  ;;  %v8426_v46 = vpop.f32.mrf.mxu1 }
 0x5f3   : > { %12906 = vst [vmem:[#allocation65_spill] sm:$0xff] %v12264_v4  ;;  %12907 = vst [vmem:[#allocation51_spill] sm:$0xff] %v12266_v16  ;;  %v8427_v38 = vadd.f32 %v8426_v46, %v8425_v33 }
 0x5f4   : > { %v12268_v45 = vpop.f32.mrf.mxu0  ;;  %v8428_v11 = vpop.f32.mrf.mxu1 }
 0x5f5   : > { %12908 = vst [vmem:[#allocation69_spill] sm:$0xff] %v12268_v45  ;;  %v12271_v29 = vadd.f32 %v8427_v38, %v12103_v58 }
 0x5f6   : > { %v8429_v56 = vpop.f32.mrf.mxu1  ;;  %v12273_v10 = vpop.f32.mrf.mxu0 }
 0x5f7   : > { %12909 = vst [vmem:[#allocation55_spill] sm:$0xff] %v12273_v10  ;;  %v8430_v49 = vadd.f32 %v8429_v56, %v8428_v11 }
 0x5f8   : > { %v8431_v6 = vpop.f32.mrf.mxu1  ;;  %v12278_v25 = vpop.f32.mrf.mxu0 }
 0x5f9   : > { %v12276_v18 = vadd.f32 %v8430_v49, %v12107_v15 }
 0x5fa   : > { %v8432_v43 = vpop.f32.mrf.mxu1  ;;  %v12283_v45 = vpop.f32.mrf.mxu0 }
 0x5fb   : > { %12910 = vst [vmem:[#allocation72_spill] sm:$0xff] %v12276_v18  ;;  %v8433_v4 = vadd.f32 %v8432_v43, %v8431_v6 }
 0x5fc   : > { %v8434_v16 = vpop.f32.mrf.mxu1  ;;  %v12288_v56 = vpop.f32.mrf.mxu0 }
 0x5fd   : > { %v12281_v33 = vadd.f32 %v8433_v4, %v12109_v52 }
 0x5fe   : > { %v8435_v46 = vpop.f32.mrf.mxu1  ;;  %v12293_v43 = vpop.f32.mrf.mxu0 }
 0x5ff   : > { %12911 = vst [vmem:[#allocation58_spill] sm:$0xff] %v12281_v33  ;;  %v8436_v58 = vadd.f32 %v8435_v46, %v8434_v16 }
 0x600   : > { %v8437_v38 = vpop.f32.mrf.mxu1  ;;  %v12298_v46 = vpop.f32.mrf.mxu0 }
 0x601   : > { %v12286_v10 = vadd.f32 %v8436_v58, %v12113_v47 }
 0x602   : > { %v8438_v11 = vpop.f32.mrf.mxu1 }
 0x603   : > { %12912 = vst [vmem:[#allocation76_spill] sm:$0xff] %v12286_v10  ;;  %v8439_v15 = vadd.f32 %v8438_v11, %v8437_v38  ;;  %v12303_v11 = vpop.f32.mrf.mxu0 }
 0x604   : > { %v8440_v49 = vpop.f32.mrf.mxu1 }
 0x605   : > { %v12291_v18 = vadd.f32 %v8439_v15, %v12115_v62 }
 0x606   : > { %v8441_v6 = vpop.f32.mrf.mxu1 }
 0x607   : > { %v8442_v52 = vadd.f32 %v8441_v6, %v8440_v49 }
 0x608   : > { %v8443_v4 = vpop.f32.mrf.mxu1 }
 0x609   : > { %v12296_v33 = vadd.f32 %v8442_v52, %v12118_v50  ;;  %v8479_v50 = vadd.f32 %v12142_v41, %v12138_v20  ;;  %v12314_v52 = vpop.f32.mrf.mxu0  ;;  %v12333_v41 = vld [vmem:[%s12599_s9] ss:$0 sm:$0xff] }
 0x60a   : > { %v8444_v16 = vpop.f32.mrf.mxu1 }
 0x60b   : > { %12913 = vst [vmem:[#allocation62_spill] sm:$0xff] %v12296_v33  ;;  %v8445_v47 = vadd.f32 %v8444_v16, %v8443_v4  ;;  %v8482_v16 = vadd.f32 %v12149_v60, %v12147_v34 }
 0x60c   : > { %v8446_v58 = vpop.f32.mrf.mxu1 }
 0x60d   : > { %v12301_v10 = vadd.f32 %v8445_v47, %v12120_v61  ;;  %v12322_v47 = vpop.f32.mrf.mxu0 }
 0x60e   : > { %v8447_v38 = vpop.f32.mrf.mxu1 }
 0x60f   : > { %12914 = vst [vmem:[#allocation64_spill] sm:$0xff] %v12301_v10  ;;  %v8448_v62 = vadd.f32 %v8447_v38, %v8446_v58  ;;  %v6317_v58 = vadd.f32 %v8479_v50, %v12131_v26  ;;  %v12328_v38 = vld [vmem:[%s12598_s8] ss:$0 sm:$0xff]  ;;  %v6320_v26 = vadd.f32 %v8482_v16, %v12136_v21  ;;  %v8485_v50 = vadd.f32 %v12156_v5, %v12154_v35 }
 0x610   : > { %v12305_v15 = vpop.f32.mrf.mxu1 }
 0x611   : > { %v12308_v49 = vadd.f32 %v8448_v62, %v12122_v31 }
 0x612   : > { %v12310_v6 = vpop.f32.mrf.mxu1 }
 0x613   : > { %12915 = vst [vmem:[#allocation68_spill] sm:$0xff] %v12308_v49  ;;  %v12335_v49 = vpop.f32.mrf.mxu0 }
 0x614   : > { %v12316_v4 = vpop.f32.mrf.mxu1 }
 0x615   : > { %12916 = vst [vmem:[#allocation67_spill] sm:$0xff] %v12316_v4 }
 0x616   : > { %v12318_v61 = vpop.f32.mrf.mxu1 }
 0x617   : > { %12917 = vst [vmem:[#allocation70_spill] sm:$0xff] %v12318_v61 }
 0x618   : > { %v8753_v31 = vpop.f32.mrf.mxu1 }
 0x619   : > { %v6478_v20 = vadd.f32 %v8753_v31, %v6317_v58  ;;  %v8491_v58 = vadd.f32 %v12170_v13, %v12168_v22 }
 0x61a   : > { %v6469_v62 = vpop.f32.mrf.mxu1 }
 0x61b   : > { %v6605_v34 = vmul.f32 %v12328_v38, %v6478_v20  ;;  %v6470_v60 = vadd.f32 %v6469_v62, %v12133_v57  ;;  %v8494_v20 = vadd.f32 %v12177_v39, %v12175_v0  ;;  %v12348_v57 = vpop.f32.mrf.mxu0  ;;  %v6333_v22 = vadd.f32 %v8491_v58, %v12159_v17 }
 0x61c   : > { %v8754_v31 = vpop.f32.mrf.mxu1  ;;  %v6325_v62 = vadd.f32 %v8485_v50, %v12145_v42  ;;  %v8503_v42 = vadd.f32 %v12198_v3, %v12196_v14  ;;  %v8506_v3 = vadd.f32 %v12205_v36, %v12203_v53 }
 0x61d   : > { %v6644_v10 = vadd.f32 %v12333_v41, %v6605_v34  ;;  %v6603_v61 = vmul.f32 %v12328_v38, %v6470_v60  ;;  %v6481_v4 = vadd.f32 %v8754_v31, %v6320_v26  ;;  %v8488_v34 = vadd.f32 %v12163_v2, %v12161_v30  ;;  %v12367_v30 = vpop.f32.mrf.mxu0 }
 0x61e   : > { %v6472_v33 = vpop.f32.mrf.mxu1  ;;  %v8497_v60 = vadd.f32 %v12184_v24, %v12182_v54 }
 0x61f   : > { %v6676_v21 = vmax.f32 %v6644_v10, 0.0  ;;  %v6642_v16 = vadd.f32 %v12333_v41, %v6603_v61  ;;  %v6606_v35 = vmul.f32 %v12328_v38, %v6481_v4  ;;  %v6473_v5 = vadd.f32 %v6472_v33, %v12140_v27 }
 0x620   : > { %v8757_v13 = vpop.f32.mrf.mxu1  ;;  %v6336_v33 = vadd.f32 %v8494_v20, %v12166_v59  ;;  %v6328_v14 = vadd.f32 %v8488_v34, %v12152_v51  ;;  %v8500_v51 = vadd.f32 %v12191_v44, %v12189_v8  ;;  %v6341_v36 = vadd.f32 %v8497_v60, %v12173_v7 }
 0x621   : > { %6708 = vst [vmem:[%s12359_s12 + $0x10] sm:$0xff] %v6676_v21  ;;  %v6674_v0 = vmax.f32 %v6642_v16, 0.0  ;;  %v6645_v39 = vadd.f32 %v12333_v41, %v6606_v35  ;;  %v6604_v27 = vmul.f32 %v12328_v38, %v6473_v5  ;;  %v6494_v10 = vadd.f32 %v8757_v13, %v6333_v22  ;;  %v12380_v16 = vpop.f32.mrf.mxu0 }
 0x622   : > { %v6485_v17 = vpop.f32.mrf.mxu1  ;;  %v6349_v5 = vadd.f32 %v8503_v42, %v12187_v23  ;;  %v6352_v23 = vadd.f32 %v8506_v3, %v12194_v32  ;;  %v12921_v3 = vld [vmem:[#allocation61_spill] sm:$0xff] }
 0x623   : > { %6706 = vst [vmem:[%s12359_s12] sm:$0xff] %v6674_v0  ;;  %v6677_v2 = vmax.f32 %v6645_v39, 0.0  ;;  %v6643_v4 = vadd.f32 %v12333_v41, %v6604_v27  ;;  %v6486_v61 = vadd.f32 %v6485_v17, %v6325_v62  ;;  %v6609_v26 = vmul.f32 %v12328_v38, %v6494_v10  ;;  %v12395_v10 = vpop.f32.mrf.mxu0 }
 0x624   : > { %v8758_v50 = vpop.f32.mrf.mxu1  ;;  %v8515_v39 = vadd.f32 %v12226_v19, %v12224_v63  ;;  %v6344_v63 = vadd.f32 %v8500_v51, %v12180_v1 }
 0x625   : > { %6709 = vst [vmem:[%s12359_s12 + $0x18] sm:$0xff] %v6677_v2  ;;  %v6675_v58 = vmax.f32 %v6643_v4, 0.0  ;;  %v6607_v59 = vmul.f32 %v12328_v38, %v6486_v61  ;;  %v6497_v31 = vadd.f32 %v8758_v50, %v6336_v33  ;;  %v6648_v20 = vadd.f32 %v12333_v41, %v6609_v26  ;;  %v12918_v61 = vld [vmem:[#allocation66_spill] sm:$0xff]  ;;  %v12919_v50 = vld [vmem:[#allocation53_spill] sm:$0xff] }
 0x626   : > { %v6488_v21 = vpop.f32.mrf.mxu1  ;;  %v8509_v33 = vadd.f32 %v12212_v12, %v12210_v9  ;;  %v8518_v60 = vadd.f32 %v12918_v61, %v12231_v40 }
 0x627   : > { %6707 = vst [vmem:[%s12359_s12 + $0x8] sm:$0xff] %v6675_v58  ;;  %v6646_v54 = vadd.f32 %v12333_v41, %v6607_v59  ;;  %v6610_v24 = vmul.f32 %v12328_v38, %v6497_v31  ;;  %v6489_v35 = vadd.f32 %v6488_v21, %v6328_v14  ;;  %v6680_v22 = vmax.f32 %v6648_v20, 0.0  ;;  %v12409_v59 = vpop.f32.mrf.mxu0  ;;  %v12920_v14 = vld [vmem:[#allocation60_spill] sm:$0xff] }
 0x628   : > { %v8761_v53 = vpop.f32.mrf.mxu1  ;;  %v6365_v58 = vadd.f32 %v8515_v39, %v12919_v50  ;;  %v8512_v20 = vadd.f32 %v12921_v3, %v12920_v14 }
 0x629   : > { %v6678_v13 = vmax.f32 %v6646_v54, 0.0  ;;  %v6649_v62 = vadd.f32 %v12333_v41, %v6610_v24  ;;  %v6608_v34 = vmul.f32 %v12328_v38, %v6489_v35  ;;  %v6510_v0 = vadd.f32 %v8761_v53, %v6349_v5  ;;  %6712 = vst [vmem:[%s12359_s12 + $0x30] sm:$0xff] %v6680_v22  ;;  %v12922_v54 = vld [vmem:[#allocation30_spill] sm:$0xff] }
 0x62a   : > { %v6501_v27 = vpop.f32.mrf.mxu1  ;;  %v6357_v24 = vadd.f32 %v8509_v33, %v12922_v54  ;;  %v8527_v22 = vadd.f32 %v12254_v28, %v12252_v37  ;;  %v8539_v54 = vadd.f32 %v12288_v56, %v12283_v45 }
 0x62b   : > { %6710 = vst [vmem:[%s12359_s12 + $0x20] sm:$0xff] %v6678_v13  ;;  %v6681_v8 = vmax.f32 %v6649_v62, 0.0  ;;  %v6647_v7 = vadd.f32 %v12333_v41, %v6608_v34  ;;  %v6613_v44 = vmul.f32 %v12328_v38, %v6510_v0  ;;  %v6502_v17 = vadd.f32 %v6501_v27, %v6341_v36  ;;  %v12923_v36 = vld [vmem:[#allocation34_spill] sm:$0xff]  ;;  %v12423_v62 = vpop.f32.mrf.mxu0 }
 0x62c   : > { %v8762_v42 = vpop.f32.mrf.mxu1  ;;  %v6368_v13 = vadd.f32 %v8518_v60, %v12923_v36 }
 0x62d   : > { %6713 = vst [vmem:[%s12359_s12 + $0x38] sm:$0xff] %v6681_v8  ;;  %v6679_v19 = vmax.f32 %v6647_v7, 0.0  ;;  %v6652_v32 = vadd.f32 %v12333_v41, %v6613_v44  ;;  %v6611_v2 = vmul.f32 %v12328_v38, %v6502_v17  ;;  %v6513_v4 = vadd.f32 %v8762_v42, %v6352_v23  ;;  %v12924_v23 = vld [vmem:[#allocation77_spill] sm:$0xff]  ;;  %v12437_v61 = vpop.f32.mrf.mxu0 }
 0x62e   : > { %v6504_v26 = vpop.f32.mrf.mxu1  ;;  %v8521_v8 = vadd.f32 %v12924_v23, %v12238_v55  ;;  %v12925_v44 = vld [vmem:[#allocation57_spill] sm:$0xff] }
 0x62f   : > { %6711 = vst [vmem:[%s12359_s12 + $0x28] sm:$0xff] %v6679_v19  ;;  %v6684_v9 = vmax.f32 %v6652_v32, 0.0  ;;  %v6650_v1 = vadd.f32 %v12333_v41, %v6611_v2  ;;  %v6614_v12 = vmul.f32 %v12328_v38, %v6513_v4  ;;  %v6505_v31 = vadd.f32 %v6504_v26, %v6344_v63  ;;  %v12926_v63 = vld [vmem:[#allocation47_spill] sm:$0xff] }
 0x630   : > { %v8765_v21 = vpop.f32.mrf.mxu1  ;;  %v6360_v17 = vadd.f32 %v8512_v20, %v12925_v44  ;;  %v8530_v19 = vadd.f32 %v12926_v63, %v12259_v48  ;;  %v12927_v2 = vld [vmem:[#allocation59_spill] sm:$0xff]  ;;  %v8542_v44 = vadd.f32 %v12298_v46, %v12293_v43 }
 0x631   : > { %6716 = vst [vmem:[%s12359_s12 + $0x50] sm:$0xff] %v6684_v9  ;;  %v6682_v40 = vmax.f32 %v6650_v1, 0.0  ;;  %v6653_v35 = vadd.f32 %v12333_v41, %v6614_v12  ;;  %v6612_v5 = vmul.f32 %v12328_v38, %v6505_v31  ;;  %v6526_v51 = vadd.f32 %v8765_v21, %v6365_v58  ;;  %v12928_v58 = vld [vmem:[#allocation73_spill] sm:$0xff]  ;;  %v12929_v9 = vld [vmem:[#allocation74_spill] sm:$0xff]  ;;  %v12930_v31 = vld [vmem:[#allocation56_spill] sm:$0xff] }
 0x632   : > { %v6517_v53 = vpop.f32.mrf.mxu1  ;;  %v6381_v4 = vadd.f32 %v8527_v22, %v12927_v2  ;;  %v8524_v1 = vadd.f32 %v12929_v9, %v12928_v58  ;;  %v6373_v14 = vadd.f32 %v8521_v8, %v12930_v31  ;;  %v12937_v9 = vld [vmem:[#allocation72_spill] sm:$0xff] }
 0x633   : > { %6714 = vst [vmem:[%s12359_s12 + $0x40] sm:$0xff] %v6682_v40  ;;  %v6685_v34 = vmax.f32 %v6653_v35, 0.0  ;;  %v6651_v0 = vadd.f32 %v12333_v41, %v6612_v5  ;;  %v6617_v39 = vmul.f32 %v12328_v38, %v6526_v51  ;;  %v6518_v27 = vadd.f32 %v6517_v53, %v6357_v24  ;;  %v12931_v40 = vld [vmem:[#allocation43_spill] sm:$0xff]  ;;  %v12451_v5 = vpop.f32.mrf.mxu0 }
 0x634   : > { %v8766_v7 = vpop.f32.mrf.mxu1  ;;  %v6384_v35 = vadd.f32 %v8530_v19, %v12931_v40 }
 0x635   : > { %6717 = vst [vmem:[%s12359_s12 + $0x58] sm:$0xff] %v6685_v34  ;;  %v6683_v37 = vmax.f32 %v6651_v0, 0.0  ;;  %v6656_v28 = vadd.f32 %v12333_v41, %v6617_v39  ;;  %v6615_v33 = vmul.f32 %v12328_v38, %v6518_v27  ;;  %v6529_v42 = vadd.f32 %v8766_v7, %v6368_v13  ;;  %v12932_v13 = vld [vmem:[#allocation51_spill] sm:$0xff]  ;;  %v12933_v34 = vld [vmem:[#allocation69_spill] sm:$0xff] }
 0x636   : > { %v6520_v32 = vpop.f32.mrf.mxu1  ;;  %v8533_v0 = vadd.f32 %v12933_v34, %v12932_v13  ;;  %v12934_v27 = vld [vmem:[#allocation39_spill] sm:$0xff]  ;;  %v8548_v34 = vadd.f32 %v12335_v49, %v12322_v47 }
 0x637   : > { %6715 = vst [vmem:[%s12359_s12 + $0x48] sm:$0xff] %v6683_v37  ;;  %v6688_v55 = vmax.f32 %v6656_v28, 0.0  ;;  %v6654_v60 = vadd.f32 %v12333_v41, %v6615_v33  ;;  %v6618_v26 = vmul.f32 %v12328_v38, %v6529_v42  ;;  %v6521_v50 = vadd.f32 %v6520_v32, %v6360_v17  ;;  %v8561_v28 = vpop.f32.mrf.mxu0  ;;  %v12935_v32 = vld [vmem:[#allocation55_spill] sm:$0xff] }
 0x638   : > { %v8769_v12 = vpop.f32.mrf.mxu1  ;;  %v6376_v23 = vadd.f32 %v8524_v1, %v12934_v27  ;;  %v6397_v37 = vadd.f32 %v8539_v54, %v12271_v29  ;;  %v8536_v2 = vadd.f32 %v12278_v25, %v12935_v32  ;;  %v6400_v1 = vadd.f32 %v8542_v44, %v12937_v9 }
 0x639   : > { %6720 = vst [vmem:[%s12359_s12 + $0x70] sm:$0xff] %v6688_v55  ;;  %v6686_v48 = vmax.f32 %v6654_v60, 0.0  ;;  %v6657_v3 = vadd.f32 %v12333_v41, %v6618_v26  ;;  %v6616_v20 = vmul.f32 %v12328_v38, %v6521_v50  ;;  %v6542_v21 = vadd.f32 %v8769_v12, %v6381_v4  ;;  %v12936_v55 = vld [vmem:[#allocation63_spill] sm:$0xff]  ;;  %v8562_v12 = vpop.f32.mrf.mxu0 }
 0x63a   : > { %v6533_v24 = vpop.f32.mrf.mxu1  ;;  %v6389_v60 = vadd.f32 %v8533_v0, %v12936_v55  ;;  %v8551_v50 = vadd.f32 %v12367_v30, %v12348_v57  ;;  %v8451_v0 = vadd.f32 %v12310_v6, %v12305_v15 }
 0x63b   : > { %6718 = vst [vmem:[%s12359_s12 + $0x60] sm:$0xff] %v6686_v48  ;;  %v6689_v51 = vmax.f32 %v6657_v3, 0.0  ;;  %v6655_v22 = vadd.f32 %v12333_v41, %v6616_v20  ;;  %v6621_v53 = vmul.f32 %v12328_v38, %v6542_v21  ;;  %v6534_v36 = vadd.f32 %v6533_v24, %v6373_v14  ;;  %v12938_v21 = vld [vmem:[#allocation65_spill] sm:$0xff] }
 0x63c   : > { %v8770_v39 = vpop.f32.mrf.mxu1  ;;  %v8545_v3 = vadd.f32 %v12314_v52, %v12303_v11  ;;  %v6392_v54 = vadd.f32 %v8536_v2, %v12938_v21  ;;  %v12944_v2 = vld [vmem:[#allocation76_spill] sm:$0xff] }
 0x63d   : > { %6721 = vst [vmem:[%s12359_s12 + $0x78] sm:$0xff] %v6689_v51  ;;  %v6687_v45 = vmax.f32 %v6655_v22, 0.0  ;;  %v6660_v56 = vadd.f32 %v12333_v41, %v6621_v53  ;;  %v6619_v8 = vmul.f32 %v12328_v38, %v6534_v36  ;;  %v6545_v7 = vadd.f32 %v8770_v39, %v6384_v35  ;;  %v8564_v53 = vpop.f32.mrf.mxu0 }
 0x63e   : > { %v6536_v17 = vpop.f32.mrf.mxu1  ;;  %v8554_v35 = vadd.f32 %v12395_v10, %v12380_v16  ;;  %v6413_v22 = vadd.f32 %v8551_v50, %v12291_v18  ;;  %v12939_v16 = vld [vmem:[#allocation58_spill] sm:$0xff] }
 0x63f   : > { %6719 = vst [vmem:[%s12359_s12 + $0x68] sm:$0xff] %v6687_v45  ;;  %v6692_v33 = vmax.f32 %v6660_v56, 0.0  ;;  %v6658_v42 = vadd.f32 %v12333_v41, %v6619_v8  ;;  %v6622_v63 = vmul.f32 %v12328_v38, %v6545_v7  ;;  %v6537_v19 = vadd.f32 %v6536_v17, %v6376_v23  ;;  %v12940_v7 = vld [vmem:[#allocation62_spill] sm:$0xff]  ;;  %v8565_v17 = vpop.f32.mrf.mxu0 }
 0x640   : > { %v8773_v4 = vpop.f32.mrf.mxu1  ;;  %v6405_v10 = vadd.f32 %v8545_v3, %v12939_v16  ;;  %v8563_v56 = vadd.f32 %v8562_v12, %v8561_v28  ;;  %v6416_v44 = vadd.f32 %v8554_v35, %v12940_v7 }
 0x641   : > { %6724 = vst [vmem:[%s12359_s12 + $0x90] sm:$0xff] %v6692_v33  ;;  %v6690_v43 = vmax.f32 %v6658_v42, 0.0  ;;  %v6661_v29 = vadd.f32 %v12333_v41, %v6622_v63  ;;  %v6620_v46 = vmul.f32 %v12328_v38, %v6537_v19  ;;  %v6558_v26 = vadd.f32 %v8773_v4, %v6397_v37  ;;  %v12941_v37 = vld [vmem:[#allocation54_spill] sm:$0xff]  ;;  %v12942_v63 = vld [vmem:[#allocation67_spill] sm:$0xff] }
 0x642   : > { %v6549_v58 = vpop.f32.mrf.mxu1  ;;  %v6268_v33 = vadd.f32 %v8451_v0, %v12941_v37  ;;  %v8557_v42 = vadd.f32 %v12423_v62, %v12409_v59  ;;  %v12943_v19 = vld [vmem:[#allocation70_spill] sm:$0xff]  ;;  %v6408_v4 = vadd.f32 %v8548_v34, %v12944_v2 }
 0x643   : > { %6722 = vst [vmem:[%s12359_s12 + $0x80] sm:$0xff] %v6690_v43  ;;  %v6693_v25 = vmax.f32 %v6661_v29, 0.0  ;;  %v6659_v31 = vadd.f32 %v12333_v41, %v6620_v46  ;;  %v6625_v14 = vmul.f32 %v12328_v38, %v6558_v26  ;;  %v6550_v48 = vadd.f32 %v6549_v58, %v6389_v60 }
 0x644   : > { %v8774_v20 = vpop.f32.mrf.mxu1  ;;  %v8454_v28 = vadd.f32 %v12943_v19, %v12942_v63  ;;  %v8566_v46 = vadd.f32 %v8565_v17, %v8564_v53  ;;  %v6429_v50 = vadd.f32 %v8563_v56, %v6268_v33 }
 0x645   : > { %6725 = vst [vmem:[%s12359_s12 + $0x98] sm:$0xff] %v6693_v25  ;;  %v6691_v57 = vmax.f32 %v6659_v31, 0.0  ;;  %v6664_v30 = vadd.f32 %v12333_v41, %v6625_v14  ;;  %v6623_v24 = vmul.f32 %v12328_v38, %v6550_v48  ;;  %v6561_v40 = vadd.f32 %v8774_v20, %v6400_v1  ;;  %v12945_v1 = vld [vmem:[#allocation49_spill] sm:$0xff]  ;;  %v12946_v14 = vld [vmem:[#allocation64_spill] sm:$0xff] }
 0x646   : > { %v6552_v51 = vpop.f32.mrf.mxu1  ;;  %v6271_v12 = vadd.f32 %v8454_v28, %v12945_v1  ;;  %v8560_v25 = vadd.f32 %v12451_v5, %v12437_v61  ;;  %v6421_v48 = vadd.f32 %v8557_v42, %v12946_v14 }
 0x647   : > { %6723 = vst [vmem:[%s12359_s12 + $0x88] sm:$0xff] %v6691_v57  ;;  %v6696_v11 = vmax.f32 %v6664_v30, 0.0  ;;  %v6662_v52 = vadd.f32 %v12333_v41, %v6623_v24  ;;  %v6626_v36 = vmul.f32 %v12328_v38, %v6561_v40  ;;  %v6553_v13 = vadd.f32 %v6552_v51, %v6392_v54  ;;  %v12947_v51 = vld [vmem:[#allocation68_spill] sm:$0xff] }
 0x648   : > { %v8777_v39 = vpop.f32.mrf.mxu1  ;;  %v6432_v30 = vadd.f32 %v8566_v46, %v6271_v12 }
 0x649   : > { %6728 = vst [vmem:[%s12359_s12 + $0xb0] sm:$0xff] %v6696_v11  ;;  %v6694_v18 = vmax.f32 %v6662_v52, 0.0  ;;  %v6665_v27 = vadd.f32 %v12333_v41, %v6626_v36  ;;  %v6624_v23 = vmul.f32 %v12328_v38, %v6553_v13  ;;  %v6574_v45 = vadd.f32 %v8777_v39, %v6413_v22 }
 0x64a   : > { %v6565_v8 = vpop.f32.mrf.mxu1  ;;  %v6424_v22 = vadd.f32 %v8560_v25, %v12947_v51 }
 0x64b   : > { %6726 = vst [vmem:[%s12359_s12 + $0xa0] sm:$0xff] %v6694_v18  ;;  %v6697_v49 = vmax.f32 %v6665_v27, 0.0  ;;  %v6663_v15 = vadd.f32 %v12333_v41, %v6624_v23  ;;  %v6629_v6 = vmul.f32 %v12328_v38, %v6574_v45  ;;  %v6566_v47 = vadd.f32 %v6565_v8, %v6405_v10 }
 0x64c   : > { %v8778_v32 = vpop.f32.mrf.mxu1 }
 0x64d   : > { %6729 = vst [vmem:[%s12359_s12 + $0xb8] sm:$0xff] %v6697_v49  ;;  %v6695_v55 = vmax.f32 %v6663_v15, 0.0  ;;  %v6668_v60 = vadd.f32 %v12333_v41, %v6629_v6  ;;  %v6627_v43 = vmul.f32 %v12328_v38, %v6566_v47  ;;  %v6577_v29 = vadd.f32 %v8778_v32, %v6416_v44 }
 0x64e   : > { %v6568_v26 = vpop.f32.mrf.mxu1 }
 0x64f   : > { %6727 = vst [vmem:[%s12359_s12 + $0xa8] sm:$0xff] %v6695_v55  ;;  %v6700_v59 = vmax.f32 %v6668_v60, 0.0  ;;  %v6666_v62 = vadd.f32 %v12333_v41, %v6627_v43  ;;  %v6630_v58 = vmul.f32 %v12328_v38, %v6577_v29  ;;  %v6569_v9 = vadd.f32 %v6568_v26, %v6408_v4 }
 0x650   : > { %v8781_v31 = vpop.f32.mrf.mxu1 }
 0x651   : > { %6732 = vst [vmem:[%s12359_s12 + $0xd0] sm:$0xff] %v6700_v59  ;;  %v6698_v3 = vmax.f32 %v6666_v62, 0.0  ;;  %v6669_v20 = vadd.f32 %v12333_v41, %v6630_v58  ;;  %v6628_v21 = vmul.f32 %v12328_v38, %v6569_v9  ;;  %v6590_v54 = vadd.f32 %v8781_v31, %v6429_v50 }
 0x652   : > { %v6581_v57 = vpop.f32.mrf.mxu1 }
 0x653   : > { %6730 = vst [vmem:[%s12359_s12 + $0xc0] sm:$0xff] %v6698_v3  ;;  %v6701_v24 = vmax.f32 %v6669_v20, 0.0  ;;  %v6667_v40 = vadd.f32 %v12333_v41, %v6628_v21  ;;  %v6633_v61 = vmul.f32 %v12328_v38, %v6590_v54  ;;  %v6582_v5 = vadd.f32 %v6581_v57, %v6421_v48 }
 0x654   : > { %v8782_v35 = vpop.f32.mrf.mxu1 }
 0x655   : > { %6733 = vst [vmem:[%s12359_s12 + $0xd8] sm:$0xff] %v6701_v24  ;;  %v6699_v53 = vmax.f32 %v6667_v40, 0.0  ;;  %v6672_v11 = vadd.f32 %v12333_v41, %v6633_v61  ;;  %v6631_v52 = vmul.f32 %v12328_v38, %v6582_v5  ;;  %v6593_v36 = vadd.f32 %v8782_v35, %v6432_v30 }
 0x656   : > { %v6584_v13 = vpop.f32.mrf.mxu1 }
 0x657   : > { %6731 = vst [vmem:[%s12359_s12 + $0xc8] sm:$0xff] %v6699_v53  ;;  %v6704_v34 = vmax.f32 %v6672_v11, 0.0  ;;  %v6670_v0 = vadd.f32 %v12333_v41, %v6631_v52  ;;  %v6634_v39 = vmul.f32 %v12328_v38, %v6593_v36  ;;  %v6585_v16 = vadd.f32 %v6584_v13, %v6424_v22 }
 0x659   : > { %6736 = vst [vmem:[%s12359_s12 + $0xf0] sm:$0xff] %v6704_v34  ;;  %v6702_v10 = vmax.f32 %v6670_v0, 0.0  ;;  %v6673_v18 = vadd.f32 %v12333_v41, %v6634_v39  ;;  %v6632_v27 = vmul.f32 %v12328_v38, %v6585_v16 }
 0x65b   : > { %6734 = vst [vmem:[%s12359_s12 + $0xe0] sm:$0xff] %v6702_v10  ;;  %v6705_v23 = vmax.f32 %v6673_v18, 0.0  ;;  %v6671_v45 = vadd.f32 %v12333_v41, %v6632_v27 }
 0x65d   : > { %6737 = vst [vmem:[%s12359_s12 + $0xf8] sm:$0xff] %v6705_v23  ;;  %v6703_v56 = vmax.f32 %v6671_v45, 0.0 }
 0x65f   : > { %6735 = vst [vmem:[%s12359_s12 + $0xe8] sm:$0xff] %v6703_v56 }
 0x660   : > { %9288 = shalt.err (!%p9285_p3)
}
 0x661   : > { %s9289_s19 = scalar_lea.hbm %s12543_s24, 4096  ;;  %s9293_s28 = scalar_lea.hbm %s12600_s10, 8192 }
 0x662   : > { %p9290_p8 = scmp.ne.s32.totalorder %s12543_s24, %s9289_s19  ;;  %p9294_p7 = scmp.lt.s32.totalorder %s12543_s24, %s12600_s10 }
 0x663   : > { %p9295_p1 = scmp.lt.s32.totalorder %s9293_s28, %s9289_s19 }
 0x664   : > { %p9291_p2 = pnand %p9290_p8, %p12948_p11 }
 0x665   : > { %p9296_p13 = por %p9295_p1, %p9294_p7 }
 0x666   : > { %p9292_p9 = pneg %p9291_p2 }
 0x668   : > { %p9297_p0 = pnand %p9296_p13, %p9292_p9 }
 0x66a   : > { %9300 = shalt.err (!%p9297_p0)
}
 0x66b   : > { %s9370_s3 = smov 128   ;;  %s9371_s0 = smov 8  }
 0x66c   : > { %8803 = dma.vmem_to_hbm [thread:$0]  (%p12948_p11), %s12545_s25, 4096, %s12543_s24, %s6739_s7, %s9370_s3, %s9370_s3, %s9371_s0  }
 0x66d PF: > { %s6767_s12 = sand.u32 1, %s9343_s13   ;;  %p12949_p5 = scmp.ne.s32.totalorder %s12681_s20, 0 }
 0x66e   : > { %p12950_p12 = scmp.ge.s32.totalorder %s9355_s16, 2  ;;  %s6768_s2 = scalar_lea.sflag [#allocation5], %s6767_s12 }
 0x670   : > { %p8826_p4 = pnand %p12950_p12, %p12949_p5 }
 0x672   : > { %p8827_p6 = pneg %p8826_p4 }
 0x674   : > { %9338 = dma.done.wait (%p8827_p6), %s6768_s2, 4096  }
 0x675   : > { %9340 = vsyncadd (%p8827_p6), %s6768_s2, 4294963200  ;;  %s12951_s16 = sld [smem:[#allocation22_spill]]  ;;  %s12954_s13 = smov %s9347_s14 }
 0x676   : > { %s12952_s30 = sld [smem:[#allocation21_spill]] }
 0x677   : > { %s12953_s15 = sld [smem:[#allocation23_spill]] }
 0x67b   : > { %p28_p10 = scmp.ge.s32.totalorder %s12951_s16, 4  }
 0x67c   : > { %s12955_s14 = smov %s12952_s30 }
 0x67d   :  { %30 = sbr.rel (!%p28_p10) target bundleno = 15 (0xf), region = 135 }
 0x682   :  { %6773 = vsyncpa [#allocation4], 1 }
 0x683   :  { %6775 = vsyncpa [#allocation4 + $0x1], 1 }
 0x684   :  { %6776 = vsyncpa [#allocation7], 1 }
 0x685   :  { %6778 = vsyncpa [#allocation7 + $0x1], 1 }
 0x686   :  { %6779 = vsyncpa [#allocation10], 1 }
 0x687   :  { %6780 = vsyncpa [#allocation13], 1 }
 0x688   :  { %6781 = vsyncpa [#allocation5], 1 }
 0x689   :  { %6783 = vsyncpa [#allocation5 + $0x1], 1 }

</bundles_post_ra>
